<compile_context>
chip_gen: v5e
topology: v5e:2x2
jax: 0.10.0
libtpu: 0.0.40
codegen_flags: <defaults>
</compile_context>

<pallas_src>
import jax
import jax.numpy as jnp
from jax.experimental import pallas as pl
from jax.experimental.pallas import tpu as pltpu

BN_EPS = 1e-5


def _round_up(v, m):
    return (v + m - 1) // m * m


def _make_kernel(n_real, num_layers):
    """Kernel factory. n_real = number of real (unpadded) nodes, static."""

    def kernel(x_ref, a_ref, wstk_ref, bgb_ref, out_ref, hsrc_ref, agg_ref):
        l = pl.program_id(0)            # GIN layer index
        i = pl.program_id(1)            # row-block index within the layer
        nblk = pl.num_programs(1)
        tm = a_ref.shape[0]             # rows per block (static)
        n_pad = agg_ref.shape[0]        # padded node count (static)

        # First grid step: seed the aggregation source with the padded bf16 node features.
        @pl.when((l == 0) & (i == 0))
        def _init():
            hsrc_ref[...] = x_ref[...]

        # Neighbour aggregation for this row block: (A + I) @ h, bf16 x bf16 -> f32 MXU.
        row0 = pl.multiple_of(i * tm, tm)
        agg_ref[pl.ds(row0, tm), :] = jnp.dot(
            a_ref[...], hsrc_ref[...], preferred_element_type=jnp.float32)

        # After the last row block of a layer, run the O(N*H) MLP / BN / ReLU stack with
        # global batch statistics over the n_real rows (padded rows masked out).
        @pl.when(i == nblk - 1)
        def _mlp():
            rows = jax.lax.broadcasted_iota(jnp.int32, (n_pad, 1), 0)
            mask = (rows < n_real).astype(jnp.float32)
            inv_n = jnp.float32(1.0 / n_real)

            def lin_bn_relu(h, w, grp):
                b, gamma, beta = grp[0:1, :], grp[1:2, :], grp[2:3, :]
                y = jnp.dot(h, w, preferred_element_type=jnp.float32) + b
                # two-pass (centred) variance: robust to |mean| >> std
                mean = jnp.sum(y * mask, axis=0, keepdims=True) * inv_n
                d = (y - mean) * mask
                var = jnp.sum(d * d, axis=0, keepdims=True) * inv_n
                y_hat = (y - mean) * jax.lax.rsqrt(var + BN_EPS)
                return jnp.maximum(y_hat * gamma + beta, 0.0)

            for layer in range(num_layers):          # static unroll -> static slab indices
                @pl.when(l == layer)
                def _run(layer=layer):
                    h = agg_ref[...]
                    h = lin_bn_relu(h, wstk_ref[2 * layer], bgb_ref[2 * layer])
                    h = lin_bn_relu(h, wstk_ref[2 * layer + 1], bgb_ref[2 * layer + 1])
                    if layer < num_layers - 1:
                        # next layer's aggregation source, stored directly as bf16
                        hsrc_ref[...] = h.astype(hsrc_ref.dtype)
                    else:
                        # merged heads: out = h @ [wmu | wls] + [bmu | bls] (lane-dense)
                        out_ref[...] = (
                            jnp.dot(h, wstk_ref[2 * num_layers],
                                    preferred_element_type=jnp.float32)
                            + bgb_ref[2 * num_layers, 0:1, :]
                        )

    return kernel


def vgae_encoder_pallas(x, adj, params, *, block_rows=None):
    """x: (N, in_ch) f32; adj: (N, N) f32 dense adjacency (A[dst, src] = multiplicity).

    Returns (mu, log_sigma), each (N, out_ch) f32.
    NB: bf16 adjacency is exact for integer edge multiplicities up to 256.
    """
    n, in_ch = x.shape
    hidden = params["w1a"].shape[1]
    out_ch = params["wmu"].shape[1]
    num_layers = 2
    f32 = jnp.float32

    # lane-dense padded width shared by activations, weight slabs and the merged head
    hp = _round_up(max(in_ch, hidden, 2 * out_ch), 128)
    # v5e: 128-aligned row blocks; v6e/v7x: 256 pays off once N is large
    tm = block_rows or (128 if n <= 1024 else 256)
    n_pad = _round_up(n, tm)

    # A_hat = A + I  (GINConv(train_eps=True), eps == 0), zero padded, bf16 (entries exact)
    a_hat = (jnp.zeros((n_pad, n_pad), f32)
             .at[:n, :n].set(adj.astype(f32) + jnp.eye(n, dtype=f32))
             .astype(jnp.bfloat16))

    x_pad = jnp.zeros((n_pad, hp), jnp.bfloat16).at[:n, :in_ch].set(x.astype(jnp.bfloat16))

    def pad_mat(w):
        return jnp.zeros((hp, hp), f32).at[: w.shape[0], : w.shape[1]].set(w)

    def pad_row(v):
        return jnp.zeros((1, hp), f32).at[:, : v.shape[1]].set(v)

    w_head = jnp.concatenate([params["wmu"], params["wls"]], axis=1)    # (H, 2*OUT)
    b_head = jnp.concatenate([params["bmu"], params["bls"]], axis=1)    # (1, 2*OUT)

    # 2*num_layers Linear slabs + merged head slab, all (hp, hp)
    wstk = jnp.stack([pad_mat(params["w1a"]), pad_mat(params["w1b"]),
                      pad_mat(params["w2a"]), pad_mat(params["w2b"]),
                      pad_mat(w_head)])

    def grp(b, g, be):   # [bias; gamma; beta]; gamma padded with 0 keeps padded cols at 0
        return jnp.concatenate([pad_row(b), pad_row(g), pad_row(be)], axis=0)

    zero_row = jnp.zeros((1, 2 * out_ch), f32)
    bgb = jnp.stack([
        grp(params["b1a"], params["g1a"], params["be1a"]),
        grp(params["b1b"], params["g1b"], params["be1b"]),
        grp(params["b2a"], params["g2a"], params["be2a"]),
        grp(params["b2b"], params["g2b"], params["be2b"]),
        grp(b_head, zero_row, zero_row),
    ])

    grid = (num_layers, n_pad // tm)

    # VMEM budget: double-buffered gridded operands + resident scratch, capped per chip.
    est = (2 * tm * n_pad * 2               # A row block, bf16, double-buffered
           + 2 * n_pad * hp * 2             # x, bf16
           + 2 * int(wstk.size) * 4 + 2 * int(bgb.size) * 4
           + 2 * n_pad * hp * 4             # output
           + n_pad * hp * (2 + 4))          # hsrc (bf16) + agg (f32) scratch
    est = int(est * 1.25) + (4 << 20)
    try:
        cap = int(pltpu.get_tpu_info().vmem_capacity_bytes) * 7 // 8
    except Exception:                        # best-effort query; v7x-safe fallback
        cap = 56 << 20
    vmem_limit = max(32 << 20, min(est, cap))

    out = pl.pallas_call(
        _make_kernel(n, num_layers),
        out_shape=jax.ShapeDtypeStruct((n_pad, hp), f32),
        grid_spec=pltpu.PrefetchScalarGridSpec(
            num_scalar_prefetch=0,
            grid=grid,
            in_specs=[
                pl.BlockSpec((n_pad, hp), lambda l, i: (0, 0)),        # x  (resident)
                pl.BlockSpec((tm, n_pad), lambda l, i: (i, 0)),        # A  (streamed rows)
                pl.BlockSpec((2 * num_layers + 1, hp, hp), lambda l, i: (0, 0, 0)),
                pl.BlockSpec((2 * num_layers + 1, 3, hp), lambda l, i: (0, 0, 0)),
            ],
            out_specs=pl.BlockSpec((n_pad, hp), lambda l, i: (0, 0)),  # [mu | log_sigma]
            scratch_shapes=[
                pltpu.VMEM((n_pad, hp), jnp.bfloat16),   # aggregation source h (bf16)
                pltpu.VMEM((n_pad, hp), jnp.float32),    # (A+I) @ h accumulator
            ],
        ),
        compiler_params=pltpu.CompilerParams(
            dimension_semantics=("arbitrary", "arbitrary"),
            vmem_limit_bytes=vmem_limit,
        ),
    )(x_pad, a_hat, wstk, bgb)

    return out[:n, :out_ch], out[:n, out_ch: 2 * out_ch]


# ----------------------------- reference (pure JAX) -----------------------------
def vgae_encoder_ref(x, adj, params, *, bf16_agg=False):
    """bf16_agg=False: full-f32 PyTorch semantics.
    bf16_agg=True : same mixed precision as the kernel (bf16 neighbour aggregation)."""
    n = x.shape[0]
    a_hat = adj + jnp.eye(n, dtype=adj.dtype)
    if bf16_agg:
        a_hat = a_hat.astype(jnp.bfloat16)

    def agg(h):
        if bf16_agg:
            h = h.astype(jnp.bfloat16)
        return jnp.dot(a_hat, h, preferred_element_type=jnp.float32)

    def lbr(h, w, b, g, be):
        y = jnp.dot(h, w, preferred_element_type=jnp.float32) + b
        m = jnp.mean(y, axis=0, keepdims=True)
        v = jnp.mean((y - m) ** 2, axis=0, keepdims=True)
        return jnp.maximum((y - m) * jax.lax.rsqrt(v + BN_EPS) * g + be, 0.0)

    h = agg(x)
    h = lbr(h, params["w1a"], params["b1a"], params["g1a"], params["be1a"])
    h = lbr(h, params["w1b"], params["b1b"], params["g1b"], params["be1b"])
    h = agg(h)
    h = lbr(h, params["w2a"], params["b2a"], params["g2a"], params["be2a"])
    h = lbr(h, params["w2b"], params["b2b"], params["g2b"], params["be2b"])
    mu = jnp.dot(h, params["wmu"], preferred_element_type=jnp.float32) + params["bmu"]
    ls = jnp.dot(h, params["wls"], preferred_element_type=jnp.float32) + params["bls"]
    return mu, ls


# ----------------------------- parameter init -----------------------------
def init_params(key, in_channels, hidden_channels, out_channels):
    ks = jax.random.split(key, 8)

    def lin(k, cin, cout):
        kw, kb = jax.random.split(k)
        w = jax.random.normal(kw, (cin, cout), jnp.float32) * 0.1
        b = jax.random.normal(kb, (1, cout), jnp.float32) * 0.1
        return w, b

    def bn(c):
        return jnp.ones((1, c), jnp.float32), jnp.zeros((1, c), jnp.float32)

    p = {}
    p["w1a"], p["b1a"] = lin(ks[0], in_channels, hidden_channels)
    p["g1a"], p["be1a"] = bn(hidden_channels)
    p["w1b"], p["b1b"] = lin(ks[1], hidden_channels, hidden_channels)
    p["g1b"], p["be1b"] = bn(hidden_channels)
    p["w2a"], p["b2a"] = lin(ks[2], hidden_channels, hidden_channels)
    p["g2a"], p["be2a"] = bn(hidden_channels)
    p["w2b"], p["b2b"] = lin(ks[3], hidden_channels, hidden_channels)
    p["g2b"], p["be2b"] = bn(hidden_channels)
    p["wmu"], p["bmu"] = lin(ks[4], hidden_channels, out_channels)
    p["wls"], p["bls"] = lin(ks[5], hidden_channels, out_channels)
    return p


if __name__ == "__main__":
    N = 200           # nodes -> pads to 2 row blocks of 128 (exercises grid + row masking)
    IN_CH = 8
    HIDDEN = 32
    OUT_CH = 16
    # num_layers = 2 (kernel is written for 2 GIN layers)

    key = jax.random.PRNGKey(0)
    kx, kp = jax.random.split(key)
    x = jax.random.normal(kx, (N, IN_CH), jnp.float32)

    # simple deterministic graph: bidirectional ring on N nodes
    src = jnp.arange(N, dtype=jnp.int32)
    dst = (src + 1) % N
    edge_index = jnp.stack([jnp.concatenate([src, dst]), jnp.concatenate([dst, src])])

    # dense adjacency with scatter-add semantics (matches PyG sum aggregation)
    adj = jnp.zeros((N, N), jnp.float32).at[edge_index[1], edge_index[0]].add(1.0)

    params = init_params(kp, IN_CH, HIDDEN, OUT_CH)

    mu, log_sigma = jax.block_until_ready(vgae_encoder_pallas(x, adj, params))
    assert mu.shape == (N, OUT_CH) and log_sigma.shape == (N, OUT_CH)

    # 1) kernel exactness vs. a matched-precision reference (same bf16 aggregation)
    mu_m, ls_m = vgae_encoder_ref(x, adj, params, bf16_agg=True)
    assert jnp.allclose(mu, mu_m, atol=2e-3, rtol=2e-3)
    assert jnp.allclose(log_sigma, ls_m, atol=2e-3, rtol=2e-3)

    # 2) fidelity to the full-f32 PyTorch semantics (bf16 neighbour-aggregation envelope)
    mu_f, ls_f = vgae_encoder_ref(x, adj, params, bf16_agg=False)
    assert jnp.allclose(mu, mu_f, atol=5e-2, rtol=5e-2)
    assert jnp.allclose(log_sigma, ls_f, atol=5e-2, rtol=5e-2)

    print("KERNEL_OK")
</pallas_src>

<mosaic_0001>
module attributes {stable_mosaic.version = 11 : i64} {
  func.func @kernel(%arg0: i32, %arg1: i32, %arg2: memref<256x128xbf16, #tpu.memory_space<vmem>>, %arg3: memref<128x256xbf16, #tpu.memory_space<vmem>>, %arg4: memref<5x128x128xf32, #tpu.memory_space<vmem>>, %arg5: memref<5x3x128xf32, #tpu.memory_space<vmem>>, %arg6: memref<256x128xf32, #tpu.memory_space<vmem>>, %arg7: memref<256x128xbf16, #tpu.memory_space<vmem>>, %arg8: memref<256x128xf32, #tpu.memory_space<vmem>>) attributes {dimension_semantics = [#tpu.dimension_semantics<arbitrary>, #tpu.dimension_semantics<arbitrary>], iteration_bounds = array<i64: 2, 2>, scalar_prefetch = 0 : i64, scratch_operands = 2 : i64, tpu.core_type = #tpu.core_type<tc>, window_params = [{pipeline_mode = #tpu.pipeline_mode<synchronous>, transform_indices = @transform_0, window_bounds = array<i64: 256, 128>}, {transform_indices = @transform_1, window_bounds = array<i64: 128, 256>}, {pipeline_mode = #tpu.pipeline_mode<synchronous>, transform_indices = @transform_2, window_bounds = array<i64: 5, 128, 128>}, {pipeline_mode = #tpu.pipeline_mode<synchronous>, transform_indices = @transform_3, window_bounds = array<i64: 5, 3, 128>}, {pipeline_mode = #tpu.pipeline_mode<synchronous>, transform_indices = @transform_4, window_bounds = array<i64: 256, 128>}]} {
    %c0_i32 = arith.constant 0 : i32
    %0 = arith.cmpi eq, %arg0, %c0_i32 : i32
    %c0_i32_0 = arith.constant 0 : i32
    %1 = arith.cmpi eq, %arg1, %c0_i32_0 : i32
    %2 = arith.andi %0, %1 : i1
    %3 = arith.extui %2 : i1 to i32
    %c0_i32_1 = arith.constant 0 : i32
    %4 = arith.cmpi ne, %3, %c0_i32_1 : i32
    scf.if %4 {
      %c0_7 = arith.constant 0 : index
      %c0_8 = arith.constant 0 : index
      %15 = vector.load %arg2[%c0_7, %c0_8] : memref<256x128xbf16, #tpu.memory_space<vmem>>, vector<256x128xbf16>
      %c0_9 = arith.constant 0 : index
      %c0_10 = arith.constant 0 : index
      %16 = vector.load %arg7[%c0_9, %c0_10] : memref<256x128xbf16, #tpu.memory_space<vmem>>, vector<256x128xbf16>
      tpu.vector_store %arg7[%c0_9, %c0_10], %15 {strides = array<i32>} : memref<256x128xbf16, #tpu.memory_space<vmem>>, vector<256x128xbf16>,
    } else {
    }
    %c128_i32 = arith.constant 128 : i32
    %5 = arith.muli %arg1, %c128_i32 : i32
    %6 = tpu.assume_multiple %5, 128 : i32
    %c0 = arith.constant 0 : index
    %c0_2 = arith.constant 0 : index
    %7 = vector.load %arg3[%c0, %c0_2] : memref<128x256xbf16, #tpu.memory_space<vmem>>, vector<128x256xbf16>
    %c0_3 = arith.constant 0 : index
    %c0_4 = arith.constant 0 : index
    %8 = vector.load %arg7[%c0_3, %c0_4] : memref<256x128xbf16, #tpu.memory_space<vmem>>, vector<256x128xbf16>
    %cst = arith.constant dense<0.000000e+00> : vector<128x128xf32>
    %9 = tpu.matmul %7, %8, %cst {dimension_numbers = #tpu.dot_dimension_numbers<[1], [0], [0], [1], [0, 0, 1, 1], [], []>} : vector<128x256xbf16>, vector<256x128xbf16>, vector<128x128xf32> -> vector<128x128xf32>
    %10 = arith.index_cast %6 : i32 to index
    %c0_5 = arith.constant 0 : index
    %11 = vector.load %arg8[%10, %c0_5] : memref<256x128xf32, #tpu.memory_space<vmem>>, vector<128x128xf32>
    tpu.vector_store %arg8[%10, %c0_5], %9 {strides = array<i32>} : memref<256x128xf32, #tpu.memory_space<vmem>>, vector<128x128xf32>,
    %c1_i32 = arith.constant 1 : i32
    %12 = arith.cmpi eq, %arg1, %c1_i32 : i32
    %13 = arith.extui %12 : i1 to i32
    %c0_i32_6 = arith.constant 0 : i32
    %14 = arith.cmpi ne, %13, %c0_i32_6 : i32
    scf.if %14 {
      %15 = tpu.iota {dimensions = array<i32: 0>} : vector<256x1xi32>
      %c200_i32 = arith.constant 200 : i32
      %16 = vector.broadcast %c200_i32 : i32 to vector<256x1xi32>
      %17 = arith.cmpi slt, %15, %16 : vector<256x1xi32>
      %18 = arith.extui %17 : vector<256x1xi1> to vector<256x1xi32>
      %19 = arith.sitofp %18 : vector<256x1xi32> to vector<256x1xf32>
      %c0_i32_7 = arith.constant 0 : i32
      %20 = arith.cmpi eq, %arg0, %c0_i32_7 : i32
      %21 = arith.extui %20 : i1 to i32
      %cst_8 = arith.constant 5.000000e-03 : f32
      %c0_i32_9 = arith.constant 0 : i32
      %22 = arith.cmpi ne, %21, %c0_i32_9 : i32
      scf.if %22 {
        %c0_13 = arith.constant 0 : index
        %c0_14 = arith.constant 0 : index
        %26 = vector.load %arg8[%c0_13, %c0_14] : memref<256x128xf32, #tpu.memory_space<vmem>>, vector<256x128xf32>
        %c0_15 = arith.constant 0 : index
        %c0_16 = arith.constant 0 : index
        %c0_17 = arith.constant 0 : index
        %27 = vector.load %arg4[%c0_15, %c0_16, %c0_17] : memref<5x128x128xf32, #tpu.memory_space<vmem>>, vector<1x128x128xf32>
        %28 = vector.shape_cast %27 : vector<1x128x128xf32> to vector<128x128xf32>
        %c0_18 = arith.constant 0 : index
        %c0_19 = arith.constant 0 : index
        %c0_20 = arith.constant 0 : index
        %29 = vector.load %arg5[%c0_18, %c0_19, %c0_20] : memref<5x3x128xf32, #tpu.memory_space<vmem>>, vector<1x3x128xf32>
        %30 = vector.shape_cast %29 : vector<1x3x128xf32> to vector<3x128xf32>
        %31 = vector.extract_strided_slice %30 {offsets = [0, 0], sizes = [1, 128], strides = [1, 1]} : vector<3x128xf32> to vector<1x128xf32>
        %32 = vector.extract_strided_slice %30 {offsets = [1, 0], sizes = [1, 128], strides = [1, 1]} : vector<3x128xf32> to vector<1x128xf32>
        %33 = vector.extract_strided_slice %30 {offsets = [2, 0], sizes = [1, 128], strides = [1, 1]} : vector<3x128xf32> to vector<1x128xf32>
        %cst_21 = arith.constant dense<0.000000e+00> : vector<256x128xf32>
        %34 = tpu.matmul %26, %28, %cst_21 {dimension_numbers = #tpu.dot_dimension_numbers<[1], [0], [0], [1], [0, 0, 1, 1], [], []>} : vector<256x128xf32>, vector<128x128xf32>, vector<256x128xf32> -> vector<256x128xf32>
        %35 = vector.broadcast %31 : vector<1x128xf32> to vector<256x128xf32>
        %36 = arith.addf %34, %35 : vector<256x128xf32>
        %37 = vector.broadcast %19 : vector<256x1xf32> to vector<256x128xf32>
        %38 = arith.mulf %36, %37 : vector<256x128xf32>
        %cst_22 = arith.constant dense<0.000000e+00> : vector<128xf32>
        %39 = vector.multi_reduction <add>, %38, %cst_22 [0] : vector<256x128xf32> to vector<128xf32>
        %40 = vector.shape_cast %39 : vector<128xf32> to vector<1x128xf32>
        %41 = vector.broadcast %cst_8 : f32 to vector<1x128xf32>
        %42 = arith.mulf %40, %41 : vector<1x128xf32>
        %43 = vector.broadcast %42 : vector<1x128xf32> to vector<256x128xf32>
        %44 = arith.subf %36, %43 : vector<256x128xf32>
        %45 = vector.broadcast %19 : vector<256x1xf32> to vector<256x128xf32>
        %46 = arith.mulf %44, %45 : vector<256x128xf32>
        %47 = arith.mulf %46, %46 : vector<256x128xf32>
        %cst_23 = arith.constant dense<0.000000e+00> : vector<128xf32>
        %48 = vector.multi_reduction <add>, %47, %cst_23 [0] : vector<256x128xf32> to vector<128xf32>
        %49 = vector.shape_cast %48 : vector<128xf32> to vector<1x128xf32>
        %50 = vector.broadcast %cst_8 : f32 to vector<1x128xf32>
        %51 = arith.mulf %49, %50 : vector<1x128xf32>
        %52 = vector.broadcast %42 : vector<1x128xf32> to vector<256x128xf32>
        %53 = arith.subf %36, %52 : vector<256x128xf32>
        %cst_24 = arith.constant 9.99999974E-6 : f32
        %54 = vector.broadcast %cst_24 : f32 to vector<1x128xf32>
        %55 = arith.addf %51, %54 : vector<1x128xf32>
        %56 = math.rsqrt %55 : vector<1x128xf32>
        %57 = vector.broadcast %56 : vector<1x128xf32> to vector<256x128xf32>
        %58 = arith.mulf %53, %57 : vector<256x128xf32>
        %59 = vector.broadcast %32 : vector<1x128xf32> to vector<256x128xf32>
        %60 = arith.mulf %58, %59 : vector<256x128xf32>
        %61 = vector.broadcast %33 : vector<1x128xf32> to vector<256x128xf32>
        %62 = arith.addf %60, %61 : vector<256x128xf32>
        %cst_25 = arith.constant 0.000000e+00 : f32
        %63 = vector.broadcast %cst_25 : f32 to vector<256x128xf32>
        %64 = arith.maximumf %62, %63 : vector<256x128xf32>
        %c1 = arith.constant 1 : index
        %c0_26 = arith.constant 0 : index
        %c0_27 = arith.constant 0 : index
        %65 = vector.load %arg4[%c1, %c0_26, %c0_27] : memref<5x128x128xf32, #tpu.memory_space<vmem>>, vector<1x128x128xf32>
        %66 = vector.shape_cast %65 : vector<1x128x128xf32> to vector<128x128xf32>
        %c1_28 = arith.constant 1 : index
        %c0_29 = arith.constant 0 : index
        %c0_30 = arith.constant 0 : index
        %67 = vector.load %arg5[%c1_28, %c0_29, %c0_30] : memref<5x3x128xf32, #tpu.memory_space<vmem>>, vector<1x3x128xf32>
        %68 = vector.shape_cast %67 : vector<1x3x128xf32> to vector<3x128xf32>
        %69 = vector.extract_strided_slice %68 {offsets = [0, 0], sizes = [1, 128], strides = [1, 1]} : vector<3x128xf32> to vector<1x128xf32>
        %70 = vector.extract_strided_slice %68 {offsets = [1, 0], sizes = [1, 128], strides = [1, 1]} : vector<3x128xf32> to vector<1x128xf32>
        %71 = vector.extract_strided_slice %68 {offsets = [2, 0], sizes = [1, 128], strides = [1, 1]} : vector<3x128xf32> to vector<1x128xf32>
        %cst_31 = arith.constant dense<0.000000e+00> : vector<256x128xf32>
        %72 = tpu.matmul %64, %66, %cst_31 {dimension_numbers = #tpu.dot_dimension_numbers<[1], [0], [0], [1], [0, 0, 1, 1], [], []>} : vector<256x128xf32>, vector<128x128xf32>, vector<256x128xf32> -> vector<256x128xf32>
        %73 = vector.broadcast %69 : vector<1x128xf32> to vector<256x128xf32>
        %74 = arith.addf %72, %73 : vector<256x128xf32>
        %75 = vector.broadcast %19 : vector<256x1xf32> to vector<256x128xf32>
        %76 = arith.mulf %74, %75 : vector<256x128xf32>
        %cst_32 = arith.constant dense<0.000000e+00> : vector<128xf32>
        %77 = vector.multi_reduction <add>, %76, %cst_32 [0] : vector<256x128xf32> to vector<128xf32>
        %78 = vector.shape_cast %77 : vector<128xf32> to vector<1x128xf32>
        %79 = vector.broadcast %cst_8 : f32 to vector<1x128xf32>
        %80 = arith.mulf %78, %79 : vector<1x128xf32>
        %81 = vector.broadcast %80 : vector<1x128xf32> to vector<256x128xf32>
        %82 = arith.subf %74, %81 : vector<256x128xf32>
        %83 = vector.broadcast %19 : vector<256x1xf32> to vector<256x128xf32>
        %84 = arith.mulf %82, %83 : vector<256x128xf32>
        %85 = arith.mulf %84, %84 : vector<256x128xf32>
        %cst_33 = arith.constant dense<0.000000e+00> : vector<128xf32>
        %86 = vector.multi_reduction <add>, %85, %cst_33 [0] : vector<256x128xf32> to vector<128xf32>
        %87 = vector.shape_cast %86 : vector<128xf32> to vector<1x128xf32>
        %88 = vector.broadcast %cst_8 : f32 to vector<1x128xf32>
        %89 = arith.mulf %87, %88 : vector<1x128xf32>
        %90 = vector.broadcast %80 : vector<1x128xf32> to vector<256x128xf32>
        %91 = arith.subf %74, %90 : vector<256x128xf32>
        %cst_34 = arith.constant 9.99999974E-6 : f32
        %92 = vector.broadcast %cst_34 : f32 to vector<1x128xf32>
        %93 = arith.addf %89, %92 : vector<1x128xf32>
        %94 = math.rsqrt %93 : vector<1x128xf32>
        %95 = vector.broadcast %94 : vector<1x128xf32> to vector<256x128xf32>
        %96 = arith.mulf %91, %95 : vector<256x128xf32>
        %97 = vector.broadcast %70 : vector<1x128xf32> to vector<256x128xf32>
        %98 = arith.mulf %96, %97 : vector<256x128xf32>
        %99 = vector.broadcast %71 : vector<1x128xf32> to vector<256x128xf32>
        %100 = arith.addf %98, %99 : vector<256x128xf32>
        %cst_35 = arith.constant 0.000000e+00 : f32
        %101 = vector.broadcast %cst_35 : f32 to vector<256x128xf32>
        %102 = arith.maximumf %100, %101 : vector<256x128xf32>
        %103 = arith.truncf %102 : vector<256x128xf32> to vector<256x128xbf16>
        %c0_36 = arith.constant 0 : index
        %c0_37 = arith.constant 0 : index
        %104 = vector.load %arg7[%c0_36, %c0_37] : memref<256x128xbf16, #tpu.memory_space<vmem>>, vector<256x128xbf16>
        tpu.vector_store %arg7[%c0_36, %c0_37], %103 {strides = array<i32>} : memref<256x128xbf16, #tpu.memory_space<vmem>>, vector<256x128xbf16>,
      } else {
      }
      %c1_i32_10 = arith.constant 1 : i32
      %23 = arith.cmpi eq, %arg0, %c1_i32_10 : i32
      %24 = arith.extui %23 : i1 to i32
      %cst_11 = arith.constant 5.000000e-03 : f32
      %c0_i32_12 = arith.constant 0 : i32
      %25 = arith.cmpi ne, %24, %c0_i32_12 : i32
      scf.if %25 {
        %c0_13 = arith.constant 0 : index
        %c0_14 = arith.constant 0 : index
        %26 = vector.load %arg8[%c0_13, %c0_14] : memref<256x128xf32, #tpu.memory_space<vmem>>, vector<256x128xf32>
        %c2 = arith.constant 2 : index
        %c0_15 = arith.constant 0 : index
        %c0_16 = arith.constant 0 : index
        %27 = vector.load %arg4[%c2, %c0_15, %c0_16] : memref<5x128x128xf32, #tpu.memory_space<vmem>>, vector<1x128x128xf32>
        %28 = vector.shape_cast %27 : vector<1x128x128xf32> to vector<128x128xf32>
        %c2_17 = arith.constant 2 : index
        %c0_18 = arith.constant 0 : index
        %c0_19 = arith.constant 0 : index
        %29 = vector.load %arg5[%c2_17, %c0_18, %c0_19] : memref<5x3x128xf32, #tpu.memory_space<vmem>>, vector<1x3x128xf32>
        %30 = vector.shape_cast %29 : vector<1x3x128xf32> to vector<3x128xf32>
        %31 = vector.extract_strided_slice %30 {offsets = [0, 0], sizes = [1, 128], strides = [1, 1]} : vector<3x128xf32> to vector<1x128xf32>
        %32 = vector.extract_strided_slice %30 {offsets = [1, 0], sizes = [1, 128], strides = [1, 1]} : vector<3x128xf32> to vector<1x128xf32>
        %33 = vector.extract_strided_slice %30 {offsets = [2, 0], sizes = [1, 128], strides = [1, 1]} : vector<3x128xf32> to vector<1x128xf32>
        %cst_20 = arith.constant dense<0.000000e+00> : vector<256x128xf32>
        %34 = tpu.matmul %26, %28, %cst_20 {dimension_numbers = #tpu.dot_dimension_numbers<[1], [0], [0], [1], [0, 0, 1, 1], [], []>} : vector<256x128xf32>, vector<128x128xf32>, vector<256x128xf32> -> vector<256x128xf32>
        %35 = vector.broadcast %31 : vector<1x128xf32> to vector<256x128xf32>
        %36 = arith.addf %34, %35 : vector<256x128xf32>
        %37 = vector.broadcast %19 : vector<256x1xf32> to vector<256x128xf32>
        %38 = arith.mulf %36, %37 : vector<256x128xf32>
        %cst_21 = arith.constant dense<0.000000e+00> : vector<128xf32>
        %39 = vector.multi_reduction <add>, %38, %cst_21 [0] : vector<256x128xf32> to vector<128xf32>
        %40 = vector.shape_cast %39 : vector<128xf32> to vector<1x128xf32>
        %41 = vector.broadcast %cst_11 : f32 to vector<1x128xf32>
        %42 = arith.mulf %40, %41 : vector<1x128xf32>
        %43 = vector.broadcast %42 : vector<1x128xf32> to vector<256x128xf32>
        %44 = arith.subf %36, %43 : vector<256x128xf32>
        %45 = vector.broadcast %19 : vector<256x1xf32> to vector<256x128xf32>
        %46 = arith.mulf %44, %45 : vector<256x128xf32>
        %47 = arith.mulf %46, %46 : vector<256x128xf32>
        %cst_22 = arith.constant dense<0.000000e+00> : vector<128xf32>
        %48 = vector.multi_reduction <add>, %47, %cst_22 [0] : vector<256x128xf32> to vector<128xf32>
        %49 = vector.shape_cast %48 : vector<128xf32> to vector<1x128xf32>
        %50 = vector.broadcast %cst_11 : f32 to vector<1x128xf32>
        %51 = arith.mulf %49, %50 : vector<1x128xf32>
        %52 = vector.broadcast %42 : vector<1x128xf32> to vector<256x128xf32>
        %53 = arith.subf %36, %52 : vector<256x128xf32>
        %cst_23 = arith.constant 9.99999974E-6 : f32
        %54 = vector.broadcast %cst_23 : f32 to vector<1x128xf32>
        %55 = arith.addf %51, %54 : vector<1x128xf32>
        %56 = math.rsqrt %55 : vector<1x128xf32>
        %57 = vector.broadcast %56 : vector<1x128xf32> to vector<256x128xf32>
        %58 = arith.mulf %53, %57 : vector<256x128xf32>
        %59 = vector.broadcast %32 : vector<1x128xf32> to vector<256x128xf32>
        %60 = arith.mulf %58, %59 : vector<256x128xf32>
        %61 = vector.broadcast %33 : vector<1x128xf32> to vector<256x128xf32>
        %62 = arith.addf %60, %61 : vector<256x128xf32>
        %cst_24 = arith.constant 0.000000e+00 : f32
        %63 = vector.broadcast %cst_24 : f32 to vector<256x128xf32>
        %64 = arith.maximumf %62, %63 : vector<256x128xf32>
        %c3 = arith.constant 3 : index
        %c0_25 = arith.constant 0 : index
        %c0_26 = arith.constant 0 : index
        %65 = vector.load %arg4[%c3, %c0_25, %c0_26] : memref<5x128x128xf32, #tpu.memory_space<vmem>>, vector<1x128x128xf32>
        %66 = vector.shape_cast %65 : vector<1x128x128xf32> to vector<128x128xf32>
        %c3_27 = arith.constant 3 : index
        %c0_28 = arith.constant 0 : index
        %c0_29 = arith.constant 0 : index
        %67 = vector.load %arg5[%c3_27, %c0_28, %c0_29] : memref<5x3x128xf32, #tpu.memory_space<vmem>>, vector<1x3x128xf32>
        %68 = vector.shape_cast %67 : vector<1x3x128xf32> to vector<3x128xf32>
        %69 = vector.extract_strided_slice %68 {offsets = [0, 0], sizes = [1, 128], strides = [1, 1]} : vector<3x128xf32> to vector<1x128xf32>
        %70 = vector.extract_strided_slice %68 {offsets = [1, 0], sizes = [1, 128], strides = [1, 1]} : vector<3x128xf32> to vector<1x128xf32>
        %71 = vector.extract_strided_slice %68 {offsets = [2, 0], sizes = [1, 128], strides = [1, 1]} : vector<3x128xf32> to vector<1x128xf32>
        %cst_30 = arith.constant dense<0.000000e+00> : vector<256x128xf32>
        %72 = tpu.matmul %64, %66, %cst_30 {dimension_numbers = #tpu.dot_dimension_numbers<[1], [0], [0], [1], [0, 0, 1, 1], [], []>} : vector<256x128xf32>, vector<128x128xf32>, vector<256x128xf32> -> vector<256x128xf32>
        %73 = vector.broadcast %69 : vector<1x128xf32> to vector<256x128xf32>
        %74 = arith.addf %72, %73 : vector<256x128xf32>
        %75 = vector.broadcast %19 : vector<256x1xf32> to vector<256x128xf32>
        %76 = arith.mulf %74, %75 : vector<256x128xf32>
        %cst_31 = arith.constant dense<0.000000e+00> : vector<128xf32>
        %77 = vector.multi_reduction <add>, %76, %cst_31 [0] : vector<256x128xf32> to vector<128xf32>
        %78 = vector.shape_cast %77 : vector<128xf32> to vector<1x128xf32>
        %79 = vector.broadcast %cst_11 : f32 to vector<1x128xf32>
        %80 = arith.mulf %78, %79 : vector<1x128xf32>
        %81 = vector.broadcast %80 : vector<1x128xf32> to vector<256x128xf32>
        %82 = arith.subf %74, %81 : vector<256x128xf32>
        %83 = vector.broadcast %19 : vector<256x1xf32> to vector<256x128xf32>
        %84 = arith.mulf %82, %83 : vector<256x128xf32>
        %85 = arith.mulf %84, %84 : vector<256x128xf32>
        %cst_32 = arith.constant dense<0.000000e+00> : vector<128xf32>
        %86 = vector.multi_reduction <add>, %85, %cst_32 [0] : vector<256x128xf32> to vector<128xf32>
        %87 = vector.shape_cast %86 : vector<128xf32> to vector<1x128xf32>
        %88 = vector.broadcast %cst_11 : f32 to vector<1x128xf32>
        %89 = arith.mulf %87, %88 : vector<1x128xf32>
        %90 = vector.broadcast %80 : vector<1x128xf32> to vector<256x128xf32>
        %91 = arith.subf %74, %90 : vector<256x128xf32>
        %cst_33 = arith.constant 9.99999974E-6 : f32
        %92 = vector.broadcast %cst_33 : f32 to vector<1x128xf32>
        %93 = arith.addf %89, %92 : vector<1x128xf32>
        %94 = math.rsqrt %93 : vector<1x128xf32>
        %95 = vector.broadcast %94 : vector<1x128xf32> to vector<256x128xf32>
        %96 = arith.mulf %91, %95 : vector<256x128xf32>
        %97 = vector.broadcast %70 : vector<1x128xf32> to vector<256x128xf32>
        %98 = arith.mulf %96, %97 : vector<256x128xf32>
        %99 = vector.broadcast %71 : vector<1x128xf32> to vector<256x128xf32>
        %100 = arith.addf %98, %99 : vector<256x128xf32>
        %cst_34 = arith.constant 0.000000e+00 : f32
        %101 = vector.broadcast %cst_34 : f32 to vector<256x128xf32>
        %102 = arith.maximumf %100, %101 : vector<256x128xf32>
        %c4 = arith.constant 4 : index
        %c0_35 = arith.constant 0 : index
        %c0_36 = arith.constant 0 : index
        %103 = vector.load %arg4[%c4, %c0_35, %c0_36] : memref<5x128x128xf32, #tpu.memory_space<vmem>>, vector<1x128x128xf32>
        %104 = vector.shape_cast %103 : vector<1x128x128xf32> to vector<128x128xf32>
        %cst_37 = arith.constant dense<0.000000e+00> : vector<256x128xf32>
        %105 = tpu.matmul %102, %104, %cst_37 {dimension_numbers = #tpu.dot_dimension_numbers<[1], [0], [0], [1], [0, 0, 1, 1], [], []>} : vector<256x128xf32>, vector<128x128xf32>, vector<256x128xf32> -> vector<256x128xf32>
        %c4_38 = arith.constant 4 : index
        %c0_39 = arith.constant 0 : index
        %c0_40 = arith.constant 0 : index
        %106 = vector.load %arg5[%c4_38, %c0_39, %c0_40] : memref<5x3x128xf32, #tpu.memory_space<vmem>>, vector<1x1x128xf32>
        %107 = vector.shape_cast %106 : vector<1x1x128xf32> to vector<1x128xf32>
        %108 = vector.broadcast %107 : vector<1x128xf32> to vector<256x128xf32>
        %109 = arith.addf %105, %108 : vector<256x128xf32>
        %c0_41 = arith.constant 0 : index
        %c0_42 = arith.constant 0 : index
        %110 = vector.load %arg6[%c0_41, %c0_42] : memref<256x128xf32, #tpu.memory_space<vmem>>, vector<256x128xf32>
        tpu.vector_store %arg6[%c0_41, %c0_42], %109 {strides = array<i32>} : memref<256x128xf32, #tpu.memory_space<vmem>>, vector<256x128xf32>,
      } else {
      }
    } else {
    }
    return
  }
  func.func @transform_0(%arg0: i32, %arg1: i32) -> (i32, i32) {
    %c0_i32 = arith.constant 0 : i32
    %c0_i32_0 = arith.constant 0 : i32
    %c0_i32_1 = arith.constant 0 : i32
    return %c0_i32, %c0_i32_0 : i32, i32
  }
  func.func @transform_1(%arg0: i32, %arg1: i32) -> (i32, i32) {
    %c0_i32 = arith.constant 0 : i32
    %c0_i32_0 = arith.constant 0 : i32
    return %arg1, %c0_i32 : i32, i32
  }
  func.func @transform_2(%arg0: i32, %arg1: i32) -> (i32, i32, i32) {
    %c0_i32 = arith.constant 0 : i32
    %c0_i32_0 = arith.constant 0 : i32
    %c0_i32_1 = arith.constant 0 : i32
    %c0_i32_2 = arith.constant 0 : i32
    return %c0_i32, %c0_i32_0, %c0_i32_1 : i32, i32, i32
  }
  func.func @transform_3(%arg0: i32, %arg1: i32) -> (i32, i32, i32) {
    %c0_i32 = arith.constant 0 : i32
    %c0_i32_0 = arith.constant 0 : i32
    %c0_i32_1 = arith.constant 0 : i32
    %c0_i32_2 = arith.constant 0 : i32
    return %c0_i32, %c0_i32_0, %c0_i32_1 : i32, i32, i32
  }
  func.func @transform_4(%arg0: i32, %arg1: i32) -> (i32, i32) {
    %c0_i32 = arith.constant 0 : i32
    %c0_i32_0 = arith.constant 0 : i32
    %c0_i32_1 = arith.constant 0 : i32
    return %c0_i32, %c0_i32_0 : i32, i32
  }
}

</mosaic_0001>

<bundles_post_ra>
// kernel: tpu_custom_call.1
= control target key start
LH: loop header
LB: loop body
LE: loop exit
PB: predicated region body
PF: predicated region fallthrough
CT: control target
= control target key end

     0   :  { %s6002_s0 = inlined_call_operand.hbm [shape: bf16[256,128], index: 0, kind: input, shape index: {}]   ;;  %s6003_s1 = inlined_call_operand.hbm [shape: bf16[256,256], index: 1, kind: input, shape index: {}]   ;;  %s6004_s2 = inlined_call_operand.hbm [shape: f32[5,128,128], index: 2, kind: input, shape index: {}]   ;;  %s6005_s3 = inlined_call_operand.hbm [shape: f32[5,3,128], index: 3, kind: input, shape index: {}]   ;;  %s6006_s4 = inlined_call_operand.hbm [shape: f32[256,128], index: 4, kind: output, shape index: {}]  }
   0x1   :  { %6009 = sst [smem:[#allocation18_spill]] %s6002_s0 }
   0x2   :  { %9 = vsyncpa [#allocation5], 0 }
   0x3   :  { %10 = vsyncpa [#allocation8], 0 }
   0x4   :  { %12 = vsyncpa [#allocation8 + $0x1], 0 }
   0x5   :  { %13 = vsyncpa [#allocation11], 0 }
   0x6   :  { %14 = vsyncpa [#allocation6], 0  ;;  %s3896_s15 = smov 0   ;;  %s3898_s16 = smov 0  }
   0x7   :  { %s3900_s17 = smov 0   ;;  %s3902_s18 = smov 0  }
   0x8   :  { %s3904_s19 = smov 0   ;;  %s3906_s20 = smov 0  }
   0x9   :  { %s3908_s21 = smov 0   ;;  %s3910_s22 = smov 0  }
   0xa LB: > { %s3935_s23 = sadd.s32 4294967295, %s3859_s22   ;;  %p73_p0 = scmp.ne.s32.totalorder %s3835_s16, %s3831_s15  ;;  %s3859_s22 = sphi %s3910_s22, %s20_s22   ;;  %s3855_s21 = sphi %s3908_s21, %s6023_s21   ;;  %s3851_s20 = sphi %s3906_s20, %s6022_s20   ;;  %s3847_s19 = sphi %s3904_s19, %s6021_s19   ;;  %s3843_s18 = sphi %s3902_s18, %s6020_s18   ;;  %s3839_s17 = sphi %s3900_s17, %s6019_s17   ;;  %s3835_s16 = sphi %s3898_s16, %s6018_s16   ;;  %s3831_s15 = sphi %s3896_s15, %s6017_s15  }
   0xb   : > { %p74_p1 = scmp.eq.s32.totalorder %s3935_s23, 0  ;;  %p3130_p2 = scmp.ge.s32.totalorder %s3859_s22, 1 }
   0xc   : > { %p147_p3 = scmp.lt.s32.totalorder %s3859_s22, 5  ;;  %s172_s27 = sshll.u32 %s6004_s2, 4  ;;  %s173_s27 = int_to_ptr.hbm [resolvable:$true] %s172_s27 }
   0xd   : > { %p3943_p4 = por %p74_p1, %p73_p0  ;;  %s3861_s29 = smov [#allocation9]  }
   0xe   : > { %p3950_p5 = pnand %p3130_p2, %p147_p3  ;;  %s174_s30 = sshll.u32 %s3861_s29, 4  ;;  %s175_s30 = int_to_ptr.vmem [resolvable:$true] %s174_s30 }
   0xf   : > { %s6007_s6 = smov 128   ;;  %s6008_s7 = smov 8  }
  0x10   : > { %p3523_p6 = pneg %p3950_p5  ;;  %s6013_s0 = sld [smem:[#allocation18_spill]] }
  0x11   : > { %s3864_s11 = smov [#allocation4]   ;;  %s3865_s13 = smov 64  }
  0x12   : > { %p3958_p7 = pnand %p3523_p6, %p74_p1  ;;  %s160_s12 = sshll.u32 %s3864_s11, 4  ;;  %s161_s12 = int_to_ptr.vmem [resolvable:$true] %s160_s12 }
  0x13   : > { %s3866_s14 = smov 4   ;;  %s186_s26 = sshll.u32 %s6005_s3, 4  ;;  %s187_s26 = int_to_ptr.hbm [resolvable:$true] %s186_s26 }
  0x14   : > { %3529 = dma.hbm_to_vmem [thread:$0]  (!%p3958_p7), %s173_s27, 10240, %s175_s30, [#allocation8], %s6007_s6, %s6007_s6, %s6008_s7  }
  0x15   : > { %s3867_s27 = smov [#allocation10]   ;;  %s29_s30 = sadd.s32 1, %s3851_s20 }
  0x16   : > { %s158_s10 = sshll.u32 %s6013_s0, 4  ;;  %s188_s29 = sshll.u32 %s3867_s27, 4  ;;  %s159_s10 = int_to_ptr.hbm [resolvable:$true] %s158_s10  ;;  %s189_s29 = int_to_ptr.vmem [resolvable:$true] %s188_s29 }
  0x17   : > { %3526 = dma.hbm_to_vmem [thread:$0]  (!%p3958_p7), %s159_s10, 2048, %s161_s12, [#allocation5], %s3865_s13, %s3865_s13, %s3866_s14  }
  0x18   : > { %3532 = dma.hbm_to_vmem [thread:$0]  (!%p3958_p7), %s187_s26, 320, %s189_s29, [#allocation11], %s3865_s13, %s3865_s13, %s3866_s14  }
  0x19   : > { %p30_p8 = scmp.ge.s32.totalorder %s29_s30, 2  ;;  %s32_s8 = sadd.s32 1, %s3855_s21 }
  0x1a   : > { %s60_s9 = sadd.s32 1, %s3839_s17  ;;  %p67_p9 = scmp.ne.s32.totalorder %s3839_s17, %s3835_s16 }
  0x1b   : > { %s6025_s30 = smov (%p30_p8, %s29_s30), 0  ;;  %s6027_s8 = smov (!%p30_p8, %s32_s8), %s3855_s21 }
  0x1c   : > { %s57_s10 = ssub.s32 %s3851_s20, %s6025_s30  ;;  %p68_p10 = scmp.eq.s32.totalorder %s3859_s22, 0 }
  0x1d   : > { %p34_p11 = scmp.ge.s32.totalorder %s6027_s8, 2  ;;  %p58_p12 = scmp.eq.s32.totalorder %s57_s10, 0 }
  0x1e   : > { %p3988_p13 = por %p68_p10, %p67_p9  ;;  %p3540_p0 = scmp.lt.s32.totalorder %s3859_s22, 4 }
  0x1f   : > { %s6029_s8 = smov (%p34_p11, %s6027_s8), 0  ;;  %s202_s12 = sand.u32 1, %s3859_s22  }
  0x20   : > { %s3996_s11 = scalar_select %p58_p12, %s3839_s17, %s60_s9  }
  0x21   : > { %s204_s13 = sand.u32 1, %s3839_s17   ;;  %s3281_s15 = sshll.u32 %s3851_s20, 7 }
  0x22   : > { %s3135_s14 = sshll.u32 %s204_s13, 7  ;;  %s212_s27 = scalar_lea.hbm %s6003_s1, %s3281_s15 }
  0x23   : > { %s206_s29 = scalar_lea.vmem [#allocation7], %s3135_s14  ;;  %s213_s6 = sshll.u32 %s212_s27, 4  ;;  %s214_s6 = int_to_ptr.hbm [resolvable:$true] %s213_s6 }
  0x24   : > { %s215_s10 = sshll.u32 %s206_s29, 4  ;;  %p3534_p2 = pnand %p3540_p0, %p3988_p13  ;;  %s216_s10 = int_to_ptr.vmem [resolvable:$true] %s215_s10 }
  0x25   : > { %s203_s7 = scalar_lea.sflag [#allocation8], %s202_s12  ;;  %s6015_s0 = smov 8  }
  0x26   : > { %s6016_s9 = smov 128   ;;  %227 = sbr.rel (%p3950_p5) target bundleno = 2468 (0x9a4), region = 36 }
  0x27   : > { %3536 = dma.hbm_to_vmem [thread:$0]  (!%p3534_p2), %s214_s6, 2048, %s216_s10, %s203_s7, %s6016_s9, %s6016_s9, %s6015_s0  }
  0x2b   : > { %3810 = dma.done.wait (%p74_p1), [#allocation5], 2048  }
  0x2c   : > { %3812 = vsyncadd (%p74_p1), [#allocation5], 4294965248  ;;  %s234_s5 = sand.u32 1, %s3935_s23   ;;  %s236_s13 = sand.u32 1, %s3835_s16  }
  0x2d   : > { %s3141_s14 = sshll.u32 %s236_s13, 7  ;;  %s235_s12 = scalar_lea.sflag [#allocation8], %s234_s5 }
  0x2e   : > { %s4019_s15 = scalar_lea.vmem [#allocation7], %s3141_s14 }
  0x2f   : > { %3814 = dma.done.wait (%p3943_p4), %s235_s12, 2048  }
  0x30   : > { %3816 = vsyncadd (%p3943_p4), %s235_s12, 4294965248 }
  0x31   : > { %3818 = dma.done.wait (%p74_p1), [#allocation8], 10240  }
  0x32   : > { %3820 = vsyncadd (%p74_p1), [#allocation8], 4294957056 }
  0x33   : > { %3822 = dma.done.wait (%p74_p1), [#allocation11], 320  }
  0x34   : > { %3824 = vsyncadd (%p74_p1), [#allocation11], 4294966976  ;;  %p270_p3 = scmp.eq.s32.totalorder %s3847_s19, 0  ;;  %p271_p5 = scmp.eq.s32.totalorder %s3843_s18, 0 }
  0x36   : > { %p272_p6 = pnand %p271_p5, %p270_p3 }
  0x38   : > { %275 = sbr.rel (%p272_p6) target bundleno = 78 (0x4e), region = 56 }
  0x3d   : > { %v276_v0 = vld [vmem:[#allocation4] sm:$0xff]   ;;  %v278_v1 = vld [vmem:[#allocation4 + $0x8] sm:$0xff]   ;;  %v280_v2 = vld [vmem:[#allocation4 + $0x10] sm:$0xff]  }
  0x3e   : > { %308 = vst [vmem:[#allocation2] sm:$0xff] %v276_v0   ;;  %v282_v3 = vld [vmem:[#allocation4 + $0x18] sm:$0xff]   ;;  %v284_v4 = vld [vmem:[#allocation4 + $0x20] sm:$0xff]   ;;  %v286_v5 = vld [vmem:[#allocation4 + $0x28] sm:$0xff]  }
  0x3f   : > { %310 = vst [vmem:[#allocation2 + $0x8] sm:$0xff] %v278_v1   ;;  %v288_v6 = vld [vmem:[#allocation4 + $0x30] sm:$0xff]   ;;  %v290_v7 = vld [vmem:[#allocation4 + $0x38] sm:$0xff]   ;;  %v292_v8 = vld [vmem:[#allocation4 + $0x40] sm:$0xff]  }
  0x40   : > { %312 = vst [vmem:[#allocation2 + $0x10] sm:$0xff] %v280_v2   ;;  %v294_v9 = vld [vmem:[#allocation4 + $0x48] sm:$0xff]   ;;  %v296_v10 = vld [vmem:[#allocation4 + $0x50] sm:$0xff]   ;;  %v298_v11 = vld [vmem:[#allocation4 + $0x58] sm:$0xff]  }
  0x41   : > { %314 = vst [vmem:[#allocation2 + $0x18] sm:$0xff] %v282_v3   ;;  %v300_v12 = vld [vmem:[#allocation4 + $0x60] sm:$0xff]   ;;  %v302_v13 = vld [vmem:[#allocation4 + $0x68] sm:$0xff]   ;;  %v304_v14 = vld [vmem:[#allocation4 + $0x70] sm:$0xff]  }
  0x42   : > { %316 = vst [vmem:[#allocation2 + $0x20] sm:$0xff] %v284_v4   ;;  %v306_v15 = vld [vmem:[#allocation4 + $0x78] sm:$0xff]  }
  0x43   : > { %318 = vst [vmem:[#allocation2 + $0x28] sm:$0xff] %v286_v5  }
  0x44   : > { %320 = vst [vmem:[#allocation2 + $0x30] sm:$0xff] %v288_v6  }
  0x45   : > { %322 = vst [vmem:[#allocation2 + $0x38] sm:$0xff] %v290_v7  }
  0x46   : > { %324 = vst [vmem:[#allocation2 + $0x40] sm:$0xff] %v292_v8  }
  0x47   : > { %326 = vst [vmem:[#allocation2 + $0x48] sm:$0xff] %v294_v9  }
  0x48   : > { %328 = vst [vmem:[#allocation2 + $0x50] sm:$0xff] %v296_v10  }
  0x49   : > { %330 = vst [vmem:[#allocation2 + $0x58] sm:$0xff] %v298_v11  }
  0x4a   : > { %332 = vst [vmem:[#allocation2 + $0x60] sm:$0xff] %v300_v12  }
  0x4b   : > { %334 = vst [vmem:[#allocation2 + $0x68] sm:$0xff] %v302_v13  }
  0x4c   : > { %336 = vst [vmem:[#allocation2 + $0x70] sm:$0xff] %v304_v14  }
  0x4d   : > { %338 = vst [vmem:[#allocation2 + $0x78] sm:$0xff] %v306_v15  }
  0x4e PF: > { %v3305_v16 = vld [vmem:[#allocation2 + $0x38] sm:$0xff]  ;;  %v3304_v18 = vld [vmem:[#allocation2 + $0x30] sm:$0xff]  ;;  %v3303_v20 = vld [vmem:[#allocation2 + $0x28] sm:$0xff]  ;;  %s3144_s0 = sshll.u32 %s3843_s18, 7  ;;  %p3273_p1 = scmp.ne.s32.totalorder %s3843_s18, 1 }
  0x4f   : > { %565 = vmatpush.bf16.msra.mxu0 %v3305_v16  ;;  %3409 = vmatpush.bf16.msra.mxu2 %v3305_v16  ;;  %v3302_v22 = vld [vmem:[#allocation2 + $0x20] sm:$0xff]  ;;  %v3301_v24 = vld [vmem:[#allocation2 + $0x18] sm:$0xff]  ;;  %v3300_v26 = vld [vmem:[#allocation2 + $0x10] sm:$0xff]  ;;  %s4068_s24 = scalar_lea.vmem [#allocation3], %s3144_s0  ;;  %p3274_p4 = scmp.ne.s32.totalorder (!%p3273_p1), %s3847_s19, 0 }
  0x50   : > { %v3309_v25 = vld [vmem:[#allocation2 + $0x58] sm:$0xff]  ;;  %v3308_v27 = vld [vmem:[#allocation2 + $0x50] sm:$0xff]  ;;  %v3299_v28 = vld [vmem:[#allocation2 + $0x8] sm:$0xff] }
  0x51   : > { %v3310_v23 = vld [vmem:[#allocation2 + $0x60] sm:$0xff]  ;;  %v3307_v29 = vld [vmem:[#allocation2 + $0x48] sm:$0xff]  ;;  %v3155_v44 = vld [vmem:[%s4019_s15 + $0x10] sm:$0xf] }
  0x52   : > { %v3311_v21 = vld [vmem:[#allocation2 + $0x68] sm:$0xff]  ;;  %v3298_v30 = vld [vmem:[#allocation2] sm:$0xff]  ;;  %v3285_v45 = vld [vmem:[%s4019_s15 + $0x14] sm:$0xf0] }
  0x53   : > { %v3312_v19 = vld [vmem:[#allocation2 + $0x70] sm:$0xff]  ;;  %566 = vmatpush.bf16.msra.mxu0 %v3304_v18  ;;  %3410 = vmatpush.bf16.msra.mxu2 %v3304_v18  ;;  %v3306_v31 = vld [vmem:[#allocation2 + $0x40] sm:$0xff]  ;;  %v3283_v33 = vld [vmem:[%s4019_s15 + $0x4] sm:$0xf0]  ;;  %v3156_v52 = vor.u32 %v3285_v45, %v3155_v44 }
  0x54   : > { %v3313_v17 = vld [vmem:[#allocation2 + $0x78] sm:$0xff]  ;;  %v3147_v32 = vld [vmem:[%s4019_s15] sm:$0xf]  ;;  %v3291_v35 = vld [vmem:[%s4019_s15 + $0x44] sm:$0xf0] }
  0x55   : > { %614 = vmatpush.bf16.msra.mxu1 %v3313_v17  ;;  %3417 = vmatpush.bf16.msra.mxu3 %v3313_v17  ;;  %v3179_v34 = vld [vmem:[%s4019_s15 + $0x40] sm:$0xf]  ;;  %v3282_v36 = vld [vmem:[%s4019_s15 + $0x4] sm:$0xf]  ;;  %v3149_v37 = vld [vmem:[%s4019_s15 + $0x8] sm:$0xf0]  ;;  %v3148_v40 = vor.u32 %v3283_v33, %v3147_v32 }
  0x56   : > { %v3290_v38 = vld [vmem:[%s4019_s15 + $0x44] sm:$0xf]  ;;  %v3181_v39 = vld [vmem:[%s4019_s15 + $0x48] sm:$0xf0]  ;;  %v3180_v41 = vor.u32 %v3291_v35, %v3179_v34  ;;  %v3152_v42 = vor.u32 %v3282_v36, %v3149_v37  ;;  %v3187_v46 = vld [vmem:[%s4019_s15 + $0x50] sm:$0xf] }
  0x57   : > { %567 = vmatpush.bf16.msra.mxu0 %v3303_v20  ;;  %3411 = vmatpush.bf16.msra.mxu2 %v3303_v20  ;;  %v3184_v43 = vor.u32 %v3290_v38, %v3181_v39  ;;  %v3293_v47 = vld [vmem:[%s4019_s15 + $0x54] sm:$0xf0]  ;;  %v3284_v48 = vld [vmem:[%s4019_s15 + $0x14] sm:$0xf]  ;;  %v3157_v49 = vld [vmem:[%s4019_s15 + $0x18] sm:$0xf0] }
  0x58   : > { %v3292_v50 = vld [vmem:[%s4019_s15 + $0x54] sm:$0xf]  ;;  %v3189_v51 = vld [vmem:[%s4019_s15 + $0x58] sm:$0xf0]  ;;  %v3188_v53 = vor.u32 %v3293_v47, %v3187_v46  ;;  %v3160_v54 = vor.u32 %v3284_v48, %v3157_v49  ;;  %v3163_v56 = vld [vmem:[%s4019_s15 + $0x20] sm:$0xf] }
  0x59   : > { %615 = vmatpush.bf16.msra.mxu1 %v3312_v19  ;;  %3418 = vmatpush.bf16.msra.mxu3 %v3312_v19  ;;  %v3192_v55 = vor.u32 %v3292_v50, %v3189_v51  ;;  %v3287_v57 = vld [vmem:[%s4019_s15 + $0x24] sm:$0xf0]  ;;  %v3195_v58 = vld [vmem:[%s4019_s15 + $0x60] sm:$0xf]  ;;  %v3286_v60 = vld [vmem:[%s4019_s15 + $0x24] sm:$0xf] }
  0x5a   : > { %v3295_v59 = vld [vmem:[%s4019_s15 + $0x64] sm:$0xf0]  ;;  %v3165_v61 = vld [vmem:[%s4019_s15 + $0x28] sm:$0xf0]  ;;  %v3294_v62 = vld [vmem:[%s4019_s15 + $0x64] sm:$0xf]  ;;  %v3164_v0 = vor.u32 %v3287_v57, %v3163_v56 }
  0x5b   : > { %568 = vmatpush.bf16.msra.mxu0 %v3302_v22  ;;  %3412 = vmatpush.bf16.msra.mxu2 %v3302_v22  ;;  %v3197_v63 = vld [vmem:[%s4019_s15 + $0x68] sm:$0xf0]  ;;  %v3196_v1 = vor.u32 %v3295_v59, %v3195_v58  ;;  %v3168_v2 = vor.u32 %v3286_v60, %v3165_v61  ;;  %v3171_v4 = vld [vmem:[%s4019_s15 + $0x30] sm:$0xf]  ;;  %v3289_v5 = vld [vmem:[%s4019_s15 + $0x34] sm:$0xf0] }
  0x5c   : > { %v3200_v3 = vor.u32 %v3294_v62, %v3197_v63  ;;  %v3203_v6 = vld [vmem:[%s4019_s15 + $0x70] sm:$0xf]  ;;  %v3297_v7 = vld [vmem:[%s4019_s15 + $0x74] sm:$0xf0]  ;;  %v3288_v8 = vld [vmem:[%s4019_s15 + $0x34] sm:$0xf]  ;;  %v3172_v12 = vor.u32 %v3289_v5, %v3171_v4 }
  0x5d   : > { %616 = vmatpush.bf16.msra.mxu1 %v3311_v21  ;;  %3419 = vmatpush.bf16.msra.mxu3 %v3311_v21  ;;  %v3173_v9 = vld [vmem:[%s4019_s15 + $0x38] sm:$0xf0]  ;;  %v3296_v10 = vld [vmem:[%s4019_s15 + $0x74] sm:$0xf]  ;;  %v3204_v13 = vor.u32 %v3297_v7, %v3203_v6 }
  0x5e   : > { %v3205_v11 = vld [vmem:[%s4019_s15 + $0x78] sm:$0xf0]  ;;  %v3176_v14 = vor.u32 %v3288_v8, %v3173_v9 }
  0x5f   : > { %569 = vmatpush.bf16.msra.mxu0 %v3301_v24  ;;  %3413 = vmatpush.bf16.msra.mxu2 %v3301_v24  ;;  %v3208_v15 = vor.u32 %v3296_v10, %v3205_v11 }
  0x61   : > { %617 = vmatpush.bf16.msra.mxu1 %v3310_v23  ;;  %3420 = vmatpush.bf16.msra.mxu3 %v3310_v23 }
  0x63   : > { %570 = vmatpush.bf16.msra.mxu0 %v3300_v26  ;;  %3414 = vmatpush.bf16.msra.mxu2 %v3300_v26 }
  0x65   : > { %618 = vmatpush.bf16.msra.mxu1 %v3309_v25  ;;  %3421 = vmatpush.bf16.msra.mxu3 %v3309_v25 }
  0x67   : > { %571 = vmatpush.bf16.msra.mxu0 %v3299_v28  ;;  %3415 = vmatpush.bf16.msra.mxu2 %v3299_v28 }
  0x69   : > { %619 = vmatpush.bf16.msra.mxu1 %v3308_v27  ;;  %3422 = vmatpush.bf16.msra.mxu3 %v3308_v27 }
  0x6b   : > { %572 = vmatpush.bf16.msra.mxu0 %v3298_v30  ;;  %3416 = vmatpush.bf16.msra.mxu2 %v3298_v30 }
  0x6d   : > { %620 = vmatpush.bf16.msra.mxu1 %v3307_v29  ;;  %3423 = vmatpush.bf16.msra.mxu3 %v3307_v29 }
  0x6e   : > { %573 = vmatmul.bf16.vlgmr.msra.gmra.mxu0 %v3148_v40  ;;  %593 = vmatmul.bf16.vlgmr.msra.gmra.mxu2 %v3180_v41 }
  0x71   : > { %621 = vmatpush.bf16.msra.mxu1 %v3306_v31  ;;  %3424 = vmatpush.bf16.msra.mxu3 %v3306_v31 }
  0x74   : > { %622 = vmatmul.bf16.vlgmr.msra.gmra.mxu1 %v3152_v42  ;;  %642 = vmatmul.bf16.vlgmr.msra.gmra.mxu3 %v3184_v43 }
  0x7e   : > { %578 = vmatmul.bf16.gmra.mxu0 %v3156_v52  ;;  %598 = vmatmul.bf16.gmra.mxu2 %v3188_v53 }
  0x84   : > { %627 = vmatmul.bf16.gmra.mxu1 %v3160_v54  ;;  %647 = vmatmul.bf16.gmra.mxu3 %v3192_v55 }
  0x8e   : > { %583 = vmatmul.bf16.gmra.mxu0 %v3164_v0  ;;  %603 = vmatmul.bf16.gmra.mxu2 %v3196_v1 }
  0x94   : > { %632 = vmatmul.bf16.gmra.mxu1 %v3168_v2  ;;  %652 = vmatmul.bf16.gmra.mxu3 %v3200_v3 }
  0x9e   : > { %588 = vmatmul.bf16.gmra.mxu0 %v3172_v12  ;;  %608 = vmatmul.bf16.gmra.mxu2 %v3204_v13 }
  0xa4   : > { %637 = vmatmul.bf16.gmra.mxu1 %v3176_v14  ;;  %657 = vmatmul.bf16.gmra.mxu3 %v3208_v15 }
  0xeb   : > { %v574_v16 = vpop.f32.mrf.mxu0 }
  0xf1   : > { %v623_v17 = vpop.f32.mrf.mxu1  ;;  %v594_v19 = vpop.f32.mrf.mxu2 }
  0xf2   : > { %v624_v18 = vadd.f32 %v623_v17, %v574_v16 }
  0xf3   : > { %v576_v22 = vpop.f32.mrf.mxu0 }
  0xf4   : > { %664 = vst [vmem:[%s4068_s24] sm:$0xff] %v624_v18 }
  0xf7   : > { %v643_v20 = vpop.f32.mrf.mxu3 }
  0xf8   : > { %v644_v21 = vadd.f32 %v643_v20, %v594_v19 }
  0xf9   : > { %v625_v23 = vpop.f32.mrf.mxu1  ;;  %v596_v25 = vpop.f32.mrf.mxu2 }
  0xfa   : > { %672 = vst [vmem:[%s4068_s24 + $0x40] sm:$0xff] %v644_v21  ;;  %v626_v24 = vadd.f32 %v625_v23, %v576_v22 }
  0xfb   : > { %v579_v28 = vpop.f32.mrf.mxu0 }
  0xfc   : > { %665 = vst [vmem:[%s4068_s24 + $0x8] sm:$0xff] %v626_v24 }
  0xff   : > { %v645_v26 = vpop.f32.mrf.mxu3 }
 0x100   : > { %v646_v27 = vadd.f32 %v645_v26, %v596_v25 }
 0x101   : > { %v628_v29 = vpop.f32.mrf.mxu1  ;;  %v599_v31 = vpop.f32.mrf.mxu2 }
 0x102   : > { %673 = vst [vmem:[%s4068_s24 + $0x48] sm:$0xff] %v646_v27  ;;  %v629_v30 = vadd.f32 %v628_v29, %v579_v28 }
 0x103   : > { %v581_v34 = vpop.f32.mrf.mxu0 }
 0x104   : > { %666 = vst [vmem:[%s4068_s24 + $0x10] sm:$0xff] %v629_v30 }
 0x107   : > { %v648_v32 = vpop.f32.mrf.mxu3 }
 0x108   : > { %v649_v33 = vadd.f32 %v648_v32, %v599_v31 }
 0x109   : > { %v630_v35 = vpop.f32.mrf.mxu1  ;;  %v601_v37 = vpop.f32.mrf.mxu2 }
 0x10a   : > { %674 = vst [vmem:[%s4068_s24 + $0x50] sm:$0xff] %v649_v33  ;;  %v631_v36 = vadd.f32 %v630_v35, %v581_v34 }
 0x10b   : > { %v584_v40 = vpop.f32.mrf.mxu0 }
 0x10c   : > { %667 = vst [vmem:[%s4068_s24 + $0x18] sm:$0xff] %v631_v36 }
 0x10f   : > { %v650_v38 = vpop.f32.mrf.mxu3 }
 0x110   : > { %v651_v39 = vadd.f32 %v650_v38, %v601_v37 }
 0x111   : > { %v633_v41 = vpop.f32.mrf.mxu1  ;;  %v604_v43 = vpop.f32.mrf.mxu2 }
 0x112   : > { %675 = vst [vmem:[%s4068_s24 + $0x58] sm:$0xff] %v651_v39  ;;  %v634_v42 = vadd.f32 %v633_v41, %v584_v40 }
 0x113   : > { %v586_v46 = vpop.f32.mrf.mxu0 }
 0x114   : > { %668 = vst [vmem:[%s4068_s24 + $0x20] sm:$0xff] %v634_v42 }
 0x117   : > { %v653_v44 = vpop.f32.mrf.mxu3 }
 0x118   : > { %v654_v45 = vadd.f32 %v653_v44, %v604_v43 }
 0x119   : > { %v635_v47 = vpop.f32.mrf.mxu1  ;;  %v606_v49 = vpop.f32.mrf.mxu2 }
 0x11a   : > { %676 = vst [vmem:[%s4068_s24 + $0x60] sm:$0xff] %v654_v45  ;;  %v636_v48 = vadd.f32 %v635_v47, %v586_v46 }
 0x11b   : > { %v589_v52 = vpop.f32.mrf.mxu0 }
 0x11c   : > { %669 = vst [vmem:[%s4068_s24 + $0x28] sm:$0xff] %v636_v48 }
 0x11f   : > { %v655_v50 = vpop.f32.mrf.mxu3 }
 0x120   : > { %v656_v51 = vadd.f32 %v655_v50, %v606_v49 }
 0x121   : > { %v638_v53 = vpop.f32.mrf.mxu1  ;;  %v609_v55 = vpop.f32.mrf.mxu2 }
 0x122   : > { %677 = vst [vmem:[%s4068_s24 + $0x68] sm:$0xff] %v656_v51  ;;  %v639_v54 = vadd.f32 %v638_v53, %v589_v52 }
 0x123   : > { %v591_v58 = vpop.f32.mrf.mxu0 }
 0x124   : > { %670 = vst [vmem:[%s4068_s24 + $0x30] sm:$0xff] %v639_v54 }
 0x127   : > { %v658_v56 = vpop.f32.mrf.mxu3 }
 0x128   : > { %v659_v57 = vadd.f32 %v658_v56, %v609_v55 }
 0x129   : > { %v640_v59 = vpop.f32.mrf.mxu1  ;;  %v611_v61 = vpop.f32.mrf.mxu2 }
 0x12a   : > { %678 = vst [vmem:[%s4068_s24 + $0x70] sm:$0xff] %v659_v57  ;;  %v641_v60 = vadd.f32 %v640_v59, %v591_v58 }
 0x12c   : > { %671 = vst [vmem:[%s4068_s24 + $0x38] sm:$0xff] %v641_v60 }
 0x12e   : > { %683 = sbr.rel (%p3273_p1) target bundleno = 2462 (0x99e), region = 60 }
 0x12f   : > { %v660_v62 = vpop.f32.mrf.mxu3 }
 0x130   : > { %v661_v63 = vadd.f32 %v660_v62, %v611_v61 }
 0x132   : > { %679 = vst [vmem:[%s4068_s24 + $0x78] sm:$0xff] %v661_v63 }
 0x133   : > { %815 = sbr.rel (%p3274_p4) target bundleno = 1200 (0x4b0), region = 64 }
 0x138   : > { %v863_v0 = vld [vmem:[#allocation9 + $0x78] sm:$0xff]  ;;  %v862_v1 = vld [vmem:[#allocation9 + $0x70] sm:$0xff]  ;;  %v861_v2 = vld [vmem:[#allocation9 + $0x68] sm:$0xff] }
 0x139   : > { %866 = vmatpush.msra.mxu0 %v863_v0  ;;  %3425 = vmatpush.msra.mxu2 %v863_v0  ;;  %v860_v3 = vld [vmem:[#allocation9 + $0x60] sm:$0xff]  ;;  %v859_v4 = vld [vmem:[#allocation9 + $0x58] sm:$0xff]  ;;  %v858_v5 = vld [vmem:[#allocation9 + $0x50] sm:$0xff] }
 0x13a   : > { %v857_v6 = vld [vmem:[#allocation9 + $0x48] sm:$0xff]  ;;  %v856_v7 = vld [vmem:[#allocation9 + $0x40] sm:$0xff]  ;;  %v855_v8 = vld [vmem:[#allocation9 + $0x38] sm:$0xff] }
 0x13b   : > { %867 = vmatpush.msra.mxu0 %v862_v1  ;;  %3426 = vmatpush.msra.mxu2 %v862_v1  ;;  %v854_v9 = vld [vmem:[#allocation9 + $0x30] sm:$0xff]  ;;  %v853_v10 = vld [vmem:[#allocation9 + $0x28] sm:$0xff]  ;;  %v852_v11 = vld [vmem:[#allocation9 + $0x20] sm:$0xff] }
 0x13c   : > { %v851_v12 = vld [vmem:[#allocation9 + $0x18] sm:$0xff]  ;;  %v850_v13 = vld [vmem:[#allocation9 + $0x10] sm:$0xff]  ;;  %v849_v14 = vld [vmem:[#allocation9 + $0x8] sm:$0xff] }
 0x13d   : > { %868 = vmatpush.msra.mxu0 %v861_v2  ;;  %3427 = vmatpush.msra.mxu2 %v861_v2  ;;  %v848_v15 = vld [vmem:[#allocation9] sm:$0xff]  ;;  %v817_v18 = vld [vmem:[#allocation3 + $0x8] sm:$0xff]  ;;  %v818_v20 = vld [vmem:[#allocation3 + $0x10] sm:$0xff] }
 0x13e   : > { %v816_v16 = vld [vmem:[#allocation3] sm:$0xff]  ;;  %v833_v19 = vld [vmem:[#allocation3 + $0x88] sm:$0xff]  ;;  %v834_v21 = vld [vmem:[#allocation3 + $0x90] sm:$0xff] }
 0x13f   : > { %869 = vmatpush.msra.mxu0 %v860_v3  ;;  %3428 = vmatpush.msra.mxu2 %v860_v3  ;;  %v832_v17 = vld [vmem:[#allocation3 + $0x80] sm:$0xff]  ;;  %v819_v22 = vld [vmem:[#allocation3 + $0x18] sm:$0xff]  ;;  %v821_v26 = vld [vmem:[#allocation3 + $0x28] sm:$0xff] }
 0x140   : > { %v835_v23 = vld [vmem:[#allocation3 + $0x98] sm:$0xff]  ;;  %v820_v24 = vld [vmem:[#allocation3 + $0x20] sm:$0xff]  ;;  %v837_v27 = vld [vmem:[#allocation3 + $0xa8] sm:$0xff] }
 0x141   : > { %870 = vmatpush.msra.mxu0 %v859_v4  ;;  %3429 = vmatpush.msra.mxu2 %v859_v4  ;;  %v836_v25 = vld [vmem:[#allocation3 + $0xa0] sm:$0xff]  ;;  %v822_v28 = vld [vmem:[#allocation3 + $0x30] sm:$0xff]  ;;  %v823_v30 = vld [vmem:[#allocation3 + $0x38] sm:$0xff] }
 0x142   : > { %v838_v29 = vld [vmem:[#allocation3 + $0xb0] sm:$0xff]  ;;  %v839_v31 = vld [vmem:[#allocation3 + $0xb8] sm:$0xff]  ;;  %v824_v32 = vld [vmem:[#allocation3 + $0x40] sm:$0xff] }
 0x143   : > { %871 = vmatpush.msra.mxu0 %v858_v5  ;;  %3430 = vmatpush.msra.mxu2 %v858_v5  ;;  %v840_v33 = vld [vmem:[#allocation3 + $0xc0] sm:$0xff]  ;;  %v825_v34 = vld [vmem:[#allocation3 + $0x48] sm:$0xff]  ;;  %v826_v36 = vld [vmem:[#allocation3 + $0x50] sm:$0xff] }
 0x144   : > { %v841_v35 = vld [vmem:[#allocation3 + $0xc8] sm:$0xff]  ;;  %v842_v37 = vld [vmem:[#allocation3 + $0xd0] sm:$0xff]  ;;  %v827_v38 = vld [vmem:[#allocation3 + $0x58] sm:$0xff] }
 0x145   : > { %872 = vmatpush.msra.mxu0 %v857_v6  ;;  %3431 = vmatpush.msra.mxu2 %v857_v6  ;;  %v843_v39 = vld [vmem:[#allocation3 + $0xd8] sm:$0xff]  ;;  %v828_v40 = vld [vmem:[#allocation3 + $0x60] sm:$0xff]  ;;  %v829_v42 = vld [vmem:[#allocation3 + $0x68] sm:$0xff] }
 0x146   : > { %v844_v41 = vld [vmem:[#allocation3 + $0xe0] sm:$0xff]  ;;  %v845_v43 = vld [vmem:[#allocation3 + $0xe8] sm:$0xff]  ;;  %v830_v44 = vld [vmem:[#allocation3 + $0x70] sm:$0xff] }
 0x147   : > { %873 = vmatpush.msra.mxu0 %v856_v7  ;;  %3432 = vmatpush.msra.mxu2 %v856_v7  ;;  %v846_v45 = vld [vmem:[#allocation3 + $0xf0] sm:$0xff]  ;;  %v831_v46 = vld [vmem:[#allocation3 + $0x78] sm:$0xff]  ;;  %v4088_v5 = vld [vmem:[#allocation10] sm:$0x7] }
 0x148   : > { %v847_v47 = vld [vmem:[#allocation3 + $0xf8] sm:$0xff]  ;;  %v4091_v7 = vperm.slane %v4088_v5, 0 }
 0x149   : > { %874 = vmatpush.msra.mxu0 %v855_v8  ;;  %3433 = vmatpush.msra.mxu2 %v855_v8 }
 0x14b   : > { %875 = vmatpush.msra.mxu0 %v854_v9  ;;  %3434 = vmatpush.msra.mxu2 %v854_v9 }
 0x14d   : > { %876 = vmatpush.msra.mxu0 %v853_v10  ;;  %3435 = vmatpush.msra.mxu2 %v853_v10 }
 0x14f   : > { %877 = vmatpush.msra.mxu0 %v852_v11  ;;  %3436 = vmatpush.msra.mxu2 %v852_v11 }
 0x151   : > { %878 = vmatpush.msra.mxu0 %v851_v12  ;;  %3437 = vmatpush.msra.mxu2 %v851_v12 }
 0x153   : > { %879 = vmatpush.msra.mxu0 %v850_v13  ;;  %3438 = vmatpush.msra.mxu2 %v850_v13 }
 0x155   : > { %880 = vmatpush.msra.mxu0 %v849_v14  ;;  %3439 = vmatpush.msra.mxu2 %v849_v14 }
 0x157   : > { %881 = vmatpush.msra.mxu0 %v848_v15  ;;  %3440 = vmatpush.msra.mxu2 %v848_v15 }
 0x158   : > { %882 = vmatmul.f32.vlgmr.msra.gmra.mxu0 %v816_v16  ;;  %930 = vmatmul.f32.vlgmr.msra.gmra.mxu2 %v832_v17 }
 0x160   : > { %885 = vmatmul.f32.gmra.mxu0 %v817_v18  ;;  %933 = vmatmul.f32.gmra.mxu2 %v833_v19 }
 0x168   : > { %888 = vmatmul.f32.gmra.mxu0 %v818_v20  ;;  %936 = vmatmul.f32.gmra.mxu2 %v834_v21 }
 0x170   : > { %891 = vmatmul.f32.gmra.mxu0 %v819_v22  ;;  %939 = vmatmul.f32.gmra.mxu2 %v835_v23 }
 0x178   : > { %894 = vmatmul.f32.gmra.mxu0 %v820_v24  ;;  %942 = vmatmul.f32.gmra.mxu2 %v836_v25 }
 0x180   : > { %897 = vmatmul.f32.gmra.mxu0 %v821_v26  ;;  %945 = vmatmul.f32.gmra.mxu2 %v837_v27 }
 0x188   : > { %900 = vmatmul.f32.gmra.mxu0 %v822_v28  ;;  %948 = vmatmul.f32.gmra.mxu2 %v838_v29 }
 0x190   : > { %903 = vmatmul.f32.gmra.mxu0 %v823_v30  ;;  %951 = vmatmul.f32.gmra.mxu2 %v839_v31 }
 0x198   : > { %906 = vmatmul.f32.gmra.mxu0 %v824_v32  ;;  %954 = vmatmul.f32.gmra.mxu2 %v840_v33 }
 0x1a0   : > { %909 = vmatmul.f32.gmra.mxu0 %v825_v34  ;;  %957 = vmatmul.f32.gmra.mxu2 %v841_v35 }
 0x1a8   : > { %912 = vmatmul.f32.gmra.mxu0 %v826_v36  ;;  %960 = vmatmul.f32.gmra.mxu2 %v842_v37 }
 0x1b0   : > { %915 = vmatmul.f32.gmra.mxu0 %v827_v38  ;;  %963 = vmatmul.f32.gmra.mxu2 %v843_v39 }
 0x1b8   : > { %918 = vmatmul.f32.gmra.mxu0 %v828_v40  ;;  %966 = vmatmul.f32.gmra.mxu2 %v844_v41 }
 0x1c0   : > { %921 = vmatmul.f32.gmra.mxu0 %v829_v42  ;;  %969 = vmatmul.f32.gmra.mxu2 %v845_v43 }
 0x1c8   : > { %924 = vmatmul.f32.gmra.mxu0 %v830_v44  ;;  %972 = vmatmul.f32.gmra.mxu2 %v846_v45 }
 0x1d0   : > { %927 = vmatmul.f32.gmra.mxu0 %v831_v46  ;;  %975 = vmatmul.f32.gmra.mxu2 %v847_v47 }
 0x1d5   : > { %v883_v48 = vpop.f32.mrf.mxu0 }
 0x1d6   : > { %v4097_v9 = vadd.f32 %v883_v48, %v4091_v7 }
 0x1db   : > { %v931_v49 = vpop.f32.mrf.mxu2 }
 0x1dc   : > { %v932_v45 = vadd.f32 %v931_v49, %v4091_v7 }
 0x1dd   : > { %v886_v50 = vpop.f32.mrf.mxu0 }
 0x1de   : > { %v4094_v8 = vadd.f32 %v886_v50, %v4091_v7 }
 0x1e0   : > { %v1011_v12 = vadd.f32 %v4094_v8, %v4097_v9 }
 0x1e3   : > { %v934_v51 = vpop.f32.mrf.mxu2 }
 0x1e4   : > { %v935_v48 = vadd.f32 %v934_v51, %v4091_v7 }
 0x1e5   : > { %v889_v52 = vpop.f32.mrf.mxu0 }
 0x1e6   : > { %v4100_v10 = vadd.f32 %v889_v52, %v4091_v7 }
 0x1e8   : > { %v1012_v15 = vadd.f32 %v1011_v12, %v4100_v10 }
 0x1eb   : > { %v937_v53 = vpop.f32.mrf.mxu2 }
 0x1ec   : > { %v938_v52 = vadd.f32 %v937_v53, %v4091_v7 }
 0x1ed   : > { %v892_v54 = vpop.f32.mrf.mxu0 }
 0x1ee   : > { %v4105_v13 = vadd.f32 %v892_v54, %v4091_v7 }
 0x1f0   : > { %v1013_v17 = vadd.f32 %v1012_v15, %v4105_v13 }
 0x1f3   : > { %v940_v55 = vpop.f32.mrf.mxu2 }
 0x1f5   : > { %v895_v56 = vpop.f32.mrf.mxu0 }
 0x1f6   : > { %v4109_v16 = vadd.f32 %v895_v56, %v4091_v7  ;;  %v941_v56 = vadd.f32 %v940_v55, %v4091_v7 }
 0x1f8   : > { %v1014_v19 = vadd.f32 %v1013_v17, %v4109_v16 }
 0x1fb   : > { %v943_v57 = vpop.f32.mrf.mxu2 }
 0x1fd   : > { %v898_v58 = vpop.f32.mrf.mxu0 }
 0x1fe   : > { %v4113_v18 = vadd.f32 %v898_v58, %v4091_v7 }
 0x200   : > { %v1015_v21 = vadd.f32 %v1014_v19, %v4113_v18 }
 0x203   : > { %v946_v59 = vpop.f32.mrf.mxu2 }
 0x205   : > { %v901_v60 = vpop.f32.mrf.mxu0 }
 0x206   : > { %v4117_v20 = vadd.f32 %v901_v60, %v4091_v7  ;;  %v944_v60 = vadd.f32 %v943_v57, %v4091_v7 }
 0x208   : > { %v1016_v25 = vadd.f32 %v1015_v21, %v4117_v20 }
 0x20b   : > { %v949_v61 = vpop.f32.mrf.mxu2 }
 0x20c   : > { %v950_v49 = vadd.f32 %v949_v61, %v4091_v7 }
 0x20d   : > { %v904_v62 = vpop.f32.mrf.mxu0 }
 0x20e   : > { %v4121_v22 = vadd.f32 %v904_v62, %v4091_v7 }
 0x210   : > { %v1017_v27 = vadd.f32 %v1016_v25, %v4121_v22 }
 0x213   : > { %v952_v0 = vpop.f32.mrf.mxu2 }
 0x214   : > { %v953_v12 = vadd.f32 %v952_v0, %v4091_v7 }
 0x215   : > { %v907_v63 = vpop.f32.mrf.mxu0 }
 0x216   : > { %v4125_v26 = vadd.f32 %v907_v63, %v4091_v7  ;;  %v947_v63 = vadd.f32 %v946_v59, %v4091_v7 }
 0x218   : > { %v1018_v29 = vadd.f32 %v1017_v27, %v4125_v26 }
 0x21b   : > { %v955_v2 = vpop.f32.mrf.mxu2 }
 0x21d   : > { %v910_v1 = vpop.f32.mrf.mxu0 }
 0x21e   : > { %v4129_v28 = vadd.f32 %v910_v1, %v4091_v7 }
 0x220   : > { %v1019_v31 = vadd.f32 %v1018_v29, %v4129_v28 }
 0x223   : > { %v958_v4 = vpop.f32.mrf.mxu2 }
 0x224   : > { %v4160_v51 = vadd.f32 %v958_v4, %v4091_v7 }
 0x225   : > { %v913_v3 = vpop.f32.mrf.mxu0 }
 0x226   : > { %v4133_v30 = vadd.f32 %v913_v3, %v4091_v7  ;;  %v1004_v15 = vmul.f32 0.0, %v4160_v51 }
 0x228   : > { %v1020_v34 = vadd.f32 %v1019_v31, %v4133_v30 }
 0x22b   : > { %v961_v11 = vpop.f32.mrf.mxu2 }
 0x22c   : > { %v4164_v55 = vadd.f32 %v961_v11, %v4091_v7 }
 0x22d   : > { %v916_v6 = vpop.f32.mrf.mxu0 }
 0x22e   : > { %v4137_v32 = vadd.f32 %v916_v6, %v4091_v7  ;;  %v1005_v61 = vmul.f32 0.0, %v4164_v55 }
 0x230   : > { %v1021_v37 = vadd.f32 %v1020_v34, %v4137_v32 }
 0x233   : > { %v964_v24 = vpop.f32.mrf.mxu2 }
 0x234   : > { %v4168_v59 = vadd.f32 %v964_v24, %v4091_v7 }
 0x235   : > { %v919_v14 = vpop.f32.mrf.mxu0 }
 0x236   : > { %v4141_v35 = vadd.f32 %v919_v14, %v4091_v7  ;;  %v956_v14 = vadd.f32 %v955_v2, %v4091_v7  ;;  %v1006_v21 = vmul.f32 0.0, %v4168_v59 }
 0x238   : > { %v1022_v39 = vadd.f32 %v1021_v37, %v4141_v35 }
 0x23b   : > { %v967_v36 = vpop.f32.mrf.mxu2 }
 0x23c   : > { %v4172_v0 = vadd.f32 %v967_v36, %v4091_v7 }
 0x23d   : > { %v922_v23 = vpop.f32.mrf.mxu0 }
 0x23e   : > { %v4145_v38 = vadd.f32 %v922_v23, %v4091_v7  ;;  %v1007_v23 = vmul.f32 0.0, %v4172_v0 }
 0x240   : > { %v1023_v41 = vadd.f32 %v1022_v39, %v4145_v38 }
 0x243   : > { %v970_v47 = vpop.f32.mrf.mxu2 }
 0x244   : > { %v4176_v11 = vadd.f32 %v970_v47, %v4091_v7 }
 0x245   : > { %v925_v33 = vpop.f32.mrf.mxu0 }
 0x246   : > { %v926_v40 = vadd.f32 %v925_v33, %v4091_v7  ;;  %v1008_v31 = vmul.f32 0.0, %v4176_v11 }
 0x248   : > { %v1024_v43 = vadd.f32 %v1023_v41, %v926_v40 }
 0x24b   : > { %v973_v3 = vpop.f32.mrf.mxu2 }
 0x24c   : > { %v974_v24 = vadd.f32 %v973_v3, %v4091_v7 }
 0x24d   : > { %v928_v42 = vpop.f32.mrf.mxu0 }
 0x24e   : > { %v929_v44 = vadd.f32 %v928_v42, %v4091_v7  ;;  %v1009_v34 = vmul.f32 0.0, %v974_v24 }
 0x250   : > { %v1025_v46 = vadd.f32 %v1024_v43, %v929_v44 }
 0x252   : > { %v1026_v50 = vadd.f32 %v1025_v46, %v932_v45 }
 0x253   : > { %v976_v19 = vpop.f32.mrf.mxu2 }
 0x254   : > { %v1027_v54 = vadd.f32 %v1026_v50, %v935_v48  ;;  %v977_v27 = vadd.f32 %v976_v19, %v4091_v7 }
 0x256   : > { %v1028_v58 = vadd.f32 %v1027_v54, %v938_v52  ;;  %v1010_v36 = vmul.f32 0.0, %v977_v27 }
 0x258   : > { %v1029_v62 = vadd.f32 %v1028_v58, %v941_v56 }
 0x25a   : > { %v1030_v1 = vadd.f32 %v1029_v62, %v944_v60 }
 0x25c   : > { %v1031_v6 = vadd.f32 %v1030_v1, %v947_v63 }
 0x25e   : > { %v1032_v53 = vadd.f32 %v1031_v6, %v950_v49 }
 0x260   : > { %v1033_v57 = vadd.f32 %v1032_v53, %v953_v12 }
 0x262   : > { %v1034_v17 = vadd.f32 %v1033_v57, %v956_v14 }
 0x264   : > { %v1035_v4 = vadd.f32 %v1034_v17, %v1004_v15 }
 0x266   : > { %v1036_v2 = vadd.f32 %v1035_v4, %v1005_v61 }
 0x268   : > { %v1037_v25 = vadd.f32 %v1036_v2, %v1006_v21 }
 0x26a   : > { %v1038_v29 = vadd.f32 %v1037_v25, %v1007_v23 }
 0x26c   : > { %v1039_v33 = vadd.f32 %v1038_v29, %v1008_v31 }
 0x26e   : > { %v1040_v37 = vadd.f32 %v1039_v33, %v1009_v34 }
 0x270   : > { %v1041_v39 = vadd.f32 %v1040_v37, %v1010_v36 }
 0x272   : > { %v1042_v41 = vrot.slane %v1041_v39, 4 }
 0x274   : > { %v1043_v42 = vadd.f32 %v1042_v41, %v1041_v39 }
 0x276   : > { %v1044_v43 = vrot.slane %v1043_v42, 2 }
 0x278   : > { %v1045_v46 = vadd.f32 %v1044_v43, %v1043_v42 }
 0x27a   : > { %v1046_v47 = vrot.slane %v1045_v46, 1 }
 0x27c   : > { %v1047_v50 = vadd.f32 %v1046_v47, %v1045_v46 }
 0x27e   : > { %v4182_v54 = vmul.f32 0.005, %v1047_v50 }
 0x280   : > { %v4185_v58 = vsub.f32 %v926_v40, %v4182_v54  ;;  %v4188_v7 = vsub.f32 %v929_v44, %v4182_v54  ;;  %v4191_v62 = vsub.f32 %v932_v45, %v4182_v54  ;;  %v4194_v1 = vsub.f32 %v935_v48, %v4182_v54 }
 0x281   : > { %v4197_v3 = vsub.f32 %v938_v52, %v4182_v54  ;;  %v4200_v6 = vsub.f32 %v941_v56, %v4182_v54  ;;  %v4203_v53 = vsub.f32 %v944_v60, %v4182_v54  ;;  %v4206_v40 = vsub.f32 %v947_v63, %v4182_v54 }
 0x282   : > { %v4209_v44 = vsub.f32 %v950_v49, %v4182_v54  ;;  %v4212_v45 = vsub.f32 %v953_v12, %v4182_v54  ;;  %v4215_v48 = vsub.f32 %v956_v14, %v4182_v54  ;;  %v4218_v52 = vsub.f32 %v974_v24, %v4182_v54 }
 0x283   : > { %v4221_v56 = vsub.f32 %v977_v27, %v4182_v54  ;;  %v4225_v60 = vsub.f32 %v4097_v9, %v4182_v54  ;;  %v4229_v63 = vsub.f32 %v4094_v8, %v4182_v54  ;;  %v4233_v49 = vsub.f32 %v4100_v10, %v4182_v54 }
 0x284   : > { %v4241_v57 = vsub.f32 %v4105_v13, %v4182_v54  ;;  %v4245_v9 = vsub.f32 %v4109_v16, %v4182_v54  ;;  %v4251_v10 = vsub.f32 %v4113_v18, %v4182_v54  ;;  %v4257_v13 = vsub.f32 %v4117_v20, %v4182_v54 }
 0x285   : > { %v1113_v12 = vmul.f32 %v4225_v60, %v4225_v60  ;;  %v1114_v14 = vmul.f32 %v4229_v63, %v4229_v63  ;;  %v1115_v8 = vmul.f32 %v4233_v49, %v4233_v49  ;;  %v4263_v19 = vsub.f32 %v4121_v22, %v4182_v54 }
 0x286   : > { %v1116_v17 = vmul.f32 %v4241_v57, %v4241_v57  ;;  %v1117_v16 = vmul.f32 %v4245_v9, %v4245_v9  ;;  %v1118_v18 = vmul.f32 %v4251_v10, %v4251_v10  ;;  %v4269_v2 = vsub.f32 %v4125_v26, %v4182_v54 }
 0x287   : > { %v1145_v15 = vadd.f32 %v1114_v14, %v1113_v12  ;;  %v1119_v20 = vmul.f32 %v4257_v13, %v4257_v13  ;;  %v4275_v25 = vsub.f32 %v4129_v28, %v4182_v54  ;;  %v1120_v22 = vmul.f32 %v4263_v19, %v4263_v19 }
 0x288   : > { %v4281_v27 = vsub.f32 %v4133_v30, %v4182_v54  ;;  %v1121_v26 = vmul.f32 %v4269_v2, %v4269_v2  ;;  %v4287_v31 = vsub.f32 %v4137_v32, %v4182_v54  ;;  %v4293_v34 = vsub.f32 %v4141_v35, %v4182_v54 }
 0x289   : > { %v1146_v61 = vadd.f32 %v1145_v15, %v1115_v8  ;;  %v1122_v28 = vmul.f32 %v4275_v25, %v4275_v25  ;;  %v4299_v37 = vsub.f32 %v4145_v38, %v4182_v54  ;;  %v1127_v46 = vmul.f32 %v4185_v58, %v4185_v58 }
 0x28a   : > { %v1123_v30 = vmul.f32 %v4281_v27, %v4281_v27  ;;  %v1124_v32 = vmul.f32 %v4287_v31, %v4287_v31  ;;  %v1125_v41 = vmul.f32 %v4293_v34, %v4293_v34  ;;  %v1128_v38 = vmul.f32 %v4188_v7, %v4188_v7 }
 0x28b   : > { %v1147_v4 = vadd.f32 %v1146_v61, %v1116_v17  ;;  %v1126_v35 = vmul.f32 %v4299_v37, %v4299_v37  ;;  %v1129_v12 = vmul.f32 %v4191_v62, %v4191_v62  ;;  %v1130_v8 = vmul.f32 %v4194_v1, %v4194_v1 }
 0x28c   : > { %v1131_v17 = vmul.f32 %v4197_v3, %v4197_v3 }
 0x28d   : > { %v1148_v21 = vadd.f32 %v1147_v4, %v1117_v16  ;;  %v1132_v16 = vmul.f32 %v4200_v6, %v4200_v6 }
 0x28f   : > { %v1149_v23 = vadd.f32 %v1148_v21, %v1118_v18  ;;  %v1133_v18 = vmul.f32 %v4203_v53, %v4203_v53 }
 0x291   : > { %v1150_v24 = vadd.f32 %v1149_v23, %v1119_v20  ;;  %v4323_v20 = vsub.f32 %v4160_v51, %v4182_v54  ;;  %v1134_v23 = vmul.f32 %v4206_v40, %v4206_v40  ;;  %v1136_v51 = vmul.f32 %v4212_v45, %v4212_v45 }
 0x293   : > { %v1151_v29 = vadd.f32 %v1150_v24, %v1120_v22  ;;  %v4329_v24 = vsub.f32 %v4164_v55, %v4182_v54 }
 0x295   : > { %v1152_v33 = vadd.f32 %v1151_v29, %v1121_v26  ;;  %v1135_v26 = vmul.f32 %v4209_v44, %v4209_v44  ;;  %v1107_v55 = vmul.f32 0.0, %v4329_v24 }
 0x297   : > { %v1153_v36 = vadd.f32 %v1152_v33, %v1122_v28  ;;  %v4335_v28 = vsub.f32 %v4168_v59, %v4182_v54  ;;  %v1106_v33 = vmul.f32 0.0, %v4323_v20  ;;  %v4349_v59 = vsub.f32 %v4176_v11, %v4182_v54  ;;  %v1338_v11 = vld [vmem:[#allocation9 + $0xe8] sm:$0xff] }
 0x299   : > { %v1154_v39 = vadd.f32 %v1153_v36, %v1123_v30  ;;  %v4342_v36 = vsub.f32 %v4172_v0, %v4182_v54  ;;  %v1111_v54 = vmul.f32 0.0, %v4218_v52 }
 0x29b   : > { %v1155_v42 = vadd.f32 %v1154_v39, %v1124_v32  ;;  %v1137_v32 = vmul.f32 %v4215_v48, %v4215_v48 }
 0x29d   : > { %v1156_v43 = vadd.f32 %v1155_v42, %v1125_v41  ;;  %v1108_v41 = vmul.f32 0.0, %v4335_v28  ;;  %v1138_v42 = vmul.f32 %v1106_v33, %v1106_v33  ;;  %v1334_v33 = vld [vmem:[#allocation9 + $0xc8] sm:$0xff] }
 0x29f   : > { %v1157_v47 = vadd.f32 %v1156_v43, %v1126_v35  ;;  %v1340_v43 = vld [vmem:[#allocation9 + $0xf8] sm:$0xff] }
 0x2a0   : > { %1344 = vmatpush.msra.mxu1 %v1340_v43  ;;  %3441 = vmatpush.msra.mxu3 %v1340_v43 }
 0x2a1   : > { %v1158_v50 = vadd.f32 %v1157_v47, %v1127_v46  ;;  %v1109_v46 = vmul.f32 0.0, %v4342_v36  ;;  %v1139_v47 = vmul.f32 %v1107_v55, %v1107_v55 }
 0x2a3   : > { %v1159_v14 = vadd.f32 %v1158_v50, %v1128_v38  ;;  %v1339_v38 = vld [vmem:[#allocation9 + $0xf0] sm:$0xff]  ;;  %v1110_v50 = vmul.f32 0.0, %v4349_v59 }
 0x2a4   : > { %1345 = vmatpush.msra.mxu1 %v1339_v38  ;;  %3442 = vmatpush.msra.mxu3 %v1339_v38  ;;  %v1327_v38 = vld [vmem:[#allocation9 + $0x90] sm:$0xff] }
 0x2a5   : > { %v1160_v15 = vadd.f32 %v1159_v14, %v1129_v12  ;;  %v1140_v12 = vmul.f32 %v1108_v41, %v1108_v41  ;;  %v1331_v41 = vld [vmem:[#allocation9 + $0xb0] sm:$0xff] }
 0x2a6   : > { %1346 = vmatpush.msra.mxu1 %v1338_v11  ;;  %3443 = vmatpush.msra.mxu3 %v1338_v11  ;;  %v1325_v11 = vld [vmem:[#allocation9 + $0x80] sm:$0xff] }
 0x2a7   : > { %v1161_v61 = vadd.f32 %v1160_v15, %v1130_v8  ;;  %v1141_v8 = vmul.f32 %v1109_v46, %v1109_v46  ;;  %v1329_v46 = vld [vmem:[#allocation9 + $0xa0] sm:$0xff] }
 0x2a9   : > { %v1162_v4 = vadd.f32 %v1161_v61, %v1131_v17  ;;  %v1337_v17 = vld [vmem:[#allocation9 + $0xe0] sm:$0xff]  ;;  %v1112_v61 = vmul.f32 0.0, %v4221_v56 }
 0x2aa   : > { %1347 = vmatpush.msra.mxu1 %v1337_v17  ;;  %3444 = vmatpush.msra.mxu3 %v1337_v17 }
 0x2ab   : > { %v1163_v21 = vadd.f32 %v1162_v4, %v1132_v16  ;;  %v1142_v16 = vmul.f32 %v1110_v50, %v1110_v50 }
 0x2ad   : > { %v1164_v22 = vadd.f32 %v1163_v21, %v1133_v18  ;;  %v1336_v18 = vld [vmem:[#allocation9 + $0xd8] sm:$0xff]  ;;  %v1143_v21 = vmul.f32 %v1111_v54, %v1111_v54 }
 0x2ae   : > { %1348 = vmatpush.msra.mxu1 %v1336_v18  ;;  %3445 = vmatpush.msra.mxu3 %v1336_v18 }
 0x2af   : > { %v1165_v29 = vadd.f32 %v1164_v22, %v1134_v23  ;;  %v1335_v22 = vld [vmem:[#allocation9 + $0xd0] sm:$0xff] }
 0x2b0   : > { %1349 = vmatpush.msra.mxu1 %v1335_v22  ;;  %3446 = vmatpush.msra.mxu3 %v1335_v22  ;;  %v4363_v22 = vperm.slane %v4088_v5, 1 }
 0x2b1   : > { %v1166_v30 = vadd.f32 %v1165_v29, %v1135_v26  ;;  %v1144_v26 = vmul.f32 %v1112_v61, %v1112_v61 }
 0x2b2   : > { %1350 = vmatpush.msra.mxu1 %v1334_v33  ;;  %3447 = vmatpush.msra.mxu3 %v1334_v33 }
 0x2b3   : > { %v1167_v39 = vadd.f32 %v1166_v30, %v1136_v51  ;;  %v1333_v30 = vld [vmem:[#allocation9 + $0xc0] sm:$0xff] }
 0x2b4   : > { %1351 = vmatpush.msra.mxu1 %v1333_v30  ;;  %3448 = vmatpush.msra.mxu3 %v1333_v30 }
 0x2b5   : > { %v1168_v35 = vadd.f32 %v1167_v39, %v1137_v32  ;;  %v1332_v32 = vld [vmem:[#allocation9 + $0xb8] sm:$0xff] }
 0x2b6   : > { %1352 = vmatpush.msra.mxu1 %v1332_v32  ;;  %3449 = vmatpush.msra.mxu3 %v1332_v32 }
 0x2b7   : > { %v1169_v0 = vadd.f32 %v1168_v35, %v1138_v42  ;;  %v1330_v35 = vld [vmem:[#allocation9 + $0xa8] sm:$0xff] }
 0x2b8   : > { %1353 = vmatpush.msra.mxu1 %v1331_v41  ;;  %3450 = vmatpush.msra.mxu3 %v1331_v41 }
 0x2b9   : > { %v1170_v14 = vadd.f32 %v1169_v0, %v1139_v47  ;;  %v1328_v0 = vld [vmem:[#allocation9 + $0x98] sm:$0xff] }
 0x2ba   : > { %1354 = vmatpush.msra.mxu1 %v1330_v35  ;;  %3451 = vmatpush.msra.mxu3 %v1330_v35 }
 0x2bb   : > { %v1171_v15 = vadd.f32 %v1170_v14, %v1140_v12  ;;  %v1326_v12 = vld [vmem:[#allocation9 + $0x88] sm:$0xff] }
 0x2bc   : > { %1355 = vmatpush.msra.mxu1 %v1329_v46  ;;  %3452 = vmatpush.msra.mxu3 %v1329_v46 }
 0x2bd   : > { %v1172_v4 = vadd.f32 %v1171_v15, %v1141_v8 }
 0x2be   : > { %1356 = vmatpush.msra.mxu1 %v1328_v0  ;;  %3453 = vmatpush.msra.mxu3 %v1328_v0 }
 0x2bf   : > { %v1173_v23 = vadd.f32 %v1172_v4, %v1142_v16 }
 0x2c0   : > { %1357 = vmatpush.msra.mxu1 %v1327_v38  ;;  %3454 = vmatpush.msra.mxu3 %v1327_v38 }
 0x2c1   : > { %v1174_v29 = vadd.f32 %v1173_v23, %v1143_v21 }
 0x2c2   : > { %1358 = vmatpush.msra.mxu1 %v1326_v12  ;;  %3455 = vmatpush.msra.mxu3 %v1326_v12 }
 0x2c3   : > { %v1175_v51 = vadd.f32 %v1174_v29, %v1144_v26  ;;  %v4366_v26 = vperm.slane %v4088_v5, 2 }
 0x2c4   : > { %1359 = vmatpush.msra.mxu1 %v1325_v11  ;;  %3456 = vmatpush.msra.mxu3 %v1325_v11 }
 0x2c5   : > { %v1176_v55 = vrot.slane %v1175_v51, 4 }
 0x2c7   : > { %v1177_v39 = vadd.f32 %v1176_v55, %v1175_v51 }
 0x2c9   : > { %v1178_v42 = vrot.slane %v1177_v39, 2 }
 0x2cb   : > { %v1179_v43 = vadd.f32 %v1178_v42, %v1177_v39 }
 0x2cd   : > { %v1180_v47 = vrot.slane %v1179_v43, 1 }
 0x2cf   : > { %v1181_v50 = vadd.f32 %v1180_v47, %v1179_v43 }
 0x2d1   : > { %v1182_v14 = vmul.f32 0.005, %v1181_v50 }
 0x2d3   : > { %v1183_v54 = vadd.f32 1e-05, %v1182_v14 }
 0x2d5   : > { %3620 = vrsqrt.f32 %v1183_v54  ;;  %vm1190_vm1 = vweird.f32 %v1183_v54 }
 0x2db   : > { %v3621_v8 = vpop.eup %3620 }
 0x2dc   : > { %v1185_v15 = vmul.f32 %v3621_v8, %v1183_v54  ;;  %vm1191_vm0 = vweird.f32 %v3621_v8 }
 0x2dd   : > { %vm1192_vm2 = vmor %vm1190_vm1, %vm1191_vm0 }
 0x2de   : > { %v1186_v17 = vmul.f32 %v3621_v8, %v1185_v15 }
 0x2e0   : > { %v1187_v61 = vmul.f32 0.5, %v1186_v17 }
 0x2e2   : > { %v1188_v16 = vsub.f32 1.5, %v1187_v61 }
 0x2e4   : > { %v1189_v4 = vmul.f32 %v3621_v8, %v1188_v16 }
 0x2e6   : > { %v4356_v18 = vsel %vm1192_vm2, %v3621_v8, %v1189_v4 }
 0x2e7   : > { %v1194_v21 = vmul.f32 %v4356_v18, %v4225_v60  ;;  %v1210_v23 = vmul.f32 %v4356_v18, %v4191_v62  ;;  %v1195_v29 = vmul.f32 %v4356_v18, %v4229_v63  ;;  %v1211_v33 = vmul.f32 %v4356_v18, %v4194_v1 }
 0x2e8   : > { %v1196_v55 = vmul.f32 %v4356_v18, %v4233_v49  ;;  %v1197_v1 = vmul.f32 %v4356_v18, %v4241_v57  ;;  %v1202_v41 = vmul.f32 %v4356_v18, %v4269_v2  ;;  %v1203_v42 = vmul.f32 %v4356_v18, %v4275_v25 }
 0x2e9   : > { %v1227_v51 = vmul.f32 %v4363_v22, %v1194_v21  ;;  %v1243_v30 = vmul.f32 %v4363_v22, %v1210_v23  ;;  %v1228_v5 = vmul.f32 %v4363_v22, %v1195_v29  ;;  %v1244_v63 = vmul.f32 %v4363_v22, %v1211_v33 }
 0x2ea   : > { %v1204_v35 = vmul.f32 %v4356_v18, %v4281_v27  ;;  %v1205_v49 = vmul.f32 %v4356_v18, %v4287_v31  ;;  %v1212_v43 = vmul.f32 %v4356_v18, %v4197_v3  ;;  %v1229_v57 = vmul.f32 %v4363_v22, %v1196_v55 }
 0x2eb   : > { %v1260_v60 = vadd.f32 %v4366_v26, %v1227_v51  ;;  %v1276_v62 = vadd.f32 %v4366_v26, %v1243_v30  ;;  %v1261_v46 = vadd.f32 %v4366_v26, %v1228_v5  ;;  %v1206_v2 = vmul.f32 %v4356_v18, %v4293_v34 }
 0x2ec   : > { %v1207_v25 = vmul.f32 %v4356_v18, %v4299_v37  ;;  %v1218_v27 = vmul.f32 %v4356_v18, %v4215_v48  ;;  %v1277_v47 = vadd.f32 %v4366_v26, %v1244_v63  ;;  %v1208_v31 = vmul.f32 %v4356_v18, %v4185_v58 }
 0x2ed   : > { %v1292_v32 = vmax.f32 %v1260_v60, 0.0  ;;  %v1308_v39 = vmax.f32 %v1276_v62, 0.0  ;;  %v1209_v3 = vmul.f32 %v4356_v18, %v4188_v7  ;;  %v1219_v0 = vmul.f32 %v4356_v18, %v4323_v20 }
 0x2ee   : > { %v1220_v34 = vmul.f32 %v4356_v18, %v4329_v24  ;;  %v1213_v37 = vmul.f32 %v4356_v18, %v4200_v6  ;;  %v1221_v48 = vmul.f32 %v4356_v18, %v4335_v28  ;;  %v1222_v38 = vmul.f32 %v4356_v18, %v4342_v36 }
 0x2ef   : > { %1360 = vmatmul.f32.vlgmr.msra.gmra.mxu1 %v1292_v32  ;;  %1408 = vmatmul.f32.vlgmr.msra.gmra.mxu3 %v1308_v39  ;;  %v1223_v58 = vmul.f32 %v4356_v18, %v4349_v59  ;;  %v1224_v7 = vmul.f32 %v4356_v18, %v4218_v52  ;;  %v1293_v50 = vmax.f32 %v1261_v46, 0.0  ;;  %v1262_v20 = vadd.f32 %v4366_v26, %v1229_v57 }
 0x2f0   : > { %v1245_v24 = vmul.f32 %v4363_v22, %v1212_v43  ;;  %v1309_v12 = vmax.f32 %v1277_v47, 0.0  ;;  %v1235_v6 = vmul.f32 %v4363_v22, %v1202_v41  ;;  %v1251_v14 = vmul.f32 %v4363_v22, %v1218_v27 }
 0x2f1   : > { %v1236_v28 = vmul.f32 %v4363_v22, %v1203_v42  ;;  %v1252_v36 = vmul.f32 %v4363_v22, %v1219_v0  ;;  %v1237_v11 = vmul.f32 %v4363_v22, %v1204_v35  ;;  %v1253_v59 = vmul.f32 %v4363_v22, %v1220_v34 }
 0x2f2   : > { %v1238_v52 = vmul.f32 %v4363_v22, %v1205_v49  ;;  %v4429_v54 = vadd.f32 %v4366_v26, %v1235_v6  ;;  %v4432_v8 = vadd.f32 %v4366_v26, %v1251_v14  ;;  %v1278_v21 = vadd.f32 %v4366_v26, %v1245_v24 }
 0x2f3   : > { %v4435_v15 = vadd.f32 %v4366_v26, %v1236_v28  ;;  %v4438_v17 = vadd.f32 %v4366_v26, %v1252_v36  ;;  %v4441_v61 = vadd.f32 %v4366_v26, %v1237_v11  ;;  %v4444_v16 = vadd.f32 %v4366_v26, %v1253_v59 }
 0x2f4   : > { %v4447_v4 = vadd.f32 %v4366_v26, %v1238_v52  ;;  %v1254_v23 = vmul.f32 %v4363_v22, %v1221_v48  ;;  %v1225_v29 = vmul.f32 %v4356_v18, %v4221_v56  ;;  %v1294_v33 = vmax.f32 %v1262_v20, 0.0 }
 0x2f5   : > { %v1230_v51 = vmul.f32 %v4363_v22, %v1197_v1  ;;  %v1246_v30 = vmul.f32 %v4363_v22, %v1213_v37  ;;  %v1239_v62 = vmul.f32 %v4363_v22, %v1206_v2  ;;  %v1255_v55 = vmul.f32 %v4363_v22, %v1222_v38 }
 0x2f6   : > { %v4456_v60 = vadd.f32 %v4366_v26, %v1254_v23  ;;  %v1240_v5 = vmul.f32 %v4363_v22, %v1207_v25  ;;  %v1256_v32 = vmul.f32 %v4363_v22, %v1223_v58  ;;  %v1241_v39 = vmul.f32 %v4363_v22, %v1208_v31 }
 0x2f7   : > { %1363 = vmatmul.f32.gmra.mxu1 %v1293_v50  ;;  %1411 = vmatmul.f32.gmra.mxu3 %v1309_v12  ;;  %v1257_v56 = vmul.f32 %v4363_v22, %v1224_v7  ;;  %v1242_v63 = vmul.f32 %v4363_v22, %v1209_v3  ;;  %v1310_v1 = vmax.f32 %v1278_v21, 0.0  ;;  %v4466_v41 = vadd.f32 %v4366_v26, %v1239_v62 }
 0x2f8   : > { %v4469_v42 = vadd.f32 %v4366_v26, %v1255_v55  ;;  %v4472_v35 = vadd.f32 %v4366_v26, %v1240_v5  ;;  %v4475_v49 = vadd.f32 %v4366_v26, %v1256_v32  ;;  %v4478_v43 = vadd.f32 %v4366_v26, %v1241_v39 }
 0x2f9   : > { %v4481_v46 = vadd.f32 %v4366_v26, %v1257_v56  ;;  %v4484_v57 = vadd.f32 %v4366_v26, %v1242_v63  ;;  %v1258_v2 = vmul.f32 %v4363_v22, %v1225_v29  ;;  %v1198_v25 = vmul.f32 %v4356_v18, %v4245_v9 }
 0x2fa   : > { %v1214_v27 = vmul.f32 %v4356_v18, %v4203_v53  ;;  %v1263_v47 = vadd.f32 %v4366_v26, %v1230_v51  ;;  %v1279_v31 = vadd.f32 %v4366_v26, %v1246_v30  ;;  %v1199_v9 = vmul.f32 %v4356_v18, %v4251_v10 }
 0x2fb   : > { %v4494_v3 = vadd.f32 %v4366_v26, %v1258_v2  ;;  %v1231_v37 = vmul.f32 %v4363_v22, %v1198_v25  ;;  %v1215_v53 = vmul.f32 %v4356_v18, %v4206_v40  ;;  %v1200_v12 = vmul.f32 %v4356_v18, %v4257_v13 }
 0x2fc   : > { %v1295_v0 = vmax.f32 %v1263_v47, 0.0  ;;  %v1311_v34 = vmax.f32 %v1279_v31, 0.0  ;;  %v1247_v48 = vmul.f32 %v4363_v22, %v1214_v27  ;;  %v1232_v20 = vmul.f32 %v4363_v22, %v1199_v9  ;;  %v4540_v9 = vld [vmem:[#allocation10 + $0x4] sm:$0x7] }
 0x2fd   : > { %v1264_v38 = vadd.f32 %v4366_v26, %v1231_v37  ;;  %v1248_v24 = vmul.f32 %v4363_v22, %v1215_v53  ;;  %v1216_v10 = vmul.f32 %v4356_v18, %v4209_v44  ;;  %v1233_v36 = vmul.f32 %v4363_v22, %v1200_v12 }
 0x2fe   : > { %v1280_v58 = vadd.f32 %v4366_v26, %v1247_v48  ;;  %v1265_v40 = vadd.f32 %v4366_v26, %v1232_v20  ;;  %v1201_v59 = vmul.f32 %v4356_v18, %v4263_v19  ;;  %v1217_v13 = vmul.f32 %v4356_v18, %v4212_v45 }
 0x2ff   : > { %1366 = vmatmul.f32.gmra.mxu1 %v1294_v33  ;;  %1414 = vmatmul.f32.gmra.mxu3 %v1310_v1  ;;  %v1296_v7 = vmax.f32 %v1264_v38, 0.0  ;;  %v1281_v6 = vadd.f32 %v4366_v26, %v1248_v24  ;;  %v1249_v11 = vmul.f32 %v4363_v22, %v1216_v10  ;;  %v1266_v44 = vadd.f32 %v4366_v26, %v1233_v36 }
 0x300   : > { %v1312_v50 = vmax.f32 %v1280_v58, 0.0  ;;  %v1297_v14 = vmax.f32 %v1265_v40, 0.0  ;;  %v1234_v29 = vmul.f32 %v4363_v22, %v1201_v59  ;;  %v1250_v33 = vmul.f32 %v4363_v22, %v1217_v13 }
 0x301   : > { %v1313_v28 = vmax.f32 %v1281_v6, 0.0  ;;  %v1282_v52 = vadd.f32 %v4366_v26, %v1249_v11  ;;  %v1298_v21 = vmax.f32 %v1266_v44, 0.0  ;;  %v1300_v45 = vmax.f32 %v4429_v54, 0.0 }
 0x302   : > { %v1267_v51 = vadd.f32 %v4366_v26, %v1234_v29  ;;  %v1283_v30 = vadd.f32 %v4366_v26, %v1250_v33  ;;  %v1316_v18 = vmax.f32 %v4432_v8, 0.0  ;;  %v1301_v55 = vmax.f32 %v4435_v15, 0.0 }
 0x303   : > { %v1314_v23 = vmax.f32 %v1282_v52, 0.0  ;;  %v1317_v22 = vmax.f32 %v4438_v17, 0.0  ;;  %v1302_v5 = vmax.f32 %v4441_v61, 0.0  ;;  %v1318_v26 = vmax.f32 %v4444_v16, 0.0 }
 0x304   : > { %v1299_v19 = vmax.f32 %v1267_v51, 0.0  ;;  %v1315_v62 = vmax.f32 %v1283_v30, 0.0  ;;  %v1303_v32 = vmax.f32 %v4447_v4, 0.0  ;;  %v1319_v54 = vmax.f32 %v4456_v60, 0.0 }
 0x305   : > { %v1304_v8 = vmax.f32 %v4466_v41, 0.0  ;;  %v1320_v15 = vmax.f32 %v4469_v42, 0.0  ;;  %v1305_v17 = vmax.f32 %v4472_v35, 0.0  ;;  %v1321_v61 = vmax.f32 %v4475_v49, 0.0 }
 0x306   : > { %v1306_v16 = vmax.f32 %v4478_v43, 0.0  ;;  %v1322_v4 = vmax.f32 %v4481_v46, 0.0  ;;  %v1307_v60 = vmax.f32 %v4484_v57, 0.0  ;;  %v1323_v39 = vmax.f32 %v4494_v3, 0.0 }
 0x307   : > { %1369 = vmatmul.f32.gmra.mxu1 %v1295_v0  ;;  %1417 = vmatmul.f32.gmra.mxu3 %v1311_v34  ;;  %v4543_v58 = vperm.slane %v4540_v9, 0 }
 0x30f   : > { %1372 = vmatmul.f32.gmra.mxu1 %v1296_v7  ;;  %1420 = vmatmul.f32.gmra.mxu3 %v1312_v50 }
 0x317   : > { %1375 = vmatmul.f32.gmra.mxu1 %v1297_v14  ;;  %1423 = vmatmul.f32.gmra.mxu3 %v1313_v28 }
 0x31f   : > { %1378 = vmatmul.f32.gmra.mxu1 %v1298_v21  ;;  %1426 = vmatmul.f32.gmra.mxu3 %v1314_v23 }
 0x327   : > { %1381 = vmatmul.f32.gmra.mxu1 %v1299_v19  ;;  %1429 = vmatmul.f32.gmra.mxu3 %v1315_v62 }
 0x32f   : > { %1384 = vmatmul.f32.gmra.mxu1 %v1300_v45  ;;  %1432 = vmatmul.f32.gmra.mxu3 %v1316_v18 }
 0x337   : > { %1387 = vmatmul.f32.gmra.mxu1 %v1301_v55  ;;  %1435 = vmatmul.f32.gmra.mxu3 %v1317_v22 }
 0x33f   : > { %1390 = vmatmul.f32.gmra.mxu1 %v1302_v5  ;;  %1438 = vmatmul.f32.gmra.mxu3 %v1318_v26 }
 0x347   : > { %1393 = vmatmul.f32.gmra.mxu1 %v1303_v32  ;;  %1441 = vmatmul.f32.gmra.mxu3 %v1319_v54 }
 0x34f   : > { %1396 = vmatmul.f32.gmra.mxu1 %v1304_v8  ;;  %1444 = vmatmul.f32.gmra.mxu3 %v1320_v15 }
 0x357   : > { %1399 = vmatmul.f32.gmra.mxu1 %v1305_v17  ;;  %1447 = vmatmul.f32.gmra.mxu3 %v1321_v61 }
 0x35f   : > { %1402 = vmatmul.f32.gmra.mxu1 %v1306_v16  ;;  %1450 = vmatmul.f32.gmra.mxu3 %v1322_v4 }
 0x367   : > { %1405 = vmatmul.f32.gmra.mxu1 %v1307_v60  ;;  %1453 = vmatmul.f32.gmra.mxu3 %v1323_v39 }
 0x36c   : > { %v1361_v56 = vpop.f32.mrf.mxu1 }
 0x36d   : > { %v4549_v50 = vadd.f32 %v1361_v56, %v4543_v58 }
 0x372   : > { %v1409_v63 = vpop.f32.mrf.mxu3 }
 0x373   : > { %v1410_v4 = vadd.f32 %v1409_v63, %v4543_v58 }
 0x374   : > { %v1364_v1 = vpop.f32.mrf.mxu1 }
 0x375   : > { %v4546_v7 = vadd.f32 %v1364_v1, %v4543_v58 }
 0x377   : > { %v1489_v24 = vadd.f32 %v4546_v7, %v4549_v50 }
 0x37a   : > { %v1412_v41 = vpop.f32.mrf.mxu3 }
 0x37b   : > { %v1413_v39 = vadd.f32 %v1412_v41, %v4543_v58 }
 0x37c   : > { %v1367_v42 = vpop.f32.mrf.mxu1 }
 0x37d   : > { %v4552_v20 = vadd.f32 %v1367_v42, %v4543_v58 }
 0x37f   : > { %v1490_v6 = vadd.f32 %v1489_v24, %v4552_v20 }
 0x382   : > { %v1415_v35 = vpop.f32.mrf.mxu3 }
 0x383   : > { %v1416_v42 = vadd.f32 %v1415_v35, %v4543_v58 }
 0x384   : > { %v1370_v49 = vpop.f32.mrf.mxu1 }
 0x385   : > { %v4557_v12 = vadd.f32 %v1370_v49, %v4543_v58 }
 0x387   : > { %v1491_v28 = vadd.f32 %v1490_v6, %v4557_v12 }
 0x38a   : > { %v1418_v2 = vpop.f32.mrf.mxu3 }
 0x38c   : > { %v1373_v25 = vpop.f32.mrf.mxu1 }
 0x38d   : > { %v4561_v14 = vadd.f32 %v1373_v25, %v4543_v58  ;;  %v1419_v25 = vadd.f32 %v1418_v2, %v4543_v58 }
 0x38f   : > { %v1492_v11 = vadd.f32 %v1491_v28, %v4561_v14 }
 0x392   : > { %v1421_v43 = vpop.f32.mrf.mxu3 }
 0x394   : > { %v1376_v27 = vpop.f32.mrf.mxu1 }
 0x395   : > { %v4565_v36 = vadd.f32 %v1376_v27, %v4543_v58 }
 0x397   : > { %v1493_v13 = vadd.f32 %v1492_v11, %v4565_v36 }
 0x39a   : > { %v1424_v46 = vpop.f32.mrf.mxu3 }
 0x39c   : > { %v1379_v47 = vpop.f32.mrf.mxu1 }
 0x39d   : > { %v4569_v59 = vadd.f32 %v1379_v47, %v4543_v58  ;;  %v1422_v47 = vadd.f32 %v1421_v43, %v4543_v58 }
 0x39f   : > { %v1494_v21 = vadd.f32 %v1493_v13, %v4569_v59 }
 0x3a2   : > { %v1427_v31 = vpop.f32.mrf.mxu3 }
 0x3a4   : > { %v1382_v0 = vpop.f32.mrf.mxu1 }
 0x3a5   : > { %v4573_v44 = vadd.f32 %v1382_v0, %v4543_v58 }
 0x3a7   : > { %v1495_v33 = vadd.f32 %v1494_v21, %v4573_v44 }
 0x3aa   : > { %v1430_v34 = vpop.f32.mrf.mxu3 }
 0x3ab   : > { %v1431_v41 = vadd.f32 %v1430_v34, %v4543_v58 }
 0x3ac   : > { %v1385_v57 = vpop.f32.mrf.mxu1 }
 0x3ad   : > { %v4577_v23 = vadd.f32 %v1385_v57, %v4543_v58  ;;  %v1425_v57 = vadd.f32 %v1424_v46, %v4543_v58 }
 0x3af   : > { %v1496_v30 = vadd.f32 %v1495_v33, %v4577_v23 }
 0x3b2   : > { %v1433_v37 = vpop.f32.mrf.mxu3 }
 0x3b4   : > { %v1388_v3 = vpop.f32.mrf.mxu1 }
 0x3b5   : > { %v4581_v51 = vadd.f32 %v1388_v3, %v4543_v58 }
 0x3b7   : > { %v1497_v62 = vadd.f32 %v1496_v30, %v4581_v51 }
 0x3ba   : > { %v1436_v53 = vpop.f32.mrf.mxu3 }
 0x3bb   : > { %v4612_v24 = vadd.f32 %v1436_v53, %v4543_v58 }
 0x3bc   : > { %v1391_v48 = vpop.f32.mrf.mxu1 }
 0x3bd   : > { %v4585_v19 = vadd.f32 %v1391_v48, %v4543_v58  ;;  %v1428_v48 = vadd.f32 %v1427_v31, %v4543_v58  ;;  %v1482_v6 = vmul.f32 0.0, %v4612_v24 }
 0x3bf   : > { %v1498_v55 = vadd.f32 %v1497_v62, %v4585_v19 }
 0x3c2   : > { %v1439_v10 = vpop.f32.mrf.mxu3 }
 0x3c3   : > { %v4616_v2 = vadd.f32 %v1439_v10, %v4543_v58 }
 0x3c4   : > { %v1394_v38 = vpop.f32.mrf.mxu1 }
 0x3c5   : > { %v4589_v45 = vadd.f32 %v1394_v38, %v4543_v58  ;;  %v1483_v28 = vmul.f32 0.0, %v4616_v2 }
 0x3c7   : > { %v1499_v5 = vadd.f32 %v1498_v55, %v4589_v45 }
 0x3ca   : > { %v1442_v29 = vpop.f32.mrf.mxu3 }
 0x3cb   : > { %v4620_v46 = vadd.f32 %v1442_v29, %v4543_v58 }
 0x3cc   : > { %v1397_v40 = vpop.f32.mrf.mxu1 }
 0x3cd   : > { %v4593_v22 = vadd.f32 %v1397_v40, %v4543_v58  ;;  %v1434_v40 = vadd.f32 %v1433_v37, %v4543_v58  ;;  %v1484_v11 = vmul.f32 0.0, %v4620_v46 }
 0x3cf   : > { %v1500_v54 = vadd.f32 %v1499_v5, %v4593_v22 }
 0x3d2   : > { %v1445_v32 = vpop.f32.mrf.mxu3 }
 0x3d3   : > { %v4624_v34 = vadd.f32 %v1445_v32, %v4543_v58 }
 0x3d4   : > { %v1400_v52 = vpop.f32.mrf.mxu1 }
 0x3d5   : > { %v4597_v26 = vadd.f32 %v1400_v52, %v4543_v58  ;;  %v1485_v52 = vmul.f32 0.0, %v4624_v34 }
 0x3d7   : > { %v1501_v15 = vadd.f32 %v1500_v54, %v4597_v26 }
 0x3da   : > { %v1448_v1 = vpop.f32.mrf.mxu3 }
 0x3db   : > { %v4628_v37 = vadd.f32 %v1448_v1, %v4543_v58 }
 0x3dc   : > { %v1403_v18 = vpop.f32.mrf.mxu1 }
 0x3dd   : > { %v1404_v8 = vadd.f32 %v1403_v18, %v4543_v58  ;;  %v1486_v33 = vmul.f32 0.0, %v4628_v37 }
 0x3df   : > { %v1502_v61 = vadd.f32 %v1501_v15, %v1404_v8 }
 0x3e2   : > { %v1451_v38 = vpop.f32.mrf.mxu3 }
 0x3e3   : > { %v1452_v21 = vadd.f32 %v1451_v38, %v4543_v58 }
 0x3e4   : > { %v1406_v17 = vpop.f32.mrf.mxu1 }
 0x3e5   : > { %v1407_v16 = vadd.f32 %v1406_v17, %v4543_v58  ;;  %v1487_v18 = vmul.f32 0.0, %v1452_v21 }
 0x3e7   : > { %v1503_v60 = vadd.f32 %v1502_v61, %v1407_v16 }
 0x3e9   : > { %v1504_v56 = vadd.f32 %v1503_v60, %v1410_v4 }
 0x3ea   : > { %v1454_v13 = vpop.f32.mrf.mxu3 }
 0x3eb   : > { %v1505_v49 = vadd.f32 %v1504_v56, %v1413_v39  ;;  %v1455_v30 = vadd.f32 %v1454_v13, %v4543_v58 }
 0x3ed   : > { %v1506_v27 = vadd.f32 %v1505_v49, %v1416_v42  ;;  %v1488_v5 = vmul.f32 0.0, %v1455_v30 }
 0x3ef   : > { %v1507_v0 = vadd.f32 %v1506_v27, %v1419_v25 }
 0x3f1   : > { %v1508_v3 = vadd.f32 %v1507_v0, %v1422_v47 }
 0x3f3   : > { %v1509_v63 = vadd.f32 %v1508_v3, %v1425_v57 }
 0x3f5   : > { %v1510_v35 = vadd.f32 %v1509_v63, %v1428_v48 }
 0x3f7   : > { %v1511_v43 = vadd.f32 %v1510_v35, %v1431_v41 }
 0x3f9   : > { %v1512_v31 = vadd.f32 %v1511_v43, %v1434_v40 }
 0x3fb   : > { %v1513_v53 = vadd.f32 %v1512_v31, %v1482_v6 }
 0x3fd   : > { %v1514_v10 = vadd.f32 %v1513_v53, %v1483_v28 }
 0x3ff   : > { %v1515_v29 = vadd.f32 %v1514_v10, %v1484_v11 }
 0x401   : > { %v1516_v62 = vadd.f32 %v1515_v29, %v1485_v52 }
 0x403   : > { %v1517_v55 = vadd.f32 %v1516_v62, %v1486_v33 }
 0x405   : > { %v1518_v32 = vadd.f32 %v1517_v55, %v1487_v18 }
 0x407   : > { %v1519_v54 = vadd.f32 %v1518_v32, %v1488_v5 }
 0x409   : > { %v1520_v15 = vrot.slane %v1519_v54, 4 }
 0x40b   : > { %v1521_v17 = vadd.f32 %v1520_v15, %v1519_v54 }
 0x40d   : > { %v1522_v61 = vrot.slane %v1521_v17, 2 }
 0x40f   : > { %v1523_v60 = vadd.f32 %v1522_v61, %v1521_v17 }
 0x411   : > { %v1524_v56 = vrot.slane %v1523_v60, 1 }
 0x413   : > { %v1525_v1 = vadd.f32 %v1524_v56, %v1523_v60 }
 0x415   : > { %v4634_v49 = vmul.f32 0.005, %v1525_v1 }
 0x417   : > { %v4637_v27 = vsub.f32 %v1404_v8, %v4634_v49  ;;  %v4640_v0 = vsub.f32 %v1407_v16, %v4634_v49  ;;  %v4643_v58 = vsub.f32 %v1410_v4, %v4634_v49  ;;  %v4646_v3 = vsub.f32 %v1413_v39, %v4634_v49 }
 0x418   : > { %v4649_v63 = vsub.f32 %v1416_v42, %v4634_v49  ;;  %v4652_v38 = vsub.f32 %v1419_v25, %v4634_v49  ;;  %v4655_v35 = vsub.f32 %v1422_v47, %v4634_v49  ;;  %v4658_v8 = vsub.f32 %v1425_v57, %v4634_v49 }
 0x419   : > { %v4661_v16 = vsub.f32 %v1428_v48, %v4634_v49  ;;  %v4664_v4 = vsub.f32 %v1431_v41, %v4634_v49  ;;  %v4667_v39 = vsub.f32 %v1434_v40, %v4634_v49  ;;  %v4670_v42 = vsub.f32 %v1452_v21, %v4634_v49 }
 0x41a   : > { %v4673_v25 = vsub.f32 %v1455_v30, %v4634_v49  ;;  %v4677_v47 = vsub.f32 %v4549_v50, %v4634_v49  ;;  %v4681_v57 = vsub.f32 %v4546_v7, %v4634_v49  ;;  %v4685_v48 = vsub.f32 %v4552_v20, %v4634_v49 }
 0x41b   : > { %v4693_v43 = vsub.f32 %v4557_v12, %v4634_v49  ;;  %v4697_v50 = vsub.f32 %v4561_v14, %v4634_v49  ;;  %v4703_v20 = vsub.f32 %v4565_v36, %v4634_v49  ;;  %v4709_v12 = vsub.f32 %v4569_v59, %v4634_v49 }
 0x41c   : > { %v1591_v41 = vmul.f32 %v4677_v47, %v4677_v47  ;;  %v1592_v40 = vmul.f32 %v4681_v57, %v4681_v57  ;;  %v1593_v7 = vmul.f32 %v4685_v48, %v4685_v48  ;;  %v4715_v11 = vsub.f32 %v4573_v44, %v4634_v49 }
 0x41d   : > { %v1594_v31 = vmul.f32 %v4693_v43, %v4693_v43  ;;  %v1595_v14 = vmul.f32 %v4697_v50, %v4697_v50  ;;  %v1596_v36 = vmul.f32 %v4703_v20, %v4703_v20  ;;  %v4721_v13 = vsub.f32 %v4577_v23, %v4634_v49 }
 0x41e   : > { %v1623_v6 = vadd.f32 %v1592_v40, %v1591_v41  ;;  %v1597_v59 = vmul.f32 %v4709_v12, %v4709_v12  ;;  %v4727_v21 = vsub.f32 %v4581_v51, %v4634_v49  ;;  %v1598_v44 = vmul.f32 %v4715_v11, %v4715_v11 }
 0x41f   : > { %v4733_v33 = vsub.f32 %v4585_v19, %v4634_v49  ;;  %v1599_v23 = vmul.f32 %v4721_v13, %v4721_v13  ;;  %v4739_v62 = vsub.f32 %v4589_v45, %v4634_v49  ;;  %v4745_v55 = vsub.f32 %v4593_v22, %v4634_v49 }
 0x420   : > { %v1624_v28 = vadd.f32 %v1623_v6, %v1593_v7  ;;  %v1600_v51 = vmul.f32 %v4727_v21, %v4727_v21  ;;  %v4751_v32 = vsub.f32 %v4597_v26, %v4634_v49  ;;  %v1605_v60 = vmul.f32 %v4637_v27, %v4637_v27 }
 0x421   : > { %v1601_v19 = vmul.f32 %v4733_v33, %v4733_v33  ;;  %v1602_v45 = vmul.f32 %v4739_v62, %v4739_v62  ;;  %v1603_v15 = vmul.f32 %v4745_v55, %v4745_v55  ;;  %v1606_v26 = vmul.f32 %v4640_v0, %v4640_v0 }
 0x422   : > { %v1625_v53 = vadd.f32 %v1624_v28, %v1594_v31  ;;  %v1604_v22 = vmul.f32 %v4751_v32, %v4751_v32  ;;  %v1607_v41 = vmul.f32 %v4643_v58, %v4643_v58  ;;  %v1608_v7 = vmul.f32 %v4646_v3, %v4646_v3 }
 0x423   : > { %v1609_v31 = vmul.f32 %v4649_v63, %v4649_v63 }
 0x424   : > { %v1626_v10 = vadd.f32 %v1625_v53, %v1595_v14  ;;  %v1610_v14 = vmul.f32 %v4652_v38, %v4652_v38 }
 0x426   : > { %v1627_v52 = vadd.f32 %v1626_v10, %v1596_v36  ;;  %v1611_v36 = vmul.f32 %v4655_v35, %v4655_v35 }
 0x428   : > { %v1628_v29 = vadd.f32 %v1627_v52, %v1597_v59  ;;  %v4775_v59 = vsub.f32 %v4612_v24, %v4634_v49  ;;  %v1612_v52 = vmul.f32 %v4658_v8, %v4658_v8  ;;  %v1614_v24 = vmul.f32 %v4664_v4, %v4664_v4 }
 0x42a   : > { %v1629_v30 = vadd.f32 %v1628_v29, %v1598_v44  ;;  %v4781_v29 = vsub.f32 %v4616_v2, %v4634_v49 }
 0x42c   : > { %v1630_v18 = vadd.f32 %v1629_v30, %v1599_v23  ;;  %v1613_v23 = vmul.f32 %v4661_v16, %v4661_v16  ;;  %v1585_v2 = vmul.f32 0.0, %v4781_v29 }
 0x42e   : > { %v1631_v5 = vadd.f32 %v1630_v18, %v1600_v51  ;;  %v4787_v51 = vsub.f32 %v4620_v46, %v4634_v49  ;;  %v1584_v18 = vmul.f32 0.0, %v4775_v59  ;;  %v4801_v46 = vsub.f32 %v4628_v37, %v4634_v49 }
 0x430   : > { %v1632_v54 = vadd.f32 %v1631_v5, %v1601_v19  ;;  %v4794_v5 = vsub.f32 %v4624_v34, %v4634_v49  ;;  %v1588_v34 = vmul.f32 0.0, %v4801_v46 }
 0x432   : > { %v1633_v17 = vadd.f32 %v1632_v54, %v1602_v45  ;;  %v1615_v45 = vmul.f32 %v4667_v39, %v4667_v39  ;;  %v1620_v37 = vmul.f32 %v1588_v34, %v1588_v34 }
 0x434   : > { %v1634_v61 = vadd.f32 %v1633_v17, %v1603_v15  ;;  %v1586_v15 = vmul.f32 0.0, %v4787_v51  ;;  %v1616_v17 = vmul.f32 %v1584_v18, %v1584_v18 }
 0x436   : > { %v1635_v56 = vadd.f32 %v1634_v61, %v1604_v22  ;;  %v1587_v61 = vmul.f32 0.0, %v4794_v5 }
 0x438   : > { %v1636_v1 = vadd.f32 %v1635_v56, %v1605_v60  ;;  %v1617_v60 = vmul.f32 %v1585_v2, %v1585_v2 }
 0x43a   : > { %v1637_v40 = vadd.f32 %v1636_v1, %v1606_v26  ;;  %v1618_v26 = vmul.f32 %v1586_v15, %v1586_v15 }
 0x43c   : > { %v1638_v6 = vadd.f32 %v1637_v40, %v1607_v41  ;;  %v1589_v41 = vmul.f32 0.0, %v4670_v42  ;;  %v1619_v40 = vmul.f32 %v1587_v61, %v1587_v61  ;;  %v4809_v61 = vperm.slane %v4540_v9, 1 }
 0x43e   : > { %v1639_v28 = vadd.f32 %v1638_v6, %v1608_v7  ;;  %v1590_v6 = vmul.f32 0.0, %v4673_v25 }
 0x440   : > { %v1640_v53 = vadd.f32 %v1639_v28, %v1609_v31  ;;  %v1621_v31 = vmul.f32 %v1589_v41, %v1589_v41 }
 0x442   : > { %v1641_v10 = vadd.f32 %v1640_v53, %v1610_v14  ;;  %v1622_v14 = vmul.f32 %v1590_v6, %v1590_v6 }
 0x444   : > { %v1642_v44 = vadd.f32 %v1641_v10, %v1611_v36 }
 0x446   : > { %v1643_v30 = vadd.f32 %v1642_v44, %v1612_v52 }
 0x448   : > { %v1644_v19 = vadd.f32 %v1643_v30, %v1613_v23 }
 0x44a   : > { %v1645_v54 = vadd.f32 %v1644_v19, %v1614_v24 }
 0x44c   : > { %v1646_v22 = vadd.f32 %v1645_v54, %v1615_v45 }
 0x44e   : > { %v1647_v56 = vadd.f32 %v1646_v22, %v1616_v17 }
 0x450   : > { %v1648_v1 = vadd.f32 %v1647_v56, %v1617_v60  ;;  %v4812_v60 = vperm.slane %v4540_v9, 2 }
 0x452   : > { %v1649_v7 = vadd.f32 %v1648_v1, %v1618_v26 }
 0x454   : > { %v1650_v49 = vadd.f32 %v1649_v7, %v1619_v40 }
 0x456   : > { %v1651_v28 = vadd.f32 %v1650_v49, %v1620_v37 }
 0x458   : > { %v1652_v53 = vadd.f32 %v1651_v28, %v1621_v31 }
 0x45a   : > { %v1653_v36 = vadd.f32 %v1652_v53, %v1622_v14 }
 0x45c   : > { %v1654_v10 = vrot.slane %v1653_v36, 4 }
 0x45e   : > { %v1655_v52 = vadd.f32 %v1654_v10, %v1653_v36 }
 0x460   : > { %v1656_v44 = vrot.slane %v1655_v52, 2 }
 0x462   : > { %v1657_v23 = vadd.f32 %v1656_v44, %v1655_v52 }
 0x464   : > { %v1658_v30 = vrot.slane %v1657_v23, 1 }
 0x466   : > { %v1659_v18 = vadd.f32 %v1658_v30, %v1657_v23 }
 0x468   : > { %v1660_v24 = vmul.f32 0.005, %v1659_v18 }
 0x46a   : > { %v1661_v19 = vadd.f32 1e-05, %v1660_v24 }
 0x46c   : > { %3622 = vrsqrt.f32 %v1661_v19  ;;  %vm1668_vm4 = vweird.f32 %v1661_v19 }
 0x472   : > { %v3623_v2 = vpop.eup %3622 }
 0x473   : > { %v1663_v45 = vmul.f32 %v3623_v2, %v1661_v19  ;;  %vm1669_vm3 = vweird.f32 %v3623_v2 }
 0x474   : > { %vm1670_vm5 = vmor %vm1668_vm4, %vm1669_vm3 }
 0x475   : > { %v1664_v54 = vmul.f32 %v3623_v2, %v1663_v45 }
 0x477   : > { %v1665_v15 = vmul.f32 0.5, %v1664_v54 }
 0x479   : > { %v1666_v17 = vsub.f32 1.5, %v1665_v15 }
 0x47b   : > { %v1667_v22 = vmul.f32 %v3623_v2, %v1666_v17 }
 0x47d   : > { %v1671_v56 = vsel %vm1670_vm5, %v3623_v2, %v1667_v22 }
 0x47e   : > { %v1672_v34 = vmul.f32 %v1671_v56, %v4677_v47  ;;  %v1673_v26 = vmul.f32 %v1671_v56, %v4681_v57  ;;  %v1674_v1 = vmul.f32 %v1671_v56, %v4685_v48  ;;  %v1675_v41 = vmul.f32 %v1671_v56, %v4693_v43 }
 0x47f   : > { %v1676_v40 = vmul.f32 %v1671_v56, %v4697_v50  ;;  %v1677_v7 = vmul.f32 %v1671_v56, %v4703_v20  ;;  %v1678_v6 = vmul.f32 %v1671_v56, %v4709_v12  ;;  %v1679_v37 = vmul.f32 %v1671_v56, %v4715_v11 }
 0x480   : > { %v1680_v9 = vmul.f32 %v1671_v56, %v4721_v13  ;;  %v1681_v49 = vmul.f32 %v1671_v56, %v4727_v21  ;;  %v1682_v47 = vmul.f32 %v1671_v56, %v4733_v33  ;;  %v1683_v57 = vmul.f32 %v1671_v56, %v4739_v62 }
 0x481   : > { %v1684_v48 = vmul.f32 %v1671_v56, %v4745_v55  ;;  %v1685_v43 = vmul.f32 %v1671_v56, %v4751_v32  ;;  %v1686_v50 = vmul.f32 %v1671_v56, %v4637_v27  ;;  %v1687_v20 = vmul.f32 %v1671_v56, %v4640_v0 }
 0x482   : > { %v1688_v12 = vmul.f32 %v1671_v56, %v4643_v58  ;;  %v1689_v11 = vmul.f32 %v1671_v56, %v4646_v3  ;;  %v1690_v13 = vmul.f32 %v1671_v56, %v4649_v63  ;;  %v1691_v21 = vmul.f32 %v1671_v56, %v4652_v38 }
 0x483   : > { %v1692_v33 = vmul.f32 %v1671_v56, %v4655_v35  ;;  %v1693_v62 = vmul.f32 %v1671_v56, %v4658_v8  ;;  %v1694_v55 = vmul.f32 %v1671_v56, %v4661_v16  ;;  %v1695_v32 = vmul.f32 %v1671_v56, %v4664_v4 }
 0x484   : > { %v1696_v27 = vmul.f32 %v1671_v56, %v4667_v39  ;;  %v1697_v0 = vmul.f32 %v1671_v56, %v4775_v59  ;;  %v1698_v58 = vmul.f32 %v1671_v56, %v4781_v29  ;;  %v1699_v3 = vmul.f32 %v1671_v56, %v4787_v51 }
 0x485   : > { %v1700_v63 = vmul.f32 %v1671_v56, %v4794_v5  ;;  %v1701_v38 = vmul.f32 %v1671_v56, %v4801_v46  ;;  %v1702_v35 = vmul.f32 %v1671_v56, %v4670_v42  ;;  %v1703_v8 = vmul.f32 %v1671_v56, %v4673_v25 }
 0x486   : > { %v1705_v16 = vmul.f32 %v4809_v61, %v1672_v34  ;;  %v1706_v4 = vmul.f32 %v4809_v61, %v1673_v26  ;;  %v1707_v39 = vmul.f32 %v4809_v61, %v1674_v1  ;;  %v1708_v59 = vmul.f32 %v4809_v61, %v1675_v41 }
 0x487   : > { %v1709_v29 = vmul.f32 %v4809_v61, %v1676_v40  ;;  %v1710_v51 = vmul.f32 %v4809_v61, %v1677_v7  ;;  %v1711_v5 = vmul.f32 %v4809_v61, %v1678_v6  ;;  %v1712_v46 = vmul.f32 %v4809_v61, %v1679_v37 }
 0x488   : > { %v1713_v42 = vmul.f32 %v4809_v61, %v1680_v9  ;;  %v1714_v25 = vmul.f32 %v4809_v61, %v1681_v49  ;;  %v1715_v31 = vmul.f32 %v4809_v61, %v1682_v47  ;;  %v1716_v28 = vmul.f32 %v4809_v61, %v1683_v57 }
 0x489   : > { %v1717_v14 = vmul.f32 %v4809_v61, %v1684_v48  ;;  %v1718_v53 = vmul.f32 %v4809_v61, %v1685_v43  ;;  %v1719_v36 = vmul.f32 %v4809_v61, %v1686_v50  ;;  %v1720_v10 = vmul.f32 %v4809_v61, %v1687_v20 }
 0x48a   : > { %v1721_v52 = vmul.f32 %v4809_v61, %v1688_v12  ;;  %v1722_v44 = vmul.f32 %v4809_v61, %v1689_v11  ;;  %v1723_v23 = vmul.f32 %v4809_v61, %v1690_v13  ;;  %v1724_v30 = vmul.f32 %v4809_v61, %v1691_v21 }
 0x48b   : > { %v1725_v18 = vmul.f32 %v4809_v61, %v1692_v33  ;;  %v1726_v24 = vmul.f32 %v4809_v61, %v1693_v62  ;;  %v1727_v19 = vmul.f32 %v4809_v61, %v1694_v55  ;;  %v1728_v2 = vmul.f32 %v4809_v61, %v1695_v32 }
 0x48c   : > { %v1729_v45 = vmul.f32 %v4809_v61, %v1696_v27  ;;  %v1730_v54 = vmul.f32 %v4809_v61, %v1697_v0  ;;  %v1731_v15 = vmul.f32 %v4809_v61, %v1698_v58  ;;  %v1732_v17 = vmul.f32 %v4809_v61, %v1699_v3 }
 0x48d   : > { %v1733_v22 = vmul.f32 %v4809_v61, %v1700_v63  ;;  %v1734_v56 = vmul.f32 %v4809_v61, %v1701_v38  ;;  %v1735_v34 = vmul.f32 %v4809_v61, %v1702_v35  ;;  %v1736_v26 = vmul.f32 %v4809_v61, %v1703_v8 }
 0x48e   : > { %v4879_v1 = vadd.f32 %v4812_v60, %v1705_v16  ;;  %v4882_v41 = vadd.f32 %v4812_v60, %v1706_v4  ;;  %v4885_v40 = vadd.f32 %v4812_v60, %v1707_v39  ;;  %v4888_v7 = vadd.f32 %v4812_v60, %v1708_v59 }
 0x48f   : > { %v4891_v6 = vadd.f32 %v4812_v60, %v1709_v29  ;;  %v1743_v37 = vadd.f32 %v4812_v60, %v1710_v51  ;;  %v1744_v9 = vadd.f32 %v4812_v60, %v1711_v5  ;;  %v1745_v61 = vadd.f32 %v4812_v60, %v1712_v46 }
 0x490   : > { %v1746_v49 = vadd.f32 %v4812_v60, %v1713_v42  ;;  %v1747_v47 = vadd.f32 %v4812_v60, %v1714_v25  ;;  %v1748_v57 = vadd.f32 %v4812_v60, %v1715_v31  ;;  %v1749_v48 = vadd.f32 %v4812_v60, %v1716_v28 }
 0x491   : > { %v1750_v43 = vadd.f32 %v4812_v60, %v1717_v14  ;;  %v1751_v50 = vadd.f32 %v4812_v60, %v1718_v53  ;;  %v1752_v20 = vadd.f32 %v4812_v60, %v1719_v36  ;;  %v1753_v12 = vadd.f32 %v4812_v60, %v1720_v10 }
 0x492   : > { %v1754_v11 = vadd.f32 %v4812_v60, %v1721_v52  ;;  %v1755_v13 = vadd.f32 %v4812_v60, %v1722_v44  ;;  %v1756_v21 = vadd.f32 %v4812_v60, %v1723_v23  ;;  %v1757_v33 = vadd.f32 %v4812_v60, %v1724_v30 }
 0x493   : > { %v1758_v62 = vadd.f32 %v4812_v60, %v1725_v18  ;;  %v1759_v55 = vadd.f32 %v4812_v60, %v1726_v24  ;;  %v1760_v32 = vadd.f32 %v4812_v60, %v1727_v19  ;;  %v1761_v27 = vadd.f32 %v4812_v60, %v1728_v2 }
 0x494   : > { %v1762_v0 = vadd.f32 %v4812_v60, %v1729_v45  ;;  %v1763_v58 = vadd.f32 %v4812_v60, %v1730_v54  ;;  %v1764_v3 = vadd.f32 %v4812_v60, %v1731_v15  ;;  %v1765_v63 = vadd.f32 %v4812_v60, %v1732_v17 }
 0x495   : > { %v1766_v38 = vadd.f32 %v4812_v60, %v1733_v22  ;;  %v1767_v35 = vadd.f32 %v4812_v60, %v1734_v56  ;;  %v1768_v8 = vadd.f32 %v4812_v60, %v1735_v34  ;;  %v1769_v16 = vadd.f32 %v4812_v60, %v1736_v26 }
 0x496   : > { %v1770_v4 = vmax.f32 %v4879_v1, 0.0  ;;  %v1771_v39 = vmax.f32 %v4882_v41, 0.0  ;;  %v1772_v59 = vmax.f32 %v4885_v40, 0.0  ;;  %v1773_v29 = vmax.f32 %v4888_v7, 0.0 }
 0x497   : > { %v1774_v51 = vmax.f32 %v4891_v6, 0.0  ;;  %v1775_v5 = vmax.f32 %v1743_v37, 0.0  ;;  %v1776_v46 = vmax.f32 %v1744_v9, 0.0  ;;  %v1777_v42 = vmax.f32 %v1745_v61, 0.0 }
 0x498   : > { %v1778_v25 = vmax.f32 %v1746_v49, 0.0  ;;  %v1779_v31 = vmax.f32 %v1747_v47, 0.0  ;;  %v1780_v28 = vmax.f32 %v1748_v57, 0.0  ;;  %v1781_v14 = vmax.f32 %v1749_v48, 0.0 }
 0x499   : > { %v1782_v53 = vmax.f32 %v1750_v43, 0.0  ;;  %v1783_v36 = vmax.f32 %v1751_v50, 0.0  ;;  %v1784_v60 = vmax.f32 %v1752_v20, 0.0  ;;  %v1785_v10 = vmax.f32 %v1753_v12, 0.0 }
 0x49a   : > { %v1786_v52 = vmax.f32 %v1754_v11, 0.0  ;;  %v1787_v44 = vmax.f32 %v1755_v13, 0.0  ;;  %v1788_v23 = vmax.f32 %v1756_v21, 0.0  ;;  %v1789_v30 = vmax.f32 %v1757_v33, 0.0 }
 0x49b   : > { %v1790_v18 = vmax.f32 %v1758_v62, 0.0  ;;  %v1791_v24 = vmax.f32 %v1759_v55, 0.0  ;;  %v1792_v19 = vmax.f32 %v1760_v32, 0.0  ;;  %v1793_v2 = vmax.f32 %v1761_v27, 0.0 }
 0x49c   : > { %v1794_v45 = vmax.f32 %v1762_v0, 0.0  ;;  %v1795_v54 = vmax.f32 %v1763_v58, 0.0  ;;  %v1796_v15 = vmax.f32 %v1764_v3, 0.0  ;;  %v1797_v17 = vmax.f32 %v1765_v63, 0.0 }
 0x49d   : > { %v1798_v22 = vmax.f32 %v1766_v38, 0.0  ;;  %v1799_v56 = vmax.f32 %v1767_v35, 0.0  ;;  %v1800_v34 = vmax.f32 %v1768_v8, 0.0  ;;  %v1801_v26 = vmax.f32 %v1769_v16, 0.0 }
 0x49e   : > { %v3317_v1 = vpack.c.bf16 %v1771_v39, %v1770_v4  ;;  %v3322_v41 = vpack.c.bf16 %v1773_v29, %v1772_v59  ;;  %v3327_v40 = vpack.c.bf16 %v1775_v5, %v1774_v51  ;;  %v3332_v7 = vpack.c.bf16 %v1777_v42, %v1776_v46 }
 0x49f   : > { %v3337_v6 = vpack.c.bf16 %v1779_v31, %v1778_v25  ;;  %v3342_v37 = vpack.c.bf16 %v1781_v14, %v1780_v28  ;;  %v3347_v9 = vpack.c.bf16 %v1783_v36, %v1782_v53  ;;  %v3352_v61 = vpack.c.bf16 %v1785_v10, %v1784_v60 }
 0x4a0   : > { %3318 = vst [vmem:[#allocation2] sm:$0xff] %v3317_v1   ;;  %v3357_v49 = vpack.c.bf16 %v1787_v44, %v1786_v52  ;;  %v3362_v47 = vpack.c.bf16 %v1789_v30, %v1788_v23  ;;  %v3367_v57 = vpack.c.bf16 %v1791_v24, %v1790_v18  ;;  %v3372_v48 = vpack.c.bf16 %v1793_v2, %v1792_v19 }
 0x4a1   : > { %3394 = vst [vmem:[#allocation2 + $0x8] sm:$0xff] %v3322_v41   ;;  %v3377_v43 = vpack.c.bf16 %v1795_v54, %v1794_v45  ;;  %v3382_v50 = vpack.c.bf16 %v1797_v17, %v1796_v15  ;;  %v3387_v20 = vpack.c.bf16 %v1799_v56, %v1798_v22  ;;  %v3392_v12 = vpack.c.bf16 %v1801_v26, %v1800_v34 }
 0x4a2   : > { %3395 = vst [vmem:[#allocation2 + $0x10] sm:$0xff] %v3327_v40  }
 0x4a3   : > { %3396 = vst [vmem:[#allocation2 + $0x18] sm:$0xff] %v3332_v7  }
 0x4a4   : > { %3397 = vst [vmem:[#allocation2 + $0x20] sm:$0xff] %v3337_v6  }
 0x4a5   : > { %3398 = vst [vmem:[#allocation2 + $0x28] sm:$0xff] %v3342_v37  }
 0x4a6   : > { %3399 = vst [vmem:[#allocation2 + $0x30] sm:$0xff] %v3347_v9  }
 0x4a7   : > { %3400 = vst [vmem:[#allocation2 + $0x38] sm:$0xff] %v3352_v61  }
 0x4a8   : > { %3401 = vst [vmem:[#allocation2 + $0x40] sm:$0xff] %v3357_v49  }
 0x4a9   : > { %3402 = vst [vmem:[#allocation2 + $0x48] sm:$0xff] %v3362_v47  }
 0x4aa   : > { %3403 = vst [vmem:[#allocation2 + $0x50] sm:$0xff] %v3367_v57  }
 0x4ab   : > { %3404 = vst [vmem:[#allocation2 + $0x58] sm:$0xff] %v3372_v48  }
 0x4ac   : > { %3405 = vst [vmem:[#allocation2 + $0x60] sm:$0xff] %v3377_v43  }
 0x4ad   : > { %3406 = vst [vmem:[#allocation2 + $0x68] sm:$0xff] %v3382_v50  }
 0x4ae   : > { %3407 = vst [vmem:[#allocation2 + $0x70] sm:$0xff] %v3387_v20  }
 0x4af   : > { %3408 = vst [vmem:[#allocation2 + $0x78] sm:$0xff] %v3392_v12  }
 0x4b0 PF: > { %p3275_p7 = scmp.ne.s32.totalorder %s3847_s19, 1 }
 0x4b2   : > { %1869 = sbr.rel (%p3275_p7) target bundleno = 2462 (0x99e), region = 68 }
 0x4b7   : > { %v1918_v11 = vld [vmem:[#allocation9 + $0x178] sm:$0xff]  ;;  %v1917_v13 = vld [vmem:[#allocation9 + $0x170] sm:$0xff]  ;;  %v1916_v21 = vld [vmem:[#allocation9 + $0x168] sm:$0xff] }
 0x4b8   : > { %1922 = vmatpush.msra.mxu0 %v1918_v11  ;;  %3457 = vmatpush.msra.mxu3 %v1918_v11  ;;  %v1915_v33 = vld [vmem:[#allocation9 + $0x160] sm:$0xff]  ;;  %v1914_v62 = vld [vmem:[#allocation9 + $0x158] sm:$0xff]  ;;  %v1913_v55 = vld [vmem:[#allocation9 + $0x150] sm:$0xff] }
 0x4b9   : > { %v1912_v32 = vld [vmem:[#allocation9 + $0x148] sm:$0xff]  ;;  %v1911_v27 = vld [vmem:[#allocation9 + $0x140] sm:$0xff]  ;;  %v1910_v0 = vld [vmem:[#allocation9 + $0x138] sm:$0xff] }
 0x4ba   : > { %1923 = vmatpush.msra.mxu0 %v1917_v13  ;;  %3458 = vmatpush.msra.mxu3 %v1917_v13  ;;  %v1909_v58 = vld [vmem:[#allocation9 + $0x130] sm:$0xff]  ;;  %v1908_v3 = vld [vmem:[#allocation9 + $0x128] sm:$0xff]  ;;  %v1907_v63 = vld [vmem:[#allocation9 + $0x120] sm:$0xff] }
 0x4bb   : > { %v1906_v38 = vld [vmem:[#allocation9 + $0x118] sm:$0xff]  ;;  %v1905_v35 = vld [vmem:[#allocation9 + $0x110] sm:$0xff]  ;;  %v1904_v8 = vld [vmem:[#allocation9 + $0x108] sm:$0xff] }
 0x4bc   : > { %1924 = vmatpush.msra.mxu0 %v1916_v21  ;;  %3459 = vmatpush.msra.mxu3 %v1916_v21  ;;  %v1903_v16 = vld [vmem:[#allocation9 + $0x100] sm:$0xff]  ;;  %v1871_v39 = vld [vmem:[#allocation3 + $0x8] sm:$0xff]  ;;  %v1872_v59 = vld [vmem:[#allocation3 + $0x10] sm:$0xff] }
 0x4bd   : > { %v1870_v4 = vld [vmem:[#allocation3] sm:$0xff]  ;;  %v1873_v29 = vld [vmem:[#allocation3 + $0x18] sm:$0xff]  ;;  %v1875_v5 = vld [vmem:[#allocation3 + $0x28] sm:$0xff] }
 0x4be   : > { %1925 = vmatpush.msra.mxu0 %v1915_v33  ;;  %3460 = vmatpush.msra.mxu3 %v1915_v33  ;;  %v1874_v51 = vld [vmem:[#allocation3 + $0x20] sm:$0xff]  ;;  %v1876_v46 = vld [vmem:[#allocation3 + $0x30] sm:$0xff]  ;;  %v1877_v42 = vld [vmem:[#allocation3 + $0x38] sm:$0xff] }
 0x4bf   : > { %v1878_v25 = vld [vmem:[#allocation3 + $0x40] sm:$0xff]  ;;  %v1879_v31 = vld [vmem:[#allocation3 + $0x48] sm:$0xff]  ;;  %v1880_v28 = vld [vmem:[#allocation3 + $0x50] sm:$0xff] }
 0x4c0   : > { %1926 = vmatpush.msra.mxu0 %v1914_v62  ;;  %3461 = vmatpush.msra.mxu3 %v1914_v62  ;;  %v1881_v14 = vld [vmem:[#allocation3 + $0x58] sm:$0xff]  ;;  %v1882_v53 = vld [vmem:[#allocation3 + $0x60] sm:$0xff]  ;;  %v1883_v36 = vld [vmem:[#allocation3 + $0x68] sm:$0xff] }
 0x4c1   : > { %v1894_v60 = vld [vmem:[#allocation3 + $0xc0] sm:$0xff]  ;;  %v1884_v10 = vld [vmem:[#allocation3 + $0x70] sm:$0xff]  ;;  %v1895_v52 = vld [vmem:[#allocation3 + $0xc8] sm:$0xff] }
 0x4c2   : > { %1927 = vmatpush.msra.mxu0 %v1913_v55  ;;  %3462 = vmatpush.msra.mxu3 %v1913_v55  ;;  %v1885_v44 = vld [vmem:[#allocation3 + $0x78] sm:$0xff]  ;;  %v1896_v23 = vld [vmem:[#allocation3 + $0xd0] sm:$0xff]  ;;  %v1886_v18 = vld [vmem:[#allocation3 + $0x80] sm:$0xff] }
 0x4c3   : > { %v1897_v24 = vld [vmem:[#allocation3 + $0xd8] sm:$0xff]  ;;  %v1887_v2 = vld [vmem:[#allocation3 + $0x88] sm:$0xff]  ;;  %v1898_v45 = vld [vmem:[#allocation3 + $0xe0] sm:$0xff] }
 0x4c4   : > { %1928 = vmatpush.msra.mxu0 %v1912_v32  ;;  %3463 = vmatpush.msra.mxu3 %v1912_v32  ;;  %v1888_v15 = vld [vmem:[#allocation3 + $0x90] sm:$0xff]  ;;  %v1899_v17 = vld [vmem:[#allocation3 + $0xe8] sm:$0xff]  ;;  %v1889_v56 = vld [vmem:[#allocation3 + $0x98] sm:$0xff] }
 0x4c5   : > { %v1900_v34 = vld [vmem:[#allocation3 + $0xf0] sm:$0xff]  ;;  %v1890_v1 = vld [vmem:[#allocation3 + $0xa0] sm:$0xff]  ;;  %v1901_v41 = vld [vmem:[#allocation3 + $0xf8] sm:$0xff] }
 0x4c6   : > { %1929 = vmatpush.msra.mxu0 %v1911_v27  ;;  %3464 = vmatpush.msra.mxu3 %v1911_v27  ;;  %v1891_v7 = vld [vmem:[#allocation3 + $0xa8] sm:$0xff]  ;;  %v1892_v37 = vld [vmem:[#allocation3 + $0xb0] sm:$0xff]  ;;  %v1893_v61 = vld [vmem:[#allocation3 + $0xb8] sm:$0xff] }
 0x4c7   : > { %v4928_v33 = vld [vmem:[#allocation10 + $0x8] sm:$0x7] }
 0x4c8   : > { %1930 = vmatpush.msra.mxu0 %v1910_v0  ;;  %3465 = vmatpush.msra.mxu3 %v1910_v0  ;;  %v4931_v55 = vperm.slane %v4928_v33, 0 }
 0x4ca   : > { %1931 = vmatpush.msra.mxu0 %v1909_v58  ;;  %3466 = vmatpush.msra.mxu3 %v1909_v58 }
 0x4cc   : > { %1932 = vmatpush.msra.mxu0 %v1908_v3  ;;  %3467 = vmatpush.msra.mxu3 %v1908_v3 }
 0x4ce   : > { %1933 = vmatpush.msra.mxu0 %v1907_v63  ;;  %3468 = vmatpush.msra.mxu3 %v1907_v63 }
 0x4d0   : > { %1934 = vmatpush.msra.mxu0 %v1906_v38  ;;  %3469 = vmatpush.msra.mxu3 %v1906_v38 }
 0x4d2   : > { %1935 = vmatpush.msra.mxu0 %v1905_v35  ;;  %3470 = vmatpush.msra.mxu3 %v1905_v35 }
 0x4d4   : > { %1936 = vmatpush.msra.mxu0 %v1904_v8  ;;  %3471 = vmatpush.msra.mxu3 %v1904_v8 }
 0x4d6   : > { %1937 = vmatpush.msra.mxu0 %v1903_v16  ;;  %3472 = vmatpush.msra.mxu3 %v1903_v16 }
 0x4d7   : > { %1938 = vmatmul.f32.vlgmr.msra.gmra.mxu0 %v1870_v4  ;;  %2010 = vmatmul.f32.vlgmr.msra.gmra.mxu3 %v1894_v60 }
 0x4df   : > { %1941 = vmatmul.f32.gmra.mxu0 %v1871_v39  ;;  %2013 = vmatmul.f32.gmra.mxu3 %v1895_v52 }
 0x4e7   : > { %1944 = vmatmul.f32.gmra.mxu0 %v1872_v59  ;;  %2016 = vmatmul.f32.gmra.mxu3 %v1896_v23 }
 0x4ef   : > { %1947 = vmatmul.f32.gmra.mxu0 %v1873_v29  ;;  %2019 = vmatmul.f32.gmra.mxu3 %v1897_v24 }
 0x4f7   : > { %1950 = vmatmul.f32.gmra.mxu0 %v1874_v51  ;;  %2022 = vmatmul.f32.gmra.mxu3 %v1898_v45 }
 0x4ff   : > { %1953 = vmatmul.f32.gmra.mxu0 %v1875_v5  ;;  %2025 = vmatmul.f32.gmra.mxu3 %v1899_v17 }
 0x507   : > { %1956 = vmatmul.f32.gmra.mxu0 %v1876_v46  ;;  %2028 = vmatmul.f32.gmra.mxu3 %v1900_v34 }
 0x50f   : > { %1959 = vmatmul.f32.gmra.mxu0 %v1877_v42  ;;  %2031 = vmatmul.f32.gmra.mxu3 %v1901_v41 }
 0x517   : > { %1962 = vmatmul.f32.gmra.mxu0 %v1878_v25 }
 0x51f   : > { %1965 = vmatmul.f32.gmra.mxu0 %v1879_v31 }
 0x527   : > { %1968 = vmatmul.f32.gmra.mxu0 %v1880_v28 }
 0x52f   : > { %1971 = vmatmul.f32.gmra.mxu0 %v1881_v14 }
 0x537   : > { %1974 = vmatmul.f32.gmra.mxu0 %v1882_v53 }
 0x53f   : > { %1977 = vmatmul.f32.gmra.mxu0 %v1883_v36 }
 0x547   : > { %1980 = vmatmul.f32.gmra.mxu0 %v1884_v10 }
 0x54f   : > { %1983 = vmatmul.f32.gmra.mxu0 %v1885_v44 }
 0x554   : > { %v1939_v30 = vpop.f32.mrf.mxu0 }
 0x555   : > { %v4937_v27 = vadd.f32 %v1939_v30, %v4931_v55 }
 0x557   : > { %1986 = vmatmul.f32.gmra.mxu0 %v1886_v18 }
 0x55a   : > { %v4926_v11 = vpop.f32.mrf.mxu3 }
 0x55c   : > { %v1942_v19 = vpop.f32.mrf.mxu0 }
 0x55d   : > { %v4934_v32 = vadd.f32 %v1942_v19, %v4931_v55 }
 0x55f   : > { %1989 = vmatmul.f32.gmra.mxu0 %v1887_v2  ;;  %v2067_v3 = vadd.f32 %v4934_v32, %v4937_v27 }
 0x562   : > { %v2014_v21 = vpop.f32.mrf.mxu3 }
 0x564   : > { %v1945_v54 = vpop.f32.mrf.mxu0 }
 0x565   : > { %v4940_v0 = vadd.f32 %v1945_v54, %v4931_v55 }
 0x567   : > { %1992 = vmatmul.f32.gmra.mxu0 %v1888_v15  ;;  %v2068_v35 = vadd.f32 %v2067_v3, %v4940_v0 }
 0x56a   : > { %v2017_v58 = vpop.f32.mrf.mxu3 }
 0x56c   : > { %v1948_v22 = vpop.f32.mrf.mxu0 }
 0x56d   : > { %v4945_v63 = vadd.f32 %v1948_v22, %v4931_v55 }
 0x56f   : > { %1995 = vmatmul.f32.gmra.mxu0 %v1889_v56  ;;  %v2069_v16 = vadd.f32 %v2068_v35, %v4945_v63 }
 0x572   : > { %v2020_v46 = vpop.f32.mrf.mxu3 }
 0x573   : > { %v5041_v35 = vadd.f32 %v2020_v46, %v4931_v55 }
 0x574   : > { %v1951_v26 = vpop.f32.mrf.mxu0 }
 0x575   : > { %v4949_v8 = vadd.f32 %v1951_v26, %v4931_v55 }
 0x577   : > { %1998 = vmatmul.f32.gmra.mxu0 %v1890_v1  ;;  %v2070_v39 = vadd.f32 %v2069_v16, %v4949_v8 }
 0x57a   : > { %v2023_v23 = vpop.f32.mrf.mxu3 }
 0x57c   : > { %v1954_v40 = vpop.f32.mrf.mxu0 }
 0x57d   : > { %v4953_v4 = vadd.f32 %v1954_v40, %v4931_v55 }
 0x57f   : > { %2001 = vmatmul.f32.gmra.mxu0 %v1891_v7  ;;  %v2071_v29 = vadd.f32 %v2070_v39, %v4953_v4  ;;  %v5046_v39 = vadd.f32 %v2023_v23, %v4931_v55 }
 0x582   : > { %v2026_v34 = vpop.f32.mrf.mxu3 }
 0x584   : > { %v1957_v6 = vpop.f32.mrf.mxu0 }
 0x585   : > { %v4957_v59 = vadd.f32 %v1957_v6, %v4931_v55 }
 0x587   : > { %2004 = vmatmul.f32.gmra.mxu0 %v1892_v37  ;;  %v2072_v42 = vadd.f32 %v2071_v29, %v4957_v59 }
 0x58c   : > { %v1960_v9 = vpop.f32.mrf.mxu0 }
 0x58d   : > { %v4961_v51 = vadd.f32 %v1960_v9, %v4931_v55 }
 0x58f   : > { %2007 = vmatmul.f32.gmra.mxu0 %v1893_v61  ;;  %v2073_v31 = vadd.f32 %v2072_v42, %v4961_v51 }
 0x594   : > { %v1963_v49 = vpop.f32.mrf.mxu0 }
 0x595   : > { %v4965_v25 = vadd.f32 %v1963_v49, %v4931_v55 }
 0x597   : > { %v2074_v14 = vadd.f32 %v2073_v31, %v4965_v25  ;;  %v2063_v31 = vmul.f32 0.0, %v5046_v39 }
 0x59c   : > { %v1966_v47 = vpop.f32.mrf.mxu0 }
 0x59d   : > { %v4969_v28 = vadd.f32 %v1966_v47, %v4931_v55 }
 0x59f   : > { %v2075_v36 = vadd.f32 %v2074_v14, %v4969_v28 }
 0x5a4   : > { %v1969_v57 = vpop.f32.mrf.mxu0 }
 0x5a5   : > { %v4973_v53 = vadd.f32 %v1969_v57, %v4931_v55  ;;  %v2029_v57 = vpop.f32.mrf.mxu3 }
 0x5a6   : > { %v5054_v46 = vadd.f32 %v2029_v57, %v4931_v55 }
 0x5a7   : > { %v2076_v52 = vadd.f32 %v2075_v36, %v4973_v53 }
 0x5a8   : > { %v2065_v23 = vmul.f32 0.0, %v5054_v46 }
 0x5ac   : > { %v1972_v48 = vpop.f32.mrf.mxu0 }
 0x5ad   : > { %v4977_v60 = vadd.f32 %v1972_v48, %v4931_v55 }
 0x5af   : > { %v2077_v30 = vadd.f32 %v2076_v52, %v4977_v60 }
 0x5b4   : > { %v1975_v43 = vpop.f32.mrf.mxu0 }
 0x5b5   : > { %v4981_v44 = vadd.f32 %v1975_v43, %v4931_v55 }
 0x5b7   : > { %v2078_v24 = vadd.f32 %v2077_v30, %v4981_v44 }
 0x5bc   : > { %v1978_v50 = vpop.f32.mrf.mxu0 }
 0x5bd   : > { %v4985_v18 = vadd.f32 %v1978_v50, %v4931_v55  ;;  %v5025_v50 = vadd.f32 %v2014_v21, %v4931_v55 }
 0x5bf   : > { %v2079_v2 = vadd.f32 %v2078_v24, %v4985_v18 }
 0x5c4   : > { %v1981_v20 = vpop.f32.mrf.mxu0 }
 0x5c5   : > { %v4989_v19 = vadd.f32 %v1981_v20, %v4931_v55 }
 0x5c7   : > { %v2080_v15 = vadd.f32 %v2079_v2, %v4989_v19 }
 0x5cc   : > { %v1984_v12 = vpop.f32.mrf.mxu0 }
 0x5cd   : > { %v4993_v45 = vadd.f32 %v1984_v12, %v4931_v55 }
 0x5cf   : > { %v2081_v22 = vadd.f32 %v2080_v15, %v4993_v45 }
 0x5d4   : > { %v1987_v13 = vpop.f32.mrf.mxu0 }
 0x5d5   : > { %v4997_v17 = vadd.f32 %v1987_v13, %v4931_v55  ;;  %v5033_v13 = vadd.f32 %v4926_v11, %v4931_v55  ;;  %v2032_v11 = vpop.f32.mrf.mxu3 }
 0x5d6   : > { %v5057_v36 = vadd.f32 %v2032_v11, %v4931_v55 }
 0x5d7   : > { %v2082_v26 = vadd.f32 %v2081_v22, %v4997_v17 }
 0x5d8   : > { %v2066_v24 = vmul.f32 0.0, %v5057_v36 }
 0x5dc   : > { %v1990_v62 = vpop.f32.mrf.mxu0 }
 0x5dd   : > { %v5001_v56 = vadd.f32 %v1990_v62, %v4931_v55  ;;  %v5036_v62 = vadd.f32 %v2017_v58, %v4931_v55  ;;  %v5050_v58 = vadd.f32 %v2026_v34, %v4931_v55 }
 0x5df   : > { %v2083_v41 = vadd.f32 %v2082_v26, %v5001_v56  ;;  %v2061_v16 = vmul.f32 0.0, %v5036_v62 }
 0x5e4   : > { %v1993_v38 = vpop.f32.mrf.mxu0 }
 0x5e5   : > { %v5005_v1 = vadd.f32 %v1993_v38, %v4931_v55  ;;  %v2060_v38 = vmul.f32 0.0, %v5025_v50 }
 0x5e7   : > { %v2084_v6 = vadd.f32 %v2083_v41, %v5005_v1 }
 0x5ec   : > { %v1996_v5 = vpop.f32.mrf.mxu0 }
 0x5ed   : > { %v5009_v40 = vadd.f32 %v1996_v5, %v4931_v55  ;;  %v2062_v5 = vmul.f32 0.0, %v5041_v35 }
 0x5ef   : > { %v2085_v9 = vadd.f32 %v2084_v6, %v5009_v40 }
 0x5f4   : > { %v1999_v10 = vpop.f32.mrf.mxu0 }
 0x5f5   : > { %v5013_v37 = vadd.f32 %v1999_v10, %v4931_v55  ;;  %v2064_v10 = vmul.f32 0.0, %v5050_v58 }
 0x5f7   : > { %v2086_v49 = vadd.f32 %v2085_v9, %v5013_v37 }
 0x5fc   : > { %v2002_v54 = vpop.f32.mrf.mxu0 }
 0x5fd   : > { %v5017_v61 = vadd.f32 %v2002_v54, %v4931_v55 }
 0x5ff   : > { %v2087_v48 = vadd.f32 %v2086_v49, %v5017_v61 }
 0x604   : > { %v2005_v7 = vpop.f32.mrf.mxu0 }
 0x605   : > { %v5021_v47 = vadd.f32 %v2005_v7, %v4931_v55 }
 0x607   : > { %v2088_v20 = vadd.f32 %v2087_v48, %v5021_v47 }
 0x60c   : > { %v2008_v43 = vpop.f32.mrf.mxu0 }
 0x60d   : > { %v5029_v12 = vadd.f32 %v2008_v43, %v4931_v55 }
 0x60f   : > { %v2089_v3 = vadd.f32 %v2088_v20, %v5029_v12 }
 0x611   : > { %v2090_v21 = vadd.f32 %v2089_v3, %v5033_v13 }
 0x613   : > { %v2091_v29 = vadd.f32 %v2090_v21, %v2060_v38 }
 0x615   : > { %v2092_v42 = vadd.f32 %v2091_v29, %v2061_v16 }
 0x617   : > { %v2093_v14 = vadd.f32 %v2092_v42, %v2062_v5 }
 0x619   : > { %v2094_v52 = vadd.f32 %v2093_v14, %v2063_v31 }
 0x61b   : > { %v2095_v30 = vadd.f32 %v2094_v52, %v2064_v10 }
 0x61d   : > { %v2096_v2 = vadd.f32 %v2095_v30, %v2065_v23 }
 0x61f   : > { %v2097_v54 = vadd.f32 %v2096_v2, %v2066_v24 }
 0x621   : > { %v2098_v15 = vrot.slane %v2097_v54, 4 }
 0x623   : > { %v2099_v22 = vadd.f32 %v2098_v15, %v2097_v54 }
 0x625   : > { %v2100_v34 = vrot.slane %v2099_v22, 2 }
 0x627   : > { %v2101_v26 = vadd.f32 %v2100_v34, %v2099_v22 }
 0x629   : > { %v2102_v41 = vrot.slane %v2101_v26, 1 }
 0x62b   : > { %v2103_v7 = vadd.f32 %v2102_v41, %v2101_v26 }
 0x62d   : > { %v5062_v6 = vmul.f32 0.005, %v2103_v7 }
 0x62f   : > { %v5066_v55 = vsub.f32 %v4937_v27, %v5062_v6  ;;  %v5070_v9 = vsub.f32 %v4934_v32, %v5062_v6  ;;  %v5074_v49 = vsub.f32 %v4940_v0, %v5062_v6  ;;  %v5082_v43 = vsub.f32 %v4945_v63, %v5062_v6 }
 0x630   : > { %v5086_v27 = vsub.f32 %v4949_v8, %v5062_v6  ;;  %v5092_v0 = vsub.f32 %v4953_v4, %v5062_v6  ;;  %v5098_v63 = vsub.f32 %v4957_v59, %v5062_v6  ;;  %v5104_v16 = vsub.f32 %v4961_v51, %v5062_v6 }
 0x631   : > { %v2169_v57 = vmul.f32 %v5066_v55, %v5066_v55  ;;  %v2170_v48 = vmul.f32 %v5070_v9, %v5070_v9  ;;  %v2171_v32 = vmul.f32 %v5074_v49, %v5074_v49  ;;  %v2172_v3 = vmul.f32 %v5082_v43, %v5082_v43 }
 0x632   : > { %v2173_v8 = vmul.f32 %v5086_v27, %v5086_v27  ;;  %v2174_v4 = vmul.f32 %v5092_v0, %v5092_v0  ;;  %v5110_v11 = vsub.f32 %v4965_v25, %v5062_v6  ;;  %v2175_v59 = vmul.f32 %v5098_v63, %v5098_v63 }
 0x633   : > { %v2201_v20 = vadd.f32 %v2170_v48, %v2169_v57  ;;  %v5116_v42 = vsub.f32 %v4969_v28, %v5062_v6  ;;  %v2176_v51 = vmul.f32 %v5104_v16, %v5104_v16  ;;  %v5122_v14 = vsub.f32 %v4973_v53, %v5062_v6 }
 0x634   : > { %v2177_v25 = vmul.f32 %v5110_v11, %v5110_v11  ;;  %v5128_v52 = vsub.f32 %v4977_v60, %v5062_v6  ;;  %v5134_v30 = vsub.f32 %v4981_v44, %v5062_v6  ;;  %v5140_v2 = vsub.f32 %v4985_v18, %v5062_v6 }
 0x635   : > { %v2202_v38 = vadd.f32 %v2201_v20, %v2171_v32  ;;  %v2178_v28 = vmul.f32 %v5116_v42, %v5116_v42  ;;  %v2179_v53 = vmul.f32 %v5122_v14, %v5122_v14  ;;  %v5146_v15 = vsub.f32 %v4989_v19, %v5062_v6 }
 0x636   : > { %v2180_v60 = vmul.f32 %v5128_v52, %v5128_v52  ;;  %v2181_v44 = vmul.f32 %v5134_v30, %v5134_v30  ;;  %v5152_v34 = vsub.f32 %v4993_v45, %v5062_v6  ;;  %v2182_v18 = vmul.f32 %v5140_v2, %v5140_v2 }
 0x637   : > { %v2203_v21 = vadd.f32 %v2202_v38, %v2172_v3  ;;  %v5158_v41 = vsub.f32 %v4997_v17, %v5062_v6  ;;  %v2183_v19 = vmul.f32 %v5146_v15, %v5146_v15  ;;  %v5164_v57 = vsub.f32 %v5001_v56, %v5062_v6 }
 0x638   : > { %v2184_v45 = vmul.f32 %v5152_v34, %v5152_v34  ;;  %v5170_v32 = vsub.f32 %v5005_v1, %v5062_v6  ;;  %v5176_v3 = vsub.f32 %v5009_v40, %v5062_v6 }
 0x639   : > { %v2204_v29 = vadd.f32 %v2203_v21, %v2173_v8  ;;  %v2185_v17 = vmul.f32 %v5158_v41, %v5158_v41  ;;  %v2186_v56 = vmul.f32 %v5164_v57, %v5164_v57  ;;  %v5182_v8 = vsub.f32 %v5013_v37, %v5062_v6 }
 0x63a   : > { %v2187_v1 = vmul.f32 %v5170_v32, %v5170_v32  ;;  %v2188_v40 = vmul.f32 %v5176_v3, %v5176_v3 }
 0x63b   : > { %v2205_v5 = vadd.f32 %v2204_v29, %v2174_v4  ;;  %v5188_v4 = vsub.f32 %v5017_v61, %v5062_v6  ;;  %v2189_v37 = vmul.f32 %v5182_v8, %v5182_v8  ;;  %v5204_v61 = vsub.f32 %v5025_v50, %v5062_v6 }
 0x63c   : > { %v5220_v50 = vsub.f32 %v5041_v35, %v5062_v6  ;;  %v5234_v35 = vsub.f32 %v5050_v58, %v5062_v6  ;;  %v5244_v58 = vsub.f32 %v5057_v36, %v5062_v6  ;;  %v2392_v36 = vld [vmem:[#allocation9 + $0x1d8] sm:$0xff] }
 0x63d   : > { %v2206_v31 = vadd.f32 %v2205_v5, %v2175_v59  ;;  %v5194_v59 = vsub.f32 %v5021_v47, %v5062_v6  ;;  %v5210_v47 = vsub.f32 %v5033_v13, %v5062_v6  ;;  %v5227_v13 = vsub.f32 %v5046_v39, %v5062_v6 }
 0x63f   : > { %v2207_v10 = vadd.f32 %v2206_v31, %v2176_v51  ;;  %v5200_v51 = vsub.f32 %v5029_v12, %v5062_v6  ;;  %v2190_v31 = vmul.f32 %v5188_v4, %v5188_v4  ;;  %v2191_v12 = vmul.f32 %v5194_v59, %v5194_v59 }
 0x640   : > { %v2165_v39 = vmul.f32 0.0, %v5227_v13 }
 0x641   : > { %v2208_v23 = vadd.f32 %v2207_v10, %v2177_v25  ;;  %v5214_v10 = vsub.f32 %v5036_v62, %v5062_v6 }
 0x643   : > { %v2209_v24 = vadd.f32 %v2208_v23, %v2178_v28  ;;  %v2162_v23 = vmul.f32 0.0, %v5204_v61  ;;  %v2163_v62 = vmul.f32 0.0, %v5214_v10 }
 0x645   : > { %v2210_v54 = vadd.f32 %v2209_v24, %v2179_v53  ;;  %v2192_v53 = vmul.f32 %v5200_v51, %v5200_v51 }
 0x647   : > { %v2211_v22 = vadd.f32 %v2210_v54, %v2180_v60  ;;  %v2193_v60 = vmul.f32 %v5210_v47, %v5210_v47 }
 0x649   : > { %v2212_v26 = vadd.f32 %v2211_v22, %v2181_v44  ;;  %v2164_v44 = vmul.f32 0.0, %v5220_v50  ;;  %v2194_v22 = vmul.f32 %v2162_v23, %v2162_v23  ;;  %v2390_v23 = vld [vmem:[#allocation9 + $0x1c8] sm:$0xff] }
 0x64b   : > { %v2213_v7 = vadd.f32 %v2212_v26, %v2182_v18  ;;  %v2396_v26 = vld [vmem:[#allocation9 + $0x1f8] sm:$0xff] }
 0x64c   : > { %2400 = vmatpush.msra.mxu1 %v2396_v26  ;;  %3473 = vmatpush.msrb.mxu3 %v2396_v26 }
 0x64d   : > { %v2214_v48 = vadd.f32 %v2213_v7, %v2183_v19  ;;  %v5239_v19 = vsub.f32 %v5054_v46, %v5062_v6  ;;  %v2195_v7 = vmul.f32 %v2163_v62, %v2163_v62 }
 0x64f   : > { %v2215_v20 = vadd.f32 %v2214_v48, %v2184_v45  ;;  %v2395_v48 = vld [vmem:[#allocation9 + $0x1f0] sm:$0xff]  ;;  %v2167_v46 = vmul.f32 0.0, %v5239_v19 }
 0x650   : > { %2401 = vmatpush.msra.mxu1 %v2395_v48  ;;  %3474 = vmatpush.msrb.mxu3 %v2395_v48  ;;  %v2383_v48 = vld [vmem:[#allocation9 + $0x190] sm:$0xff] }
 0x651   : > { %v2216_v38 = vadd.f32 %v2215_v20, %v2185_v17  ;;  %v2166_v17 = vmul.f32 0.0, %v5234_v35  ;;  %v2196_v20 = vmul.f32 %v2164_v44, %v2164_v44  ;;  %v2199_v6 = vmul.f32 %v2167_v46, %v2167_v46  ;;  %v2387_v44 = vld [vmem:[#allocation9 + $0x1b0] sm:$0xff] }
 0x653   : > { %v2217_v21 = vadd.f32 %v2216_v38, %v2186_v56  ;;  %v2394_v38 = vld [vmem:[#allocation9 + $0x1e8] sm:$0xff] }
 0x654   : > { %2402 = vmatpush.msra.mxu1 %v2394_v38  ;;  %3475 = vmatpush.msrb.mxu3 %v2394_v38  ;;  %v2381_v38 = vld [vmem:[#allocation9 + $0x180] sm:$0xff] }
 0x655   : > { %v2218_v29 = vadd.f32 %v2217_v21, %v2187_v1  ;;  %v2197_v1 = vmul.f32 %v2165_v39, %v2165_v39  ;;  %v2385_v39 = vld [vmem:[#allocation9 + $0x1a0] sm:$0xff] }
 0x657   : > { %v2219_v5 = vadd.f32 %v2218_v29, %v2188_v40  ;;  %v2393_v40 = vld [vmem:[#allocation9 + $0x1e0] sm:$0xff]  ;;  %v2168_v29 = vmul.f32 0.0, %v5244_v58 }
 0x658   : > { %2403 = vmatpush.msra.mxu1 %v2393_v40  ;;  %3476 = vmatpush.msrb.mxu3 %v2393_v40 }
 0x659   : > { %v2220_v25 = vadd.f32 %v2219_v5, %v2189_v37  ;;  %v2198_v37 = vmul.f32 %v2166_v17, %v2166_v17 }
 0x65a   : > { %2404 = vmatpush.msra.mxu1 %v2392_v36  ;;  %3477 = vmatpush.msrb.mxu3 %v2392_v36 }
 0x65b   : > { %v2221_v28 = vadd.f32 %v2220_v25, %v2190_v31  ;;  %v2391_v25 = vld [vmem:[#allocation9 + $0x1d0] sm:$0xff] }
 0x65c   : > { %2405 = vmatpush.msra.mxu1 %v2391_v25  ;;  %3478 = vmatpush.msrb.mxu3 %v2391_v25 }
 0x65d   : > { %v2222_v24 = vadd.f32 %v2221_v28, %v2191_v12  ;;  %v2200_v12 = vmul.f32 %v2168_v29, %v2168_v29 }
 0x65e   : > { %2406 = vmatpush.msra.mxu1 %v2390_v23  ;;  %3479 = vmatpush.msrb.mxu3 %v2390_v23 }
 0x65f   : > { %v2223_v54 = vadd.f32 %v2222_v24, %v2192_v53  ;;  %v2389_v24 = vld [vmem:[#allocation9 + $0x1c0] sm:$0xff] }
 0x660   : > { %2407 = vmatpush.msra.mxu1 %v2389_v24  ;;  %3480 = vmatpush.msrb.mxu3 %v2389_v24 }
 0x661   : > { %v2224_v18 = vadd.f32 %v2223_v54, %v2193_v60  ;;  %v2388_v60 = vld [vmem:[#allocation9 + $0x1b8] sm:$0xff] }
 0x662   : > { %2408 = vmatpush.msra.mxu1 %v2388_v60  ;;  %3481 = vmatpush.msrb.mxu3 %v2388_v60 }
 0x663   : > { %v2225_v45 = vadd.f32 %v2224_v18, %v2194_v22  ;;  %v2386_v18 = vld [vmem:[#allocation9 + $0x1a8] sm:$0xff] }
 0x664   : > { %2409 = vmatpush.msra.mxu1 %v2387_v44  ;;  %3482 = vmatpush.msrb.mxu3 %v2387_v44 }
 0x665   : > { %v2226_v56 = vadd.f32 %v2225_v45, %v2195_v7  ;;  %v2384_v45 = vld [vmem:[#allocation9 + $0x198] sm:$0xff] }
 0x666   : > { %2410 = vmatpush.msra.mxu1 %v2386_v18  ;;  %3483 = vmatpush.msrb.mxu3 %v2386_v18 }
 0x667   : > { %v2227_v21 = vadd.f32 %v2226_v56, %v2196_v20  ;;  %v2382_v20 = vld [vmem:[#allocation9 + $0x188] sm:$0xff] }
 0x668   : > { %2411 = vmatpush.msra.mxu1 %v2385_v39  ;;  %3484 = vmatpush.msrb.mxu3 %v2385_v39 }
 0x669   : > { %v2228_v5 = vadd.f32 %v2227_v21, %v2197_v1 }
 0x66a   : > { %2412 = vmatpush.msra.mxu1 %v2384_v45  ;;  %3485 = vmatpush.msrb.mxu3 %v2384_v45 }
 0x66b   : > { %v2229_v31 = vadd.f32 %v2228_v5, %v2198_v37 }
 0x66c   : > { %2413 = vmatpush.msra.mxu1 %v2383_v48  ;;  %3486 = vmatpush.msrb.mxu3 %v2383_v48 }
 0x66d   : > { %v2230_v28 = vadd.f32 %v2229_v31, %v2199_v6  ;;  %v5254_v31 = vperm.slane %v4928_v33, 1 }
 0x66e   : > { %2414 = vmatpush.msra.mxu1 %v2382_v20  ;;  %3487 = vmatpush.msrb.mxu3 %v2382_v20 }
 0x66f   : > { %v2231_v53 = vadd.f32 %v2230_v28, %v2200_v12  ;;  %v5259_v12 = vperm.slane %v4928_v33, 2 }
 0x670   : > { %2415 = vmatpush.msra.mxu1 %v2381_v38  ;;  %3488 = vmatpush.msrb.mxu3 %v2381_v38 }
 0x671   : > { %v2232_v62 = vrot.slane %v2231_v53, 4 }
 0x673   : > { %v2233_v54 = vadd.f32 %v2232_v62, %v2231_v53 }
 0x675   : > { %v2234_v22 = vrot.slane %v2233_v54, 2 }
 0x677   : > { %v2235_v26 = vadd.f32 %v2234_v22, %v2233_v54 }
 0x679   : > { %v2236_v7 = vrot.slane %v2235_v26, 1 }
 0x67b   : > { %v2237_v17 = vadd.f32 %v2236_v7, %v2235_v26 }
 0x67d   : > { %v2238_v56 = vmul.f32 0.005, %v2237_v17 }
 0x67f   : > { %v2239_v46 = vadd.f32 1e-05, %v2238_v56 }
 0x681   : > { %3625 = vrsqrt.f32 %v2239_v46  ;;  %vm2246_vm7 = vweird.f32 %v2239_v46 }
 0x687   : > { %v3626_v1 = vpop.eup %3625 }
 0x688   : > { %v2241_v21 = vmul.f32 %v3626_v1, %v2239_v46  ;;  %vm2247_vm6 = vweird.f32 %v3626_v1 }
 0x689   : > { %vm2248_vm8 = vmor %vm2246_vm7, %vm2247_vm6 }
 0x68a   : > { %v2242_v40 = vmul.f32 %v3626_v1, %v2241_v21 }
 0x68c   : > { %v2243_v29 = vmul.f32 0.5, %v2242_v40 }
 0x68e   : > { %v2244_v37 = vsub.f32 1.5, %v2243_v29 }
 0x690   : > { %v2245_v5 = vmul.f32 %v3626_v1, %v2244_v37 }
 0x692   : > { %v5249_v36 = vsel %vm2248_vm8, %v3626_v1, %v2245_v5 }
 0x693   : > { %v2250_v6 = vmul.f32 %v5249_v36, %v5066_v55  ;;  %v2274_v25 = vmul.f32 %v5249_v36, %v5210_v47  ;;  %v2251_v28 = vmul.f32 %v5249_v36, %v5070_v9  ;;  %v2275_v23 = vmul.f32 %v5249_v36, %v5204_v61 }
 0x694   : > { %v2252_v47 = vmul.f32 %v5249_v36, %v5074_v49  ;;  %v2253_v61 = vmul.f32 %v5249_v36, %v5082_v43  ;;  %v2258_v44 = vmul.f32 %v5249_v36, %v5110_v11  ;;  %v2259_v22 = vmul.f32 %v5249_v36, %v5116_v42 }
 0x695   : > { %v2283_v53 = vmul.f32 %v5254_v31, %v2250_v6  ;;  %v2307_v24 = vmul.f32 %v5254_v31, %v2274_v25  ;;  %v2284_v33 = vmul.f32 %v5254_v31, %v2251_v28  ;;  %v2308_v9 = vmul.f32 %v5254_v31, %v2275_v23 }
 0x696   : > { %v2260_v18 = vmul.f32 %v5249_v36, %v5122_v14  ;;  %v2261_v49 = vmul.f32 %v5249_v36, %v5128_v52  ;;  %v2276_v26 = vmul.f32 %v5249_v36, %v5214_v10  ;;  %v2285_v43 = vmul.f32 %v5254_v31, %v2252_v47 }
 0x697   : > { %v2316_v55 = vadd.f32 %v5259_v12, %v2283_v53  ;;  %v2340_v62 = vadd.f32 %v5259_v12, %v2307_v24  ;;  %v2317_v39 = vadd.f32 %v5259_v12, %v2284_v33  ;;  %v2262_v11 = vmul.f32 %v5249_v36, %v5134_v30 }
 0x698   : > { %v2263_v42 = vmul.f32 %v5249_v36, %v5140_v2  ;;  %v2264_v14 = vmul.f32 %v5249_v36, %v5146_v15  ;;  %v2341_v7 = vadd.f32 %v5259_v12, %v2308_v9  ;;  %v2265_v52 = vmul.f32 %v5249_v36, %v5152_v34 }
 0x699   : > { %v2348_v60 = vmax.f32 %v2316_v55, 0.0  ;;  %v2372_v54 = vmax.f32 %v2340_v62, 0.0  ;;  %v2266_v10 = vmul.f32 %v5249_v36, %v5158_v41  ;;  %v2267_v45 = vmul.f32 %v5249_v36, %v5164_v57 }
 0x69a   : > { %v2268_v30 = vmul.f32 %v5249_v36, %v5170_v32  ;;  %v2269_v2 = vmul.f32 %v5249_v36, %v5176_v3  ;;  %v2270_v15 = vmul.f32 %v5249_v36, %v5182_v8  ;;  %v2271_v48 = vmul.f32 %v5249_v36, %v5188_v4 }
 0x69b   : > { %2416 = vmatmul.f32.vlgmr.msra.gmra.mxu1 %v2348_v60  ;;  %2488 = vmatmul.f32.vlgmr.msrb.gmra.mxu3 %v2372_v54  ;;  %v2272_v34 = vmul.f32 %v5249_v36, %v5194_v59  ;;  %v2277_v41 = vmul.f32 %v5249_v36, %v5220_v50  ;;  %v2349_v17 = vmax.f32 %v2317_v39, 0.0  ;;  %v2318_v57 = vadd.f32 %v5259_v12, %v2285_v43 }
 0x69c   : > { %v2309_v32 = vmul.f32 %v5254_v31, %v2276_v26  ;;  %v2373_v20 = vmax.f32 %v2341_v7, 0.0  ;;  %v2291_v3 = vmul.f32 %v5254_v31, %v2258_v44  ;;  %v2292_v56 = vmul.f32 %v5254_v31, %v2259_v22 }
 0x69d   : > { %v2293_v8 = vmul.f32 %v5254_v31, %v2260_v18  ;;  %v2294_v4 = vmul.f32 %v5254_v31, %v2261_v49  ;;  %v2295_v38 = vmul.f32 %v5254_v31, %v2262_v11  ;;  %v2296_v59 = vmul.f32 %v5254_v31, %v2263_v42 }
 0x69e   : > { %v2297_v50 = vmul.f32 %v5254_v31, %v2264_v14  ;;  %v5322_v46 = vadd.f32 %v5259_v12, %v2291_v3  ;;  %v5325_v1 = vadd.f32 %v5259_v12, %v2292_v56  ;;  %v2342_v6 = vadd.f32 %v5259_v12, %v2309_v32 }
 0x69f   : > { %v5328_v21 = vadd.f32 %v5259_v12, %v2293_v8  ;;  %v5331_v40 = vadd.f32 %v5259_v12, %v2294_v4  ;;  %v5334_v29 = vadd.f32 %v5259_v12, %v2295_v38  ;;  %v5337_v37 = vadd.f32 %v5259_v12, %v2296_v59 }
 0x6a0   : > { %v5340_v5 = vadd.f32 %v5259_v12, %v2297_v50  ;;  %v2298_v25 = vmul.f32 %v5254_v31, %v2265_v52  ;;  %v2273_v28 = vmul.f32 %v5249_v36, %v5200_v51  ;;  %v2350_v23 = vmax.f32 %v2318_v57, 0.0 }
 0x6a1   : > { %v2286_v53 = vmul.f32 %v5254_v31, %v2253_v61  ;;  %v2310_v24 = vmul.f32 %v5254_v31, %v2277_v41  ;;  %v2299_v62 = vmul.f32 %v5254_v31, %v2266_v10  ;;  %v2300_v47 = vmul.f32 %v5254_v31, %v2267_v45 }
 0x6a2   : > { %v5349_v55 = vadd.f32 %v5259_v12, %v2298_v25  ;;  %v2301_v33 = vmul.f32 %v5254_v31, %v2268_v30  ;;  %v2302_v60 = vmul.f32 %v5254_v31, %v2269_v2  ;;  %v2303_v54 = vmul.f32 %v5254_v31, %v2270_v15 }
 0x6a3   : > { %2419 = vmatmul.f32.gmra.mxu1 %v2349_v17  ;;  %2491 = vmatmul.f32.gmra.mxu3 %v2373_v20  ;;  %v2304_v51 = vmul.f32 %v5254_v31, %v2271_v48  ;;  %v2305_v9 = vmul.f32 %v5254_v31, %v2272_v34  ;;  %v2374_v61 = vmax.f32 %v2342_v6, 0.0  ;;  %v5359_v44 = vadd.f32 %v5259_v12, %v2299_v62 }
 0x6a4   : > { %v5362_v22 = vadd.f32 %v5259_v12, %v2300_v47  ;;  %v5365_v18 = vadd.f32 %v5259_v12, %v2301_v33  ;;  %v5368_v49 = vadd.f32 %v5259_v12, %v2302_v60  ;;  %v5371_v26 = vadd.f32 %v5259_v12, %v2303_v54 }
 0x6a5   : > { %v5374_v39 = vadd.f32 %v5259_v12, %v2304_v51  ;;  %v5377_v43 = vadd.f32 %v5259_v12, %v2305_v9  ;;  %v2306_v11 = vmul.f32 %v5254_v31, %v2273_v28  ;;  %v2254_v42 = vmul.f32 %v5249_v36, %v5086_v27 }
 0x6a6   : > { %v2278_v14 = vmul.f32 %v5249_v36, %v5227_v13  ;;  %v2319_v7 = vadd.f32 %v5259_v12, %v2286_v53  ;;  %v2343_v52 = vadd.f32 %v5259_v12, %v2310_v24  ;;  %v2255_v27 = vmul.f32 %v5249_v36, %v5092_v0 }
 0x6a7   : > { %v5387_v10 = vadd.f32 %v5259_v12, %v2306_v11  ;;  %v2287_v2 = vmul.f32 %v5254_v31, %v2254_v42  ;;  %v2279_v13 = vmul.f32 %v5249_v36, %v5234_v35  ;;  %v2256_v20 = vmul.f32 %v5249_v36, %v5098_v63 }
 0x6a8   : > { %v2351_v45 = vmax.f32 %v2319_v7, 0.0  ;;  %v2375_v30 = vmax.f32 %v2343_v52, 0.0  ;;  %v2311_v15 = vmul.f32 %v5254_v31, %v2278_v14  ;;  %v2288_v57 = vmul.f32 %v5254_v31, %v2255_v27  ;;  %v5435_v27 = vld [vmem:[#allocation10 + $0xc] sm:$0x7] }
 0x6a9   : > { %v2320_v48 = vadd.f32 %v5259_v12, %v2287_v2  ;;  %v2312_v32 = vmul.f32 %v5254_v31, %v2279_v13  ;;  %v2280_v0 = vmul.f32 %v5249_v36, %v5239_v19  ;;  %v2289_v4 = vmul.f32 %v5254_v31, %v2256_v20 }
 0x6aa   : > { %v2344_v34 = vadd.f32 %v5259_v12, %v2311_v15  ;;  %v2321_v35 = vadd.f32 %v5259_v12, %v2288_v57  ;;  %v2281_v59 = vmul.f32 %v5249_v36, %v5244_v58  ;;  %v2257_v63 = vmul.f32 %v5249_v36, %v5104_v16 }
 0x6ab   : > { %2422 = vmatmul.f32.gmra.mxu1 %v2350_v23  ;;  %2494 = vmatmul.f32.gmra.mxu3 %v2374_v61  ;;  %v2352_v41 = vmax.f32 %v2320_v48, 0.0  ;;  %v2345_v3 = vadd.f32 %v5259_v12, %v2312_v32  ;;  %v2313_v38 = vmul.f32 %v5254_v31, %v2280_v0  ;;  %v2322_v19 = vadd.f32 %v5259_v12, %v2289_v4 }
 0x6ac   : > { %v2376_v17 = vmax.f32 %v2344_v34, 0.0  ;;  %v2353_v56 = vmax.f32 %v2321_v35, 0.0  ;;  %v2290_v28 = vmul.f32 %v5254_v31, %v2257_v63  ;;  %v2314_v23 = vmul.f32 %v5254_v31, %v2281_v59 }
 0x6ad   : > { %v2377_v8 = vmax.f32 %v2345_v3, 0.0  ;;  %v2346_v50 = vadd.f32 %v5259_v12, %v2313_v38  ;;  %v2354_v6 = vmax.f32 %v2322_v19, 0.0  ;;  %v2356_v16 = vmax.f32 %v5322_v46, 0.0 }
 0x6ae   : > { %v2323_v53 = vadd.f32 %v5259_v12, %v2290_v28  ;;  %v2347_v24 = vadd.f32 %v5259_v12, %v2314_v23  ;;  %v2357_v36 = vmax.f32 %v5325_v1, 0.0  ;;  %v2358_v47 = vmax.f32 %v5328_v21, 0.0 }
 0x6af   : > { %v2378_v25 = vmax.f32 %v2346_v50, 0.0  ;;  %v2359_v31 = vmax.f32 %v5331_v40, 0.0  ;;  %v2360_v33 = vmax.f32 %v5334_v29, 0.0  ;;  %v2361_v12 = vmax.f32 %v5337_v37, 0.0 }
 0x6b0   : > { %v2355_v58 = vmax.f32 %v2323_v53, 0.0  ;;  %v2379_v62 = vmax.f32 %v2347_v24, 0.0  ;;  %v2362_v60 = vmax.f32 %v5340_v5, 0.0  ;;  %v2363_v46 = vmax.f32 %v5349_v55, 0.0 }
 0x6b1   : > { %v2364_v54 = vmax.f32 %v5359_v44, 0.0  ;;  %v2365_v40 = vmax.f32 %v5362_v22, 0.0  ;;  %v2366_v29 = vmax.f32 %v5365_v18, 0.0  ;;  %v2367_v9 = vmax.f32 %v5368_v49, 0.0 }
 0x6b2   : > { %v2368_v55 = vmax.f32 %v5371_v26, 0.0  ;;  %v2369_v44 = vmax.f32 %v5374_v39, 0.0  ;;  %v2370_v22 = vmax.f32 %v5377_v43, 0.0  ;;  %v2371_v18 = vmax.f32 %v5387_v10, 0.0 }
 0x6b3   : > { %2425 = vmatmul.f32.gmra.mxu1 %v2351_v45  ;;  %2497 = vmatmul.f32.gmra.mxu3 %v2375_v30  ;;  %v5438_v48 = vperm.slane %v5435_v27, 0 }
 0x6bb   : > { %2428 = vmatmul.f32.gmra.mxu1 %v2352_v41  ;;  %2500 = vmatmul.f32.gmra.mxu3 %v2376_v17 }
 0x6c3   : > { %2431 = vmatmul.f32.gmra.mxu1 %v2353_v56  ;;  %2503 = vmatmul.f32.gmra.mxu3 %v2377_v8 }
 0x6cb   : > { %2434 = vmatmul.f32.gmra.mxu1 %v2354_v6  ;;  %2506 = vmatmul.f32.gmra.mxu3 %v2378_v25 }
 0x6d3   : > { %2437 = vmatmul.f32.gmra.mxu1 %v2355_v58  ;;  %2509 = vmatmul.f32.gmra.mxu3 %v2379_v62 }
 0x6db   : > { %2440 = vmatmul.f32.gmra.mxu1 %v2356_v16 }
 0x6e3   : > { %2443 = vmatmul.f32.gmra.mxu1 %v2357_v36 }
 0x6eb   : > { %2446 = vmatmul.f32.gmra.mxu1 %v2358_v47 }
 0x6f3   : > { %2449 = vmatmul.f32.gmra.mxu1 %v2359_v31 }
 0x6fb   : > { %2452 = vmatmul.f32.gmra.mxu1 %v2360_v33 }
 0x703   : > { %2455 = vmatmul.f32.gmra.mxu1 %v2361_v12 }
 0x70b   : > { %2458 = vmatmul.f32.gmra.mxu1 %v2362_v60 }
 0x713   : > { %2461 = vmatmul.f32.gmra.mxu1 %v2363_v46 }
 0x718   : > { %v2417_v1 = vpop.f32.mrf.mxu1 }
 0x719   : > { %v5444_v34 = vadd.f32 %v2417_v1, %v5438_v48 }
 0x71b   : > { %2464 = vmatmul.f32.gmra.mxu1 %v2364_v54 }
 0x71e   : > { %v5433_v15 = vpop.f32.mrf.mxu3 }
 0x720   : > { %v2420_v21 = vpop.f32.mrf.mxu1 }
 0x721   : > { %v5441_v10 = vadd.f32 %v2420_v21, %v5438_v48 }
 0x723   : > { %2467 = vmatmul.f32.gmra.mxu1 %v2365_v40  ;;  %v2545_v17 = vadd.f32 %v5441_v10, %v5444_v34 }
 0x726   : > { %v2492_v13 = vpop.f32.mrf.mxu3 }
 0x728   : > { %v2423_v51 = vpop.f32.mrf.mxu1 }
 0x729   : > { %v5447_v41 = vadd.f32 %v2423_v51, %v5438_v48 }
 0x72b   : > { %2470 = vmatmul.f32.gmra.mxu1 %v2366_v29  ;;  %v2546_v0 = vadd.f32 %v2545_v17, %v5447_v41 }
 0x72e   : > { %v2495_v32 = vpop.f32.mrf.mxu3 }
 0x730   : > { %v2426_v37 = vpop.f32.mrf.mxu1 }
 0x731   : > { %v5452_v57 = vadd.f32 %v2426_v37, %v5438_v48 }
 0x733   : > { %2473 = vmatmul.f32.gmra.mxu1 %v2367_v9  ;;  %v2547_v3 = vadd.f32 %v2546_v0, %v5452_v57 }
 0x736   : > { %v2498_v6 = vpop.f32.mrf.mxu3 }
 0x737   : > { %v5548_v0 = vadd.f32 %v2498_v6, %v5438_v48 }
 0x738   : > { %v2429_v5 = vpop.f32.mrf.mxu1 }
 0x739   : > { %v5456_v35 = vadd.f32 %v2429_v5, %v5438_v48 }
 0x73b   : > { %2476 = vmatmul.f32.gmra.mxu1 %v2368_v55  ;;  %v2548_v8 = vadd.f32 %v2547_v3, %v5456_v35 }
 0x73e   : > { %v2501_v33 = vpop.f32.mrf.mxu3 }
 0x740   : > { %v2432_v61 = vpop.f32.mrf.mxu1 }
 0x741   : > { %v5460_v56 = vadd.f32 %v2432_v61, %v5438_v48 }
 0x743   : > { %2479 = vmatmul.f32.gmra.mxu1 %v2369_v44  ;;  %v2549_v38 = vadd.f32 %v2548_v8, %v5460_v56  ;;  %v5553_v8 = vadd.f32 %v2501_v33, %v5438_v48 }
 0x746   : > { %v2504_v5 = vpop.f32.mrf.mxu3 }
 0x748   : > { %v2435_v11 = vpop.f32.mrf.mxu1 }
 0x749   : > { %v5464_v4 = vadd.f32 %v2435_v11, %v5438_v48 }
 0x74b   : > { %2482 = vmatmul.f32.gmra.mxu1 %v2370_v22  ;;  %v2550_v19 = vadd.f32 %v2549_v38, %v5464_v4 }
 0x750   : > { %v2438_v42 = vpop.f32.mrf.mxu1 }
 0x751   : > { %v5468_v59 = vadd.f32 %v2438_v42, %v5438_v48 }
 0x753   : > { %2485 = vmatmul.f32.gmra.mxu1 %v2371_v18  ;;  %v2551_v25 = vadd.f32 %v2550_v19, %v5468_v59 }
 0x758   : > { %v2441_v14 = vpop.f32.mrf.mxu1 }
 0x759   : > { %v5472_v50 = vadd.f32 %v2441_v14, %v5438_v48 }
 0x75b   : > { %v2552_v23 = vadd.f32 %v2551_v25, %v5472_v50  ;;  %v2541_v25 = vmul.f32 0.0, %v5553_v8 }
 0x760   : > { %v2444_v7 = vpop.f32.mrf.mxu1 }
 0x761   : > { %v5476_v28 = vadd.f32 %v2444_v7, %v5438_v48 }
 0x763   : > { %v2553_v24 = vadd.f32 %v2552_v23, %v5476_v28 }
 0x768   : > { %v2447_v49 = vpop.f32.mrf.mxu1 }
 0x769   : > { %v5480_v53 = vadd.f32 %v2447_v49, %v5438_v48 }
 0x76b   : > { %v2554_v16 = vadd.f32 %v2553_v24, %v5480_v53 }
 0x770   : > { %v2450_v52 = vpop.f32.mrf.mxu1 }
 0x771   : > { %v5484_v58 = vadd.f32 %v2450_v52, %v5438_v48  ;;  %v2507_v52 = vpop.f32.mrf.mxu3 }
 0x772   : > { %v5561_v6 = vadd.f32 %v2507_v52, %v5438_v48 }
 0x773   : > { %v2555_v47 = vadd.f32 %v2554_v16, %v5484_v58 }
 0x778   : > { %v2453_v45 = vpop.f32.mrf.mxu1 }
 0x779   : > { %v5488_v36 = vadd.f32 %v2453_v45, %v5438_v48  ;;  %v2510_v19 = vpop.f32.mrf.mxu3 }
 0x77b   : > { %v2556_v12 = vadd.f32 %v2555_v47, %v5488_v36  ;;  %v2543_v47 = vmul.f32 0.0, %v5561_v6 }
 0x780   : > { %v2456_v30 = vpop.f32.mrf.mxu1 }
 0x781   : > { %v5492_v31 = vadd.f32 %v2456_v30, %v5438_v48  ;;  %v5532_v30 = vadd.f32 %v2492_v13, %v5438_v48 }
 0x783   : > { %v2557_v46 = vadd.f32 %v2556_v12, %v5492_v31 }
 0x788   : > { %v2459_v26 = vpop.f32.mrf.mxu1 }
 0x789   : > { %v5496_v60 = vadd.f32 %v2459_v26, %v5438_v48 }
 0x78b   : > { %v2558_v21 = vadd.f32 %v2557_v46, %v5496_v60 }
 0x790   : > { %v2462_v2 = vpop.f32.mrf.mxu1 }
 0x791   : > { %v5500_v1 = vadd.f32 %v2462_v2, %v5438_v48 }
 0x793   : > { %v2559_v51 = vadd.f32 %v2558_v21, %v5500_v1 }
 0x798   : > { %v2465_v39 = vpop.f32.mrf.mxu1 }
 0x799   : > { %v5504_v40 = vadd.f32 %v2465_v39, %v5438_v48  ;;  %v5540_v39 = vadd.f32 %v5433_v15, %v5438_v48  ;;  %v2540_v15 = vmul.f32 0.0, %v5548_v0 }
 0x79b   : > { %v2560_v37 = vadd.f32 %v2559_v51, %v5504_v40 }
 0x7a0   : > { %v2468_v43 = vpop.f32.mrf.mxu1 }
 0x7a1   : > { %v5508_v29 = vadd.f32 %v2468_v43, %v5438_v48  ;;  %v5543_v43 = vadd.f32 %v2495_v32, %v5438_v48  ;;  %v5557_v32 = vadd.f32 %v2504_v5, %v5438_v48 }
 0x7a3   : > { %v2561_v55 = vadd.f32 %v2560_v37, %v5508_v29  ;;  %v2539_v3 = vmul.f32 0.0, %v5543_v43  ;;  %v2542_v24 = vmul.f32 0.0, %v5557_v32 }
 0x7a8   : > { %v2471_v20 = vpop.f32.mrf.mxu1 }
 0x7a9   : > { %v5512_v9 = vadd.f32 %v2471_v20, %v5438_v48  ;;  %v2538_v20 = vmul.f32 0.0, %v5532_v30 }
 0x7ab   : > { %v2562_v11 = vadd.f32 %v2561_v55, %v5512_v9 }
 0x7b0   : > { %v2474_v63 = vpop.f32.mrf.mxu1 }
 0x7b1   : > { %v5516_v61 = vadd.f32 %v2474_v63, %v5438_v48 }
 0x7b3   : > { %v2563_v42 = vadd.f32 %v2562_v11, %v5516_v61 }
 0x7b8   : > { %v2477_v62 = vpop.f32.mrf.mxu1 }
 0x7b9   : > { %v5520_v22 = vadd.f32 %v2477_v62, %v5438_v48  ;;  %v5565_v62 = vadd.f32 %v2510_v19, %v5438_v48 }
 0x7bb   : > { %v2564_v14 = vadd.f32 %v2563_v42, %v5520_v22  ;;  %v2544_v12 = vmul.f32 0.0, %v5565_v62 }
 0x7c0   : > { %v2480_v54 = vpop.f32.mrf.mxu1 }
 0x7c1   : > { %v5524_v18 = vadd.f32 %v2480_v54, %v5438_v48 }
 0x7c3   : > { %v2565_v49 = vadd.f32 %v2564_v14, %v5524_v18 }
 0x7c8   : > { %v2483_v44 = vpop.f32.mrf.mxu1 }
 0x7c9   : > { %v5528_v7 = vadd.f32 %v2483_v44, %v5438_v48 }
 0x7cb   : > { %v2566_v26 = vadd.f32 %v2565_v49, %v5528_v7 }
 0x7d0   : > { %v2486_v45 = vpop.f32.mrf.mxu1 }
 0x7d1   : > { %v5536_v2 = vadd.f32 %v2486_v45, %v5438_v48 }
 0x7d3   : > { %v2567_v17 = vadd.f32 %v2566_v26, %v5536_v2 }
 0x7d5   : > { %v2568_v13 = vadd.f32 %v2567_v17, %v5540_v39 }
 0x7d7   : > { %v2569_v38 = vadd.f32 %v2568_v13, %v2538_v20 }
 0x7d9   : > { %v2570_v63 = vadd.f32 %v2569_v38, %v2539_v3 }
 0x7db   : > { %v2571_v23 = vadd.f32 %v2570_v63, %v2540_v15 }
 0x7dd   : > { %v2572_v16 = vadd.f32 %v2571_v23, %v2541_v25 }
 0x7df   : > { %v2573_v33 = vadd.f32 %v2572_v16, %v2542_v24 }
 0x7e1   : > { %v2574_v46 = vadd.f32 %v2573_v33, %v2543_v47 }
 0x7e3   : > { %v2575_v54 = vadd.f32 %v2574_v46, %v2544_v12 }
 0x7e5   : > { %v2576_v21 = vrot.slane %v2575_v54, 4 }
 0x7e7   : > { %v2577_v51 = vadd.f32 %v2576_v21, %v2575_v54 }
 0x7e9   : > { %v2578_v37 = vrot.slane %v2577_v51, 2 }
 0x7eb   : > { %v2579_v5 = vadd.f32 %v2578_v37, %v2577_v51 }
 0x7ed   : > { %v2580_v55 = vrot.slane %v2579_v5, 1 }
 0x7ef   : > { %v2581_v44 = vadd.f32 %v2580_v55, %v2579_v5 }
 0x7f1   : > { %v5569_v11 = vmul.f32 0.005, %v2581_v44 }
 0x7f3   : > { %v5573_v48 = vsub.f32 %v5444_v34, %v5569_v11  ;;  %v5577_v42 = vsub.f32 %v5441_v10, %v5569_v11  ;;  %v5581_v14 = vsub.f32 %v5447_v41, %v5569_v11  ;;  %v5589_v45 = vsub.f32 %v5452_v57, %v5569_v11 }
 0x7f4   : > { %v5593_v34 = vsub.f32 %v5456_v35, %v5569_v11  ;;  %v5599_v41 = vsub.f32 %v5460_v56, %v5569_v11  ;;  %v5605_v57 = vsub.f32 %v5464_v4, %v5569_v11  ;;  %v5611_v3 = vsub.f32 %v5468_v59, %v5569_v11 }
 0x7f5   : > { %v2647_v49 = vmul.f32 %v5573_v48, %v5573_v48  ;;  %v2648_v52 = vmul.f32 %v5577_v42, %v5577_v42  ;;  %v2649_v10 = vmul.f32 %v5581_v14, %v5581_v14  ;;  %v2650_v17 = vmul.f32 %v5589_v45, %v5589_v45 }
 0x7f6   : > { %v2651_v35 = vmul.f32 %v5593_v34, %v5593_v34  ;;  %v2652_v56 = vmul.f32 %v5599_v41, %v5599_v41  ;;  %v5617_v15 = vsub.f32 %v5472_v50, %v5569_v11  ;;  %v2653_v4 = vmul.f32 %v5605_v57, %v5605_v57 }
 0x7f7   : > { %v2679_v26 = vadd.f32 %v2648_v52, %v2647_v49  ;;  %v5623_v19 = vsub.f32 %v5476_v28, %v5569_v11  ;;  %v2654_v59 = vmul.f32 %v5611_v3, %v5611_v3  ;;  %v5629_v23 = vsub.f32 %v5480_v53, %v5569_v11 }
 0x7f8   : > { %v2655_v50 = vmul.f32 %v5617_v15, %v5617_v15  ;;  %v5635_v16 = vsub.f32 %v5484_v58, %v5569_v11  ;;  %v5641_v33 = vsub.f32 %v5488_v36, %v5569_v11  ;;  %v5647_v46 = vsub.f32 %v5492_v31, %v5569_v11 }
 0x7f9   : > { %v2680_v20 = vadd.f32 %v2679_v26, %v2649_v10  ;;  %v2656_v28 = vmul.f32 %v5623_v19, %v5623_v19  ;;  %v2657_v53 = vmul.f32 %v5629_v23, %v5629_v23  ;;  %v5653_v21 = vsub.f32 %v5496_v60, %v5569_v11 }
 0x7fa   : > { %v2658_v58 = vmul.f32 %v5635_v16, %v5635_v16  ;;  %v2659_v36 = vmul.f32 %v5641_v33, %v5641_v33  ;;  %v5659_v37 = vsub.f32 %v5500_v1, %v5569_v11  ;;  %v2660_v31 = vmul.f32 %v5647_v46, %v5647_v46 }
 0x7fb   : > { %v2681_v13 = vadd.f32 %v2680_v20, %v2650_v17  ;;  %v5665_v55 = vsub.f32 %v5504_v40, %v5569_v11  ;;  %v2661_v60 = vmul.f32 %v5653_v21, %v5653_v21  ;;  %v5671_v49 = vsub.f32 %v5508_v29, %v5569_v11 }
 0x7fc   : > { %v2662_v1 = vmul.f32 %v5659_v37, %v5659_v37  ;;  %v5677_v10 = vsub.f32 %v5512_v9, %v5569_v11  ;;  %v5683_v17 = vsub.f32 %v5516_v61, %v5569_v11 }
 0x7fd   : > { %v2682_v38 = vadd.f32 %v2681_v13, %v2651_v35  ;;  %v2663_v40 = vmul.f32 %v5665_v55, %v5665_v55  ;;  %v2664_v29 = vmul.f32 %v5671_v49, %v5671_v49  ;;  %v5689_v35 = vsub.f32 %v5520_v22, %v5569_v11 }
 0x7fe   : > { %v2665_v9 = vmul.f32 %v5677_v10, %v5677_v10  ;;  %v2666_v61 = vmul.f32 %v5683_v17, %v5683_v17 }
 0x7ff   : > { %v2683_v63 = vadd.f32 %v2682_v38, %v2652_v56  ;;  %v5695_v56 = vsub.f32 %v5524_v18, %v5569_v11  ;;  %v2667_v22 = vmul.f32 %v5689_v35, %v5689_v35  ;;  %v5711_v18 = vsub.f32 %v5532_v30, %v5569_v11 }
 0x800   : > { %v5727_v30 = vsub.f32 %v5548_v0, %v5569_v11  ;;  %v5741_v0 = vsub.f32 %v5557_v32, %v5569_v11 }
 0x801   : > { %v2684_v25 = vadd.f32 %v2683_v63, %v2653_v4  ;;  %v5701_v4 = vsub.f32 %v5528_v7, %v5569_v11  ;;  %v5717_v7 = vsub.f32 %v5540_v39, %v5569_v11  ;;  %v5734_v39 = vsub.f32 %v5553_v8, %v5569_v11 }
 0x802   : > { %v2644_v32 = vmul.f32 0.0, %v5741_v0 }
 0x803   : > { %v2685_v24 = vadd.f32 %v2684_v25, %v2654_v59  ;;  %v5707_v59 = vsub.f32 %v5536_v2, %v5569_v11  ;;  %v2668_v25 = vmul.f32 %v5695_v56, %v5695_v56  ;;  %v2669_v2 = vmul.f32 %v5701_v4, %v5701_v4 }
 0x804   : > { %v2643_v8 = vmul.f32 0.0, %v5734_v39 }
 0x805   : > { %v2686_v47 = vadd.f32 %v2685_v24, %v2655_v50  ;;  %v5721_v24 = vsub.f32 %v5543_v43, %v5569_v11 }
 0x807   : > { %v2687_v12 = vadd.f32 %v2686_v47, %v2656_v28  ;;  %v2640_v47 = vmul.f32 0.0, %v5711_v18  ;;  %v2641_v43 = vmul.f32 0.0, %v5721_v24 }
 0x809   : > { %v2688_v54 = vadd.f32 %v2687_v12, %v2657_v53  ;;  %v2670_v53 = vmul.f32 %v5707_v59, %v5707_v59 }
 0x80b   : > { %v2689_v51 = vadd.f32 %v2688_v54, %v2658_v58  ;;  %v2671_v58 = vmul.f32 %v5717_v7, %v5717_v7 }
 0x80d   : > { %v2690_v5 = vadd.f32 %v2689_v51, %v2659_v36  ;;  %v2642_v36 = vmul.f32 0.0, %v5727_v30  ;;  %v2672_v51 = vmul.f32 %v2640_v47, %v2640_v47 }
 0x80f   : > { %v2691_v44 = vadd.f32 %v2690_v5, %v2660_v31  ;;  %v5746_v5 = vsub.f32 %v5561_v6, %v5569_v11  ;;  %v2675_v6 = vmul.f32 %v2643_v8, %v2643_v8  ;;  %v2864_v8 = vld [vmem:[#allocation9 + $0x228] sm:$0xff] }
 0x811   : > { %v2692_v52 = vadd.f32 %v2691_v44, %v2661_v60  ;;  %v2673_v60 = vmul.f32 %v2641_v43, %v2641_v43  ;;  %v2867_v43 = vld [vmem:[#allocation9 + $0x240] sm:$0xff] }
 0x813   : > { %v2693_v26 = vadd.f32 %v2692_v52, %v2662_v1  ;;  %v2874_v1 = vld [vmem:[#allocation9 + $0x278] sm:$0xff]  ;;  %v5751_v52 = vsub.f32 %v5565_v62, %v5569_v11  ;;  %v2871_v62 = vld [vmem:[#allocation9 + $0x260] sm:$0xff] }
 0x814   : > { %2878 = vmatpush.msra.mxu2 %v2874_v1  ;;  %3489 = vmatpush.msra.mxu3 %v2874_v1 }
 0x815   : > { %v2694_v20 = vadd.f32 %v2693_v26, %v2663_v40  ;;  %v2674_v40 = vmul.f32 %v2642_v36, %v2642_v36 }
 0x817   : > { %v2695_v13 = vadd.f32 %v2694_v20, %v2664_v29  ;;  %v2873_v29 = vld [vmem:[#allocation9 + $0x270] sm:$0xff]  ;;  %v2645_v20 = vmul.f32 0.0, %v5746_v5 }
 0x818   : > { %2879 = vmatpush.msra.mxu2 %v2873_v29  ;;  %3490 = vmatpush.msra.mxu3 %v2873_v29  ;;  %v2860_v29 = vld [vmem:[#allocation9 + $0x208] sm:$0xff] }
 0x819   : > { %v2696_v38 = vadd.f32 %v2695_v13, %v2665_v9  ;;  %v2872_v13 = vld [vmem:[#allocation9 + $0x268] sm:$0xff]  ;;  %v2677_v11 = vmul.f32 %v2645_v20, %v2645_v20 }
 0x81a   : > { %2880 = vmatpush.msra.mxu2 %v2872_v13  ;;  %3491 = vmatpush.msra.mxu3 %v2872_v13 }
 0x81b   : > { %v2697_v63 = vadd.f32 %v2696_v38, %v2666_v61  ;;  %v2646_v61 = vmul.f32 0.0, %v5751_v52  ;;  %v2676_v38 = vmul.f32 %v2644_v32, %v2644_v32  ;;  %v2862_v32 = vld [vmem:[#allocation9 + $0x218] sm:$0xff] }
 0x81c   : > { %2881 = vmatpush.msra.mxu2 %v2871_v62  ;;  %3492 = vmatpush.msra.mxu3 %v2871_v62 }
 0x81d   : > { %v2698_v50 = vadd.f32 %v2697_v63, %v2667_v22 }
 0x81f   : > { %v2699_v28 = vadd.f32 %v2698_v50, %v2668_v25  ;;  %v2870_v25 = vld [vmem:[#allocation9 + $0x258] sm:$0xff]  ;;  %v2678_v50 = vmul.f32 %v2646_v61, %v2646_v61 }
 0x820   : > { %2882 = vmatpush.msra.mxu2 %v2870_v25  ;;  %3493 = vmatpush.msra.mxu3 %v2870_v25 }
 0x821   : > { %v2700_v12 = vadd.f32 %v2699_v28, %v2669_v2  ;;  %v2869_v28 = vld [vmem:[#allocation9 + $0x250] sm:$0xff] }
 0x822   : > { %2883 = vmatpush.msra.mxu2 %v2869_v28  ;;  %3494 = vmatpush.msra.mxu3 %v2869_v28 }
 0x823   : > { %v2701_v54 = vadd.f32 %v2700_v12, %v2670_v53  ;;  %v2868_v53 = vld [vmem:[#allocation9 + $0x248] sm:$0xff] }
 0x824   : > { %2884 = vmatpush.msra.mxu2 %v2868_v53  ;;  %3495 = vmatpush.msra.mxu3 %v2868_v53 }
 0x825   : > { %v2702_v31 = vadd.f32 %v2701_v54, %v2671_v58  ;;  %v2866_v54 = vld [vmem:[#allocation9 + $0x238] sm:$0xff] }
 0x826   : > { %2885 = vmatpush.msra.mxu2 %v2867_v43  ;;  %3496 = vmatpush.msra.mxu3 %v2867_v43 }
 0x827   : > { %v2703_v44 = vadd.f32 %v2702_v31, %v2672_v51  ;;  %v2865_v51 = vld [vmem:[#allocation9 + $0x230] sm:$0xff] }
 0x828   : > { %2886 = vmatpush.msra.mxu2 %v2866_v54  ;;  %3497 = vmatpush.msra.mxu3 %v2866_v54 }
 0x829   : > { %v2704_v26 = vadd.f32 %v2703_v44, %v2673_v60  ;;  %v2863_v44 = vld [vmem:[#allocation9 + $0x220] sm:$0xff] }
 0x82a   : > { %2887 = vmatpush.msra.mxu2 %v2865_v51  ;;  %3498 = vmatpush.msra.mxu3 %v2865_v51 }
 0x82b   : > { %v2705_v9 = vadd.f32 %v2704_v26, %v2674_v40  ;;  %v2861_v40 = vld [vmem:[#allocation9 + $0x210] sm:$0xff] }
 0x82c   : > { %2888 = vmatpush.msra.mxu2 %v2864_v8  ;;  %3499 = vmatpush.msra.mxu3 %v2864_v8 }
 0x82d   : > { %v2706_v22 = vadd.f32 %v2705_v9, %v2675_v6  ;;  %v2859_v6 = vld [vmem:[#allocation9 + $0x200] sm:$0xff] }
 0x82e   : > { %2889 = vmatpush.msra.mxu2 %v2863_v44  ;;  %3500 = vmatpush.msra.mxu3 %v2863_v44 }
 0x82f   : > { %v2707_v63 = vadd.f32 %v2706_v22, %v2676_v38 }
 0x830   : > { %2890 = vmatpush.msra.mxu2 %v2862_v32  ;;  %3501 = vmatpush.msra.mxu3 %v2862_v32 }
 0x831   : > { %v2708_v2 = vadd.f32 %v2707_v63, %v2677_v11  ;;  %v5759_v63 = vperm.slane %v5435_v27, 1 }
 0x832   : > { %2891 = vmatpush.msra.mxu2 %v2861_v40  ;;  %3502 = vmatpush.msra.mxu3 %v2861_v40 }
 0x833   : > { %v2709_v47 = vadd.f32 %v2708_v2, %v2678_v50  ;;  %v5766_v2 = vperm.slane %v5435_v27, 2 }
 0x834   : > { %2892 = vmatpush.msra.mxu2 %v2860_v29  ;;  %3503 = vmatpush.msra.mxu3 %v2860_v29 }
 0x835   : > { %v2710_v12 = vrot.slane %v2709_v47, 4 }
 0x836   : > { %2893 = vmatpush.msra.mxu2 %v2859_v6  ;;  %3504 = vmatpush.msra.mxu3 %v2859_v6 }
 0x837   : > { %v2711_v58 = vadd.f32 %v2710_v12, %v2709_v47 }
 0x839   : > { %v2712_v36 = vrot.slane %v2711_v58, 2 }
 0x83b   : > { %v2713_v31 = vadd.f32 %v2712_v36, %v2711_v58 }
 0x83d   : > { %v2714_v60 = vrot.slane %v2713_v31, 1 }
 0x83f   : > { %v2715_v1 = vadd.f32 %v2714_v60, %v2713_v31 }
 0x841   : > { %v2716_v26 = vmul.f32 0.005, %v2715_v1 }
 0x843   : > { %v2717_v20 = vadd.f32 1e-05, %v2716_v26 }
 0x845   : > { %3627 = vrsqrt.f32 %v2717_v20  ;;  %vm2724_vm10 = vweird.f32 %v2717_v20 }
 0x84b   : > { %v3628_v9 = vpop.eup %3627 }
 0x84c   : > { %v2719_v13 = vmul.f32 %v3628_v9, %v2717_v20  ;;  %vm2725_vm9 = vweird.f32 %v3628_v9 }
 0x84d   : > { %vm2726_vm11 = vmor %vm2724_vm10, %vm2725_vm9 }
 0x84e   : > { %v2720_v61 = vmul.f32 %v3628_v9, %v2719_v13 }
 0x850   : > { %v2721_v38 = vmul.f32 0.5, %v2720_v61 }
 0x852   : > { %v2722_v22 = vsub.f32 1.5, %v2721_v38 }
 0x854   : > { %v2723_v62 = vmul.f32 %v3628_v9, %v2722_v22 }
 0x856   : > { %v5756_v11 = vsel %vm2726_vm11, %v3628_v9, %v2723_v62 }
 0x857   : > { %v2728_v25 = vmul.f32 %v5756_v11, %v5573_v48  ;;  %v2752_v50 = vmul.f32 %v5756_v11, %v5717_v7  ;;  %v2729_v28 = vmul.f32 %v5756_v11, %v5577_v42  ;;  %v2753_v47 = vmul.f32 %v5756_v11, %v5711_v18 }
 0x858   : > { %v2730_v7 = vmul.f32 %v5756_v11, %v5581_v14  ;;  %v2731_v18 = vmul.f32 %v5756_v11, %v5589_v45  ;;  %v2736_v36 = vmul.f32 %v5756_v11, %v5617_v15  ;;  %v2737_v51 = vmul.f32 %v5756_v11, %v5623_v19 }
 0x859   : > { %v2785_v53 = vmul.f32 %v5759_v63, %v2752_v50  ;;  %v2761_v12 = vmul.f32 %v5759_v63, %v2728_v25  ;;  %v2762_v27 = vmul.f32 %v5759_v63, %v2729_v28  ;;  %v2786_v42 = vmul.f32 %v5759_v63, %v2753_v47 }
 0x85a   : > { %v2738_v31 = vmul.f32 %v5756_v11, %v5629_v23  ;;  %v2739_v14 = vmul.f32 %v5756_v11, %v5635_v16  ;;  %v2754_v8 = vmul.f32 %v5756_v11, %v5721_v24  ;;  %v2763_v45 = vmul.f32 %v5759_v63, %v2730_v7 }
 0x85b   : > { %v2794_v43 = vadd.f32 %v5766_v2, %v2761_v12  ;;  %v2818_v48 = vadd.f32 %v5766_v2, %v2785_v53  ;;  %v2795_v60 = vadd.f32 %v5766_v2, %v2762_v27  ;;  %v2740_v15 = vmul.f32 %v5756_v11, %v5641_v33 }
 0x85c   : > { %v2741_v19 = vmul.f32 %v5756_v11, %v5647_v46  ;;  %v2742_v23 = vmul.f32 %v5756_v11, %v5653_v21  ;;  %v2819_v44 = vadd.f32 %v5766_v2, %v2786_v42  ;;  %v2743_v16 = vmul.f32 %v5756_v11, %v5659_v37 }
 0x85d   : > { %v2826_v58 = vmax.f32 %v2794_v43, 0.0  ;;  %v2850_v54 = vmax.f32 %v2818_v48, 0.0  ;;  %v2744_v24 = vmul.f32 %v5756_v11, %v5665_v55  ;;  %v2745_v1 = vmul.f32 %v5756_v11, %v5671_v49 }
 0x85e   : > { %v2746_v33 = vmul.f32 %v5756_v11, %v5677_v10  ;;  %v2747_v46 = vmul.f32 %v5756_v11, %v5683_v17  ;;  %v2748_v21 = vmul.f32 %v5756_v11, %v5689_v35  ;;  %v2749_v32 = vmul.f32 %v5756_v11, %v5695_v56 }
 0x85f   : > { %2894 = vmatmul.f32.vlgmr.msra.gmra.mxu2 %v2826_v58  ;;  %2966 = vmatmul.f32.vlgmr.msra.gmra.mxu3 %v2850_v54  ;;  %v2750_v37 = vmul.f32 %v5756_v11, %v5701_v4  ;;  %v2755_v55 = vmul.f32 %v5756_v11, %v5727_v30  ;;  %v2827_v40 = vmax.f32 %v2795_v60, 0.0  ;;  %v2796_v49 = vadd.f32 %v5766_v2, %v2763_v45 }
 0x860   : > { %v2787_v10 = vmul.f32 %v5759_v63, %v2754_v8  ;;  %v2851_v26 = vmax.f32 %v2819_v44, 0.0  ;;  %v2769_v17 = vmul.f32 %v5759_v63, %v2736_v36  ;;  %v2770_v29 = vmul.f32 %v5759_v63, %v2737_v51 }
 0x861   : > { %v2771_v35 = vmul.f32 %v5759_v63, %v2738_v31  ;;  %v2772_v56 = vmul.f32 %v5759_v63, %v2739_v14  ;;  %v2773_v20 = vmul.f32 %v5759_v63, %v2740_v15  ;;  %v2774_v4 = vmul.f32 %v5759_v63, %v2741_v19 }
 0x862   : > { %v2775_v30 = vmul.f32 %v5759_v63, %v2742_v23  ;;  %v5829_v6 = vadd.f32 %v5766_v2, %v2769_v17  ;;  %v5832_v9 = vadd.f32 %v5766_v2, %v2770_v29  ;;  %v2820_v25 = vadd.f32 %v5766_v2, %v2787_v10 }
 0x863   : > { %v5835_v13 = vadd.f32 %v5766_v2, %v2771_v35  ;;  %v5838_v61 = vadd.f32 %v5766_v2, %v2772_v56  ;;  %v5841_v38 = vadd.f32 %v5766_v2, %v2773_v20  ;;  %v5844_v22 = vadd.f32 %v5766_v2, %v2774_v4 }
 0x864   : > { %v5847_v62 = vadd.f32 %v5766_v2, %v2775_v30  ;;  %v2776_v50 = vmul.f32 %v5759_v63, %v2743_v16  ;;  %v2751_v28 = vmul.f32 %v5756_v11, %v5707_v59  ;;  %v2828_v47 = vmax.f32 %v2796_v49, 0.0 }
 0x865   : > { %v2764_v53 = vmul.f32 %v5759_v63, %v2731_v18  ;;  %v2788_v12 = vmul.f32 %v5759_v63, %v2755_v55  ;;  %v2777_v48 = vmul.f32 %v5759_v63, %v2744_v24  ;;  %v2778_v7 = vmul.f32 %v5759_v63, %v2745_v1 }
 0x866   : > { %v5856_v43 = vadd.f32 %v5766_v2, %v2776_v50  ;;  %v2779_v27 = vmul.f32 %v5759_v63, %v2746_v33  ;;  %v2780_v58 = vmul.f32 %v5759_v63, %v2747_v46  ;;  %v2781_v54 = vmul.f32 %v5759_v63, %v2748_v21 }
 0x867   : > { %2897 = vmatmul.f32.gmra.mxu2 %v2827_v40  ;;  %2969 = vmatmul.f32.gmra.mxu3 %v2851_v26  ;;  %v2782_v59 = vmul.f32 %v5759_v63, %v2749_v32  ;;  %v2783_v42 = vmul.f32 %v5759_v63, %v2750_v37  ;;  %v2852_v18 = vmax.f32 %v2820_v25, 0.0  ;;  %v5866_v36 = vadd.f32 %v5766_v2, %v2777_v48 }
 0x868   : > { %v5869_v51 = vadd.f32 %v5766_v2, %v2778_v7  ;;  %v5872_v31 = vadd.f32 %v5766_v2, %v2779_v27  ;;  %v5875_v14 = vadd.f32 %v5766_v2, %v2780_v58  ;;  %v5878_v8 = vadd.f32 %v5766_v2, %v2781_v54 }
 0x869   : > { %v5881_v60 = vadd.f32 %v5766_v2, %v2782_v59  ;;  %v5884_v45 = vadd.f32 %v5766_v2, %v2783_v42  ;;  %v2784_v15 = vmul.f32 %v5759_v63, %v2751_v28  ;;  %v2732_v19 = vmul.f32 %v5756_v11, %v5593_v34 }
 0x86a   : > { %v2756_v23 = vmul.f32 %v5756_v11, %v5734_v39  ;;  %v2797_v44 = vadd.f32 %v5766_v2, %v2764_v53  ;;  %v2821_v16 = vadd.f32 %v5766_v2, %v2788_v12  ;;  %v2733_v34 = vmul.f32 %v5756_v11, %v5599_v41 }
 0x86b   : > { %v5894_v24 = vadd.f32 %v5766_v2, %v2784_v15  ;;  %v2765_v46 = vmul.f32 %v5759_v63, %v2732_v19  ;;  %v2757_v39 = vmul.f32 %v5756_v11, %v5741_v0  ;;  %v2734_v26 = vmul.f32 %v5756_v11, %v5605_v57 }
 0x86c   : > { %v2829_v1 = vmax.f32 %v2797_v44, 0.0  ;;  %v2853_v33 = vmax.f32 %v2821_v16, 0.0  ;;  %v2789_v21 = vmul.f32 %v5759_v63, %v2756_v23  ;;  %v2766_v49 = vmul.f32 %v5759_v63, %v2733_v34 }
 0x86d   : > { %v2798_v32 = vadd.f32 %v5766_v2, %v2765_v46  ;;  %v2790_v10 = vmul.f32 %v5759_v63, %v2757_v39  ;;  %v2758_v41 = vmul.f32 %v5756_v11, %v5746_v5  ;;  %v2767_v56 = vmul.f32 %v5759_v63, %v2734_v26 }
 0x86e   : > { %v2822_v37 = vadd.f32 %v5766_v2, %v2789_v21  ;;  %v2799_v0 = vadd.f32 %v5766_v2, %v2766_v49  ;;  %v2735_v4 = vmul.f32 %v5756_v11, %v5611_v3  ;;  %v2759_v57 = vmul.f32 %v5756_v11, %v5751_v52 }
 0x86f   : > { %2900 = vmatmul.f32.gmra.mxu2 %v2828_v47  ;;  %2972 = vmatmul.f32.gmra.mxu3 %v2852_v18  ;;  %v2830_v55 = vmax.f32 %v2798_v32, 0.0  ;;  %v2823_v17 = vadd.f32 %v5766_v2, %v2790_v10  ;;  %v2791_v20 = vmul.f32 %v5759_v63, %v2758_v41  ;;  %v2800_v5 = vadd.f32 %v5766_v2, %v2767_v56 }
 0x870   : > { %v2854_v40 = vmax.f32 %v2822_v37, 0.0  ;;  %v2831_v29 = vmax.f32 %v2799_v0, 0.0  ;;  %v2768_v28 = vmul.f32 %v5759_v63, %v2735_v4  ;;  %v2792_v47 = vmul.f32 %v5759_v63, %v2759_v57 }
 0x871   : > { %v2855_v35 = vmax.f32 %v2823_v17, 0.0  ;;  %v2824_v30 = vadd.f32 %v5766_v2, %v2791_v20  ;;  %v2832_v25 = vmax.f32 %v2800_v5, 0.0  ;;  %v2834_v52 = vmax.f32 %v5829_v6, 0.0 }
 0x872   : > { %v2801_v53 = vadd.f32 %v5766_v2, %v2768_v28  ;;  %v2825_v12 = vadd.f32 %v5766_v2, %v2792_v47  ;;  %v2835_v11 = vmax.f32 %v5832_v9, 0.0  ;;  %v2836_v7 = vmax.f32 %v5835_v13, 0.0  ;;  %v5933_v13 = vld [vmem:[#allocation10 + $0x10] ss:$0 sm:$0xff] }
 0x873   : > { %v2856_v50 = vmax.f32 %v2824_v30, 0.0  ;;  %v2837_v63 = vmax.f32 %v5838_v61, 0.0  ;;  %v2838_v27 = vmax.f32 %v5841_v38, 0.0  ;;  %v2839_v2 = vmax.f32 %v5844_v22, 0.0 }
 0x874   : > { %v2833_v3 = vmax.f32 %v2801_v53, 0.0  ;;  %v2857_v48 = vmax.f32 %v2825_v12, 0.0  ;;  %v2840_v58 = vmax.f32 %v5847_v62, 0.0  ;;  %v2841_v6 = vmax.f32 %v5856_v43, 0.0 }
 0x875   : > { %v2842_v9 = vmax.f32 %v5866_v36, 0.0  ;;  %v2843_v22 = vmax.f32 %v5869_v51, 0.0  ;;  %v2844_v36 = vmax.f32 %v5872_v31, 0.0  ;;  %v2845_v51 = vmax.f32 %v5875_v14, 0.0 }
 0x876   : > { %v2846_v31 = vmax.f32 %v5878_v8, 0.0  ;;  %v2847_v14 = vmax.f32 %v5881_v60, 0.0  ;;  %v2848_v8 = vmax.f32 %v5884_v45, 0.0  ;;  %v2849_v60 = vmax.f32 %v5894_v24, 0.0 }
 0x877   : > { %2903 = vmatmul.f32.gmra.mxu2 %v2829_v1  ;;  %2975 = vmatmul.f32.gmra.mxu3 %v2853_v33 }
 0x87f   : > { %2906 = vmatmul.f32.gmra.mxu2 %v2830_v55  ;;  %2978 = vmatmul.f32.gmra.mxu3 %v2854_v40 }
 0x887   : > { %2909 = vmatmul.f32.gmra.mxu2 %v2831_v29  ;;  %2981 = vmatmul.f32.gmra.mxu3 %v2855_v35 }
 0x88f   : > { %2912 = vmatmul.f32.gmra.mxu2 %v2832_v25  ;;  %2984 = vmatmul.f32.gmra.mxu3 %v2856_v50 }
 0x897   : > { %2915 = vmatmul.f32.gmra.mxu2 %v2833_v3  ;;  %2987 = vmatmul.f32.gmra.mxu3 %v2857_v48 }
 0x89f   : > { %2918 = vmatmul.f32.gmra.mxu2 %v2834_v52 }
 0x8a7   : > { %2921 = vmatmul.f32.gmra.mxu2 %v2835_v11 }
 0x8af   : > { %2924 = vmatmul.f32.gmra.mxu2 %v2836_v7 }
 0x8b7   : > { %2927 = vmatmul.f32.gmra.mxu2 %v2837_v63 }
 0x8bf   : > { %2930 = vmatmul.f32.gmra.mxu2 %v2838_v27 }
 0x8c7   : > { %2933 = vmatmul.f32.gmra.mxu2 %v2839_v2 }
 0x8cf   : > { %2936 = vmatmul.f32.gmra.mxu2 %v2840_v58 }
 0x8d7   : > { %2939 = vmatmul.f32.gmra.mxu2 %v2841_v6 }
 0x8df   : > { %2942 = vmatmul.f32.gmra.mxu2 %v2842_v9 }
 0x8e2   : > { %v2895_v54 = vpop.f32.mrf.mxu2  ;;  %v2967_v61 = vpop.f32.mrf.mxu3 }
 0x8e3   : > { %v2896_v59 = vadd.f32 %v5933_v13, %v2895_v54  ;;  %v2968_v38 = vadd.f32 %v5933_v13, %v2967_v61 }
 0x8e5   : > { %2991 = vst [vmem:[#allocation12] sm:$0xff] %v2896_v59 }
 0x8e6   : > { %3015 = vst [vmem:[#allocation12 + $0xc0] sm:$0xff] %v2968_v38 }
 0x8e7   : > { %2945 = vmatmul.f32.gmra.mxu2 %v2843_v22 }
 0x8ea   : > { %v2898_v62 = vpop.f32.mrf.mxu2  ;;  %v2970_v42 = vpop.f32.mrf.mxu3 }
 0x8eb   : > { %v2899_v43 = vadd.f32 %v5933_v13, %v2898_v62  ;;  %v2971_v18 = vadd.f32 %v5933_v13, %v2970_v42 }
 0x8ed   : > { %2992 = vst [vmem:[#allocation12 + $0x8] sm:$0xff] %v2899_v43 }
 0x8ee   : > { %3016 = vst [vmem:[#allocation12 + $0xc8] sm:$0xff] %v2971_v18 }
 0x8ef   : > { %2948 = vmatmul.f32.gmra.mxu2 %v2844_v36 }
 0x8f2   : > { %v2901_v15 = vpop.f32.mrf.mxu2  ;;  %v2973_v19 = vpop.f32.mrf.mxu3 }
 0x8f3   : > { %v2902_v23 = vadd.f32 %v5933_v13, %v2901_v15  ;;  %v2974_v44 = vadd.f32 %v5933_v13, %v2973_v19 }
 0x8f5   : > { %2993 = vst [vmem:[#allocation12 + $0x10] sm:$0xff] %v2902_v23 }
 0x8f6   : > { %3017 = vst [vmem:[#allocation12 + $0xd0] sm:$0xff] %v2974_v44 }
 0x8f7   : > { %2951 = vmatmul.f32.gmra.mxu2 %v2845_v51 }
 0x8fa   : > { %v2904_v16 = vpop.f32.mrf.mxu2  ;;  %v2976_v1 = vpop.f32.mrf.mxu3 }
 0x8fb   : > { %v2905_v33 = vadd.f32 %v5933_v13, %v2904_v16  ;;  %v2977_v46 = vadd.f32 %v5933_v13, %v2976_v1 }
 0x8fd   : > { %2994 = vst [vmem:[#allocation12 + $0x18] sm:$0xff] %v2905_v33 }
 0x8fe   : > { %3018 = vst [vmem:[#allocation12 + $0xd8] sm:$0xff] %v2977_v46 }
 0x8ff   : > { %2954 = vmatmul.f32.gmra.mxu2 %v2846_v31 }
 0x902   : > { %v2907_v21 = vpop.f32.mrf.mxu2  ;;  %v2979_v34 = vpop.f32.mrf.mxu3 }
 0x903   : > { %v2908_v39 = vadd.f32 %v5933_v13, %v2907_v21  ;;  %v2980_v32 = vadd.f32 %v5933_v13, %v2979_v34 }
 0x905   : > { %2995 = vst [vmem:[#allocation12 + $0x20] sm:$0xff] %v2908_v39 }
 0x906   : > { %3019 = vst [vmem:[#allocation12 + $0xe0] sm:$0xff] %v2980_v32 }
 0x907   : > { %2957 = vmatmul.f32.gmra.mxu2 %v2847_v14 }
 0x90a   : > { %v2910_v37 = vpop.f32.mrf.mxu2  ;;  %v2982_v55 = vpop.f32.mrf.mxu3 }
 0x90b   : > { %v2911_v40 = vadd.f32 %v5933_v13, %v2910_v37  ;;  %v2983_v49 = vadd.f32 %v5933_v13, %v2982_v55 }
 0x90d   : > { %2996 = vst [vmem:[#allocation12 + $0x28] sm:$0xff] %v2911_v40 }
 0x90e   : > { %3020 = vst [vmem:[#allocation12 + $0xe8] sm:$0xff] %v2983_v49 }
 0x90f   : > { %2960 = vmatmul.f32.gmra.mxu2 %v2848_v8 }
 0x912   : > { %v2913_v10 = vpop.f32.mrf.mxu2  ;;  %v2985_v26 = vpop.f32.mrf.mxu3 }
 0x913   : > { %v2914_v41 = vadd.f32 %v5933_v13, %v2913_v10  ;;  %v2986_v0 = vadd.f32 %v5933_v13, %v2985_v26 }
 0x915   : > { %2997 = vst [vmem:[#allocation12 + $0x30] sm:$0xff] %v2914_v41 }
 0x916   : > { %3021 = vst [vmem:[#allocation12 + $0xf0] sm:$0xff] %v2986_v0 }
 0x917   : > { %2963 = vmatmul.f32.gmra.mxu2 %v2849_v60 }
 0x91a   : > { %v2916_v17 = vpop.f32.mrf.mxu2  ;;  %v2988_v29 = vpop.f32.mrf.mxu3 }
 0x91b   : > { %v2917_v35 = vadd.f32 %v5933_v13, %v2916_v17  ;;  %v2989_v56 = vadd.f32 %v5933_v13, %v2988_v29 }
 0x91d   : > { %2998 = vst [vmem:[#allocation12 + $0x38] sm:$0xff] %v2917_v35 }
 0x91e   : > { %3022 = vst [vmem:[#allocation12 + $0xf8] sm:$0xff] %v2989_v56 }
 0x922   : > { %v2919_v45 = vpop.f32.mrf.mxu2 }
 0x923   : > { %v2920_v20 = vadd.f32 %v5933_v13, %v2919_v45 }
 0x925   : > { %2999 = vst [vmem:[#allocation12 + $0x40] sm:$0xff] %v2920_v20 }
 0x92a   : > { %v2922_v4 = vpop.f32.mrf.mxu2 }
 0x92b   : > { %v2923_v57 = vadd.f32 %v5933_v13, %v2922_v4 }
 0x92d   : > { %3000 = vst [vmem:[#allocation12 + $0x48] sm:$0xff] %v2923_v57 }
 0x932   : > { %v2925_v5 = vpop.f32.mrf.mxu2 }
 0x933   : > { %v2926_v24 = vadd.f32 %v5933_v13, %v2925_v5 }
 0x935   : > { %3001 = vst [vmem:[#allocation12 + $0x50] sm:$0xff] %v2926_v24 }
 0x93a   : > { %v2928_v30 = vpop.f32.mrf.mxu2 }
 0x93b   : > { %v2929_v25 = vadd.f32 %v5933_v13, %v2928_v30 }
 0x93d   : > { %3002 = vst [vmem:[#allocation12 + $0x58] sm:$0xff] %v2929_v25 }
 0x942   : > { %v2931_v50 = vpop.f32.mrf.mxu2 }
 0x943   : > { %v2932_v28 = vadd.f32 %v5933_v13, %v2931_v50 }
 0x945   : > { %3003 = vst [vmem:[#allocation12 + $0x60] sm:$0xff] %v2932_v28 }
 0x94a   : > { %v2934_v47 = vpop.f32.mrf.mxu2 }
 0x94b   : > { %v2935_v53 = vadd.f32 %v5933_v13, %v2934_v47 }
 0x94d   : > { %3004 = vst [vmem:[#allocation12 + $0x68] sm:$0xff] %v2935_v53 }
 0x952   : > { %v2937_v12 = vpop.f32.mrf.mxu2 }
 0x953   : > { %v2938_v3 = vadd.f32 %v5933_v13, %v2937_v12 }
 0x955   : > { %3005 = vst [vmem:[#allocation12 + $0x70] sm:$0xff] %v2938_v3 }
 0x95a   : > { %v2940_v48 = vpop.f32.mrf.mxu2 }
 0x95b   : > { %v2941_v52 = vadd.f32 %v5933_v13, %v2940_v48 }
 0x95d   : > { %3006 = vst [vmem:[#allocation12 + $0x78] sm:$0xff] %v2941_v52 }
 0x962   : > { %v2943_v11 = vpop.f32.mrf.mxu2 }
 0x963   : > { %v2944_v7 = vadd.f32 %v5933_v13, %v2943_v11 }
 0x965   : > { %3007 = vst [vmem:[#allocation12 + $0x80] sm:$0xff] %v2944_v7 }
 0x96a   : > { %v2946_v63 = vpop.f32.mrf.mxu2 }
 0x96b   : > { %v2947_v27 = vadd.f32 %v5933_v13, %v2946_v63 }
 0x96d   : > { %3008 = vst [vmem:[#allocation12 + $0x88] sm:$0xff] %v2947_v27 }
 0x972   : > { %v2949_v2 = vpop.f32.mrf.mxu2 }
 0x973   : > { %v2950_v58 = vadd.f32 %v5933_v13, %v2949_v2 }
 0x975   : > { %3009 = vst [vmem:[#allocation12 + $0x90] sm:$0xff] %v2950_v58 }
 0x97a   : > { %v2952_v6 = vpop.f32.mrf.mxu2 }
 0x97b   : > { %v2953_v9 = vadd.f32 %v5933_v13, %v2952_v6 }
 0x97d   : > { %3010 = vst [vmem:[#allocation12 + $0x98] sm:$0xff] %v2953_v9 }
 0x982   : > { %v2955_v54 = vpop.f32.mrf.mxu2 }
 0x983   : > { %v2956_v61 = vadd.f32 %v5933_v13, %v2955_v54 }
 0x985   : > { %3011 = vst [vmem:[#allocation12 + $0xa0] sm:$0xff] %v2956_v61 }
 0x98a   : > { %v2958_v59 = vpop.f32.mrf.mxu2 }
 0x98b   : > { %v2959_v38 = vadd.f32 %v5933_v13, %v2958_v59 }
 0x98d   : > { %3012 = vst [vmem:[#allocation12 + $0xa8] sm:$0xff] %v2959_v38 }
 0x992   : > { %v2961_v22 = vpop.f32.mrf.mxu2 }
 0x993   : > { %v2962_v62 = vadd.f32 %v5933_v13, %v2961_v22 }
 0x995   : > { %3013 = vst [vmem:[#allocation12 + $0xb0] sm:$0xff] %v2962_v62 }
 0x99a   : > { %v2964_v42 = vpop.f32.mrf.mxu2 }
 0x99b   : > { %v2965_v43 = vadd.f32 %v5933_v13, %v2964_v42 }
 0x99d   : > { %3014 = vst [vmem:[#allocation12 + $0xb8] sm:$0xff] %v2965_v43 }
 0x99e PF: > { %p3544_p8 = scmp.eq.s32.totalorder %s3935_s23, 3  ;;  %s3030_s28 = sshll.u32 %s6006_s4, 4  ;;  %s3031_s28 = int_to_ptr.hbm [resolvable:$true] %s3030_s28 }
 0x99f   : > { %s3868_s6 = smov [#allocation12]   ;;  %s3869_s25 = smov 128  }
 0x9a0   : > { %s3028_s7 = sshll.u32 %s3868_s6, 4  ;;  %s3870_s26 = smov 8   ;;  %s3029_s7 = int_to_ptr.vmem [resolvable:$true] %s3028_s7 }
 0x9a1   : > { %3520 = dma.vmem_to_hbm [thread:$0]  (%p3544_p8), %s3029_s7, 4096, %s3031_s28, [#allocation6], %s3869_s25, %s3869_s25, %s3870_s26  }
 0x9a2   : > { %3826 = dma.done.wait (%p3544_p8), [#allocation6], 4096  }
 0x9a3   : > { %3828 = vsyncadd (%p3544_p8), [#allocation6], 4294963200 }
 0x9a4 PF: > { %s20_s22 = sadd.s32 1, %s3859_s22   ;;  %s6017_s15 = smov %s3835_s16 }
 0x9a5   : > { %p17_p9 = scmp.ge.s32.totalorder %s20_s22, 6   ;;  %s6018_s16 = smov %s3839_s17 }
 0x9a6   : > { %s6019_s17 = smov %s3996_s11  ;;  %s6020_s18 = smov %s3851_s20 }
 0x9a7   : > { %s6021_s19 = smov %s3855_s21  ;;  %s6022_s20 = smov %s6025_s30 }
 0x9a8   : > { %s6023_s21 = smov %s6029_s8  ;;  %19 = sbr.rel (!%p17_p9) target bundleno = 10 (0xa), region = 111 }
 0x9ad   :  { %3047 = vsyncpa [#allocation5], 1 }
 0x9ae   :  { %3049 = vsyncpa [#allocation5 + $0x1], 1 }
 0x9af   :  { %3050 = vsyncpa [#allocation8], 1 }
 0x9b0   :  { %3052 = vsyncpa [#allocation8 + $0x1], 1 }
 0x9b1   :  { %3053 = vsyncpa [#allocation11], 1 }
 0x9b2   :  { %3054 = vsyncpa [#allocation6], 1 }
 0x9b3   :  { %3056 = vsyncpa [#allocation6 + $0x1], 1 }

</bundles_post_ra>
